<compile_context>
chip_gen: v6e
topology: v6e:2x2x1
jax: 0.10.0
libtpu: 0.0.40
codegen_flags: <defaults>
</compile_context>

<pallas_src>
import functools
import math

import numpy as np
import jax
import jax.numpy as jnp
from jax.experimental import pallas as pl
from jax.experimental.pallas import tpu as pltpu


_LN_EPS = 1e-5                       # PyTorch nn.LayerNorm default
_VMEM_LIMIT = 48 * 1024 * 1024       # safe on v5e/v6e (128 MiB) and v7x (64 MiB)


# ----------------------------------------------------------------------------
# small math helpers (used inside kernels and in the pure-JAX reference)
# ----------------------------------------------------------------------------

def _erf_poly(x):
    # float32-accurate erf (Abramowitz & Stegun 7.1.26, |err| < 1.5e-7), built
    # only from ops that lower cleanly on Mosaic (exp/mul/add/where).
    # TODO(synk): switch to a native lax.erf lowering once guaranteed on Mosaic.
    a1, a2, a3, a4, a5 = (0.254829592, -0.284496736, 1.421413741,
                          -1.453152027, 1.061405429)
    p = 0.3275911
    sgn = jnp.where(x >= 0.0, 1.0, -1.0)
    ax = jnp.abs(x)
    t = 1.0 / (1.0 + p * ax)
    poly = ((((a5 * t + a4) * t + a3) * t + a2) * t + a1) * t
    return sgn * (1.0 - poly * jnp.exp(-ax * ax))


def _gelu_exact(x):
    # exact (erf-based) GELU, matching PyTorch nn.GELU(approximate='none')
    return 0.5 * x * (1.0 + _erf_poly(x * (1.0 / math.sqrt(2.0))))


def _layernorm(x, gamma, beta):
    mu = jnp.mean(x, axis=-1, keepdims=True)
    var = jnp.mean((x - mu) * (x - mu), axis=-1, keepdims=True)
    return (x - mu) * jax.lax.rsqrt(var + _LN_EPS) * gamma + beta


# ----------------------------------------------------------------------------
# tile-size helpers
# ----------------------------------------------------------------------------

def _row_tile(total, target):
    """Largest row tile <= target that divides `total` and is sublane friendly."""
    t = min(total, target)
    while t > 0:
        if total % t == 0 and (t % 8 == 0 or t == total):
            return t
        t -= 1
    return total


def _pick_window_batch(total_windows, n_w, n_tok, dim, target_rows=256):
    """Windows per grid step: WB | total_windows, WB compatible with the (nW,N,N)
    mask (WB % nW == 0 or nW % WB == 0), and WB*N close to the MXU-friendly
    target while keeping the per-step f32 intermediates inside a VMEM budget."""
    # per-row f32 live data ~ qkv(3C) + x/out/slab(~5C) + one head's scores(N)
    budget = 12 * 1024 * 1024
    bytes_per_row = 4 * (8 * dim + n_tok)
    max_rows = max(n_tok, min(4096, budget // bytes_per_row))
    cands = [wb for wb in range(1, total_windows + 1)
             if total_windows % wb == 0
             and (wb % n_w == 0 or n_w % wb == 0)
             and wb * n_tok <= max_rows]
    good = [wb for wb in cands if wb * n_tok >= target_rows]
    return min(good) if good else max(cands)


# ----------------------------------------------------------------------------
# Pallas kernels
# ----------------------------------------------------------------------------

def _ln_kernel(x_ref, g_ref, b_ref, o_ref):
    x = x_ref[...].astype(jnp.float32)
    o_ref[...] = _layernorm(x, g_ref[...], b_ref[...]).astype(o_ref.dtype)


def _attn_kernel(*refs, num_heads, scale, n_w, wb, use_mask, fuse_ln):
    if use_mask:
        (x_ref, mask_ref, g1_ref, b1_ref, qkvw_ref, qkvb_ref, rpb_ref,
         pw_ref, pb_ref, o_ref, acc_ref) = refs
    else:
        (x_ref, g1_ref, b1_ref, qkvw_ref, qkvb_ref, rpb_ref,
         pw_ref, pb_ref, o_ref, acc_ref) = refs
        mask_ref = None

    WB, N, C = x_ref.shape
    D = C // num_heads
    T = WB * N

    x = x_ref[...].astype(jnp.float32)                       # (WB, N, C)
    if fuse_ln:
        # norm1 fused here (only valid when no spatial zero-padding was added)
        x = _layernorm(x, g1_ref[...], b1_ref[...])

    xb = x.reshape(T, C).astype(jnp.bfloat16)
    qkv = jnp.dot(xb, qkvw_ref[...],
                  preferred_element_type=jnp.float32) + qkvb_ref[...]  # (T, 3C) f32
    qkv_bf = qkv.astype(jnp.bfloat16)

    if use_mask:
        mask = mask_ref[...]
        if wb % n_w == 0:
            # block spans wb//n_w full batches' window sets -> broadcast over batch
            mask = jnp.broadcast_to(mask[None], (wb // n_w, n_w, N, N)
                                    ).reshape(wb, N, N)
        # else: BlockSpec already delivered exactly this block's (wb, N, N) slice

    for h in range(num_heads):
        q = qkv_bf[:, h * D:(h + 1) * D].reshape(WB, N, D)
        k = qkv_bf[:, C + h * D: C + (h + 1) * D].reshape(WB, N, D)
        v = qkv_bf[:, 2 * C + h * D: 2 * C + (h + 1) * D].reshape(WB, N, D)

        # scores for all WB windows at once (window axis is a batch dim)
        s = jax.lax.dot_general(
            q, k, (((2,), (2,)), ((0,), (0,))),
            preferred_element_type=jnp.float32)              # (WB, N, N)
        s = s * scale + rpb_ref[h]
        if use_mask:
            s = s + mask

        s = s - jnp.max(s, axis=-1, keepdims=True)
        p = jnp.exp(s)
        p = p * pl.reciprocal(jnp.sum(p, axis=-1, keepdims=True), approx=True)

        o = jax.lax.dot_general(
            p.astype(jnp.bfloat16), v, (((2,), (1,)), ((0,), (0,))),
            preferred_element_type=jnp.float32)              # (WB, N, D)
        # write this head into the output slab at its static lane offset
        acc_ref[:, :, h * D:(h + 1) * D] = o

    heads = acc_ref[...].reshape(T, C).astype(jnp.bfloat16)
    out = jnp.dot(heads, pw_ref[...],
                  preferred_element_type=jnp.float32) + pb_ref[...]
    o_ref[...] = out.reshape(WB, N, C).astype(o_ref.dtype)


def _mlp_kernel(sc_ref, at_ref, g_ref, b_ref, w1_ref, b1_ref, w2_ref, b2_ref, o_ref):
    # z = shortcut + attn_out ; out = z + fc2(gelu(fc1(LN(z))))
    z = sc_ref[...].astype(jnp.float32) + at_ref[...].astype(jnp.float32)
    y = _layernorm(z, g_ref[...], b_ref[...])
    h = jnp.dot(y.astype(jnp.bfloat16), w1_ref[...],
                preferred_element_type=jnp.float32) + b1_ref[...]
    h = _gelu_exact(h)
    m = jnp.dot(h.astype(jnp.bfloat16), w2_ref[...],
                preferred_element_type=jnp.float32) + b2_ref[...]
    o_ref[...] = (z + m).astype(o_ref.dtype)


# ----------------------------------------------------------------------------
# Pallas wrappers
# ----------------------------------------------------------------------------

def layernorm_pallas(x2d, gamma, beta):
    """Row-tiled standalone LayerNorm (only used on the padded path)."""
    R, C = x2d.shape
    TM = _row_tile(R, 1024)
    return pl.pallas_call(
        _ln_kernel,
        out_shape=jax.ShapeDtypeStruct((R, C), x2d.dtype),
        grid=(R // TM,),
        in_specs=[pl.BlockSpec((TM, C), lambda i: (i, 0)),
                  pl.BlockSpec((1, C), lambda i: (0, 0)),
                  pl.BlockSpec((1, C), lambda i: (0, 0))],
        out_specs=pl.BlockSpec((TM, C), lambda i: (i, 0)),
        compiler_params=pltpu.CompilerParams(
            dimension_semantics=("parallel",),
            vmem_limit_bytes=_VMEM_LIMIT),
    )(x2d, gamma.reshape(1, -1), beta.reshape(1, -1))


def window_attention_pallas(xw, attn_mask, gamma1, beta1, qkv_w, qkv_b, rpb,
                            proj_w, proj_b, *, num_heads, scale, n_w,
                            use_mask, fuse_ln):
    TW, N, C = xw.shape
    WB = _pick_window_batch(TW, n_w, N, C)
    grid = (TW // WB,)

    kernel = functools.partial(_attn_kernel, num_heads=num_heads, scale=scale,
                               n_w=n_w, wb=WB, use_mask=use_mask, fuse_ln=fuse_ln)

    in_specs = [pl.BlockSpec((WB, N, C), lambda i: (i, 0, 0))]
    inputs = [xw]
    if use_mask:
        if WB % n_w == 0:
            # block covers whole batches: ship the full (nW, N, N) mask once;
            # broadcast across batch happens in-kernel
            in_specs.append(pl.BlockSpec((n_w, N, N), lambda i: (0, 0, 0)))
        else:
            # block is a sub-range of one batch's window set: let the BlockSpec
            # DMA exactly the needed (WB, N, N) slice (no in-kernel dyn slice)
            reps = n_w // WB
            in_specs.append(
                pl.BlockSpec((WB, N, N), lambda i, reps=reps: (i % reps, 0, 0)))
        inputs.append(attn_mask)
    in_specs += [
        pl.BlockSpec((1, C), lambda i: (0, 0)),          # norm1 gamma
        pl.BlockSpec((1, C), lambda i: (0, 0)),          # norm1 beta
        pl.BlockSpec((C, 3 * C), lambda i: (0, 0)),      # qkv weight (bf16)
        pl.BlockSpec((1, 3 * C), lambda i: (0, 0)),      # qkv bias
        pl.BlockSpec((num_heads, N, N), lambda i: (0, 0, 0)),  # rel-pos bias
        pl.BlockSpec((C, C), lambda i: (0, 0)),          # proj weight (bf16)
        pl.BlockSpec((1, C), lambda i: (0, 0)),          # proj bias
    ]
    inputs += [gamma1.reshape(1, -1), beta1.reshape(1, -1),
               qkv_w, qkv_b.reshape(1, -1), rpb, proj_w, proj_b.reshape(1, -1)]

    return pl.pallas_call(
        kernel,
        out_shape=jax.ShapeDtypeStruct((TW, N, C), xw.dtype),
        grid=grid,
        in_specs=in_specs,
        out_specs=pl.BlockSpec((WB, N, C), lambda i: (i, 0, 0)),
        scratch_shapes=[pltpu.VMEM((WB, N, C), jnp.float32)],
        compiler_params=pltpu.CompilerParams(
            dimension_semantics=("parallel",),
            vmem_limit_bytes=_VMEM_LIMIT),
    )(*inputs)


def mlp_residual_pallas(shortcut2d, attn2d, g2, b2, w1, b1, w2, b2fc):
    R, C = shortcut2d.shape
    Hd = w1.shape[1]
    # keep the TM*Hd f32 intermediate modest (TODO(synk): query get_tpu_info and
    # shrink further on v7x's 64 MiB VMEM for very large hidden dims)
    target = 512 if Hd * 512 * 4 <= (8 << 20) else 256
    TM = _row_tile(R, target)
    return pl.pallas_call(
        _mlp_kernel,
        out_shape=jax.ShapeDtypeStruct((R, C), shortcut2d.dtype),
        grid=(R // TM,),
        in_specs=[
            pl.BlockSpec((TM, C), lambda i: (i, 0)),
            pl.BlockSpec((TM, C), lambda i: (i, 0)),
            pl.BlockSpec((1, C), lambda i: (0, 0)),
            pl.BlockSpec((1, C), lambda i: (0, 0)),
            pl.BlockSpec((C, Hd), lambda i: (0, 0)),
            pl.BlockSpec((1, Hd), lambda i: (0, 0)),
            pl.BlockSpec((Hd, C), lambda i: (0, 0)),
            pl.BlockSpec((1, C), lambda i: (0, 0)),
        ],
        out_specs=pl.BlockSpec((TM, C), lambda i: (i, 0)),
        compiler_params=pltpu.CompilerParams(
            dimension_semantics=("parallel",),
            vmem_limit_bytes=_VMEM_LIMIT),
    )(shortcut2d, attn2d, g2.reshape(1, -1), b2.reshape(1, -1),
      w1, b1.reshape(1, -1), w2, b2fc.reshape(1, -1))


# ----------------------------------------------------------------------------
# Glue (pure JAX / numpy): padding, cyclic shift, window partition/reverse
# ----------------------------------------------------------------------------

def window_partition(x, ws):
    B, H, W, C = x.shape
    x = x.reshape(B, H // ws, ws, W // ws, ws, C)
    return x.transpose(0, 1, 3, 2, 4, 5).reshape(-1, ws, ws, C)


def window_reverse(windows, ws, Hp, Wp):
    B = windows.shape[0] // ((Hp // ws) * (Wp // ws))
    x = windows.reshape(B, Hp // ws, Wp // ws, ws, ws, -1)
    return x.transpose(0, 1, 3, 2, 4, 5).reshape(B, Hp, Wp, -1)


def relative_position_index(ws):
    wh, ww = ws, ws
    coords = np.stack(np.meshgrid(np.arange(wh), np.arange(ww), indexing="ij"))
    coords_flat = coords.reshape(2, -1)
    rel = coords_flat[:, :, None] - coords_flat[:, None, :]
    rel = rel.transpose(1, 2, 0).copy()
    rel[:, :, 0] += wh - 1
    rel[:, :, 1] += ww - 1
    rel[:, :, 0] *= 2 * ww - 1
    return rel.sum(-1)  # (N, N) int


def compute_shift_mask(H, W, ws, ss):
    """Replicates the mask_matrix built in Swin's BasicLayer (0 / -100). numpy-only."""
    Hp = int(np.ceil(H / ws)) * ws
    Wp = int(np.ceil(W / ws)) * ws
    img_mask = np.zeros((1, Hp, Wp, 1), dtype=np.float32)
    h_slices = (slice(0, -ws), slice(-ws, -ss), slice(-ss, None))
    w_slices = (slice(0, -ws), slice(-ws, -ss), slice(-ss, None))
    cnt = 0
    for hs in h_slices:
        for wsl in w_slices:
            img_mask[:, hs, wsl, :] = cnt
            cnt += 1
    mw = (img_mask.reshape(1, Hp // ws, ws, Wp // ws, ws, 1)
          .transpose(0, 1, 3, 2, 4, 5).reshape(-1, ws * ws))
    attn_mask = mw[:, None, :] - mw[:, :, None]
    attn_mask = np.where(attn_mask != 0, -100.0, 0.0).astype(np.float32)
    return jnp.asarray(attn_mask)  # (nW, N, N)


def gather_rpb(params, ws, num_heads):
    rel_idx = relative_position_index(ws).reshape(-1)
    N = ws * ws
    rpb = params["rpb_table"][rel_idx].reshape(N, N, num_heads)
    return jnp.transpose(rpb, (2, 0, 1)).astype(jnp.float32)   # (nH, N, N)


# ----------------------------------------------------------------------------
# Full SwinTransformerBlock forward (Pallas path)
# ----------------------------------------------------------------------------

def swin_block_forward(x, mask_matrix, params, *, H, W, window_size, shift_size,
                       num_heads):
    B, L, C = x.shape
    assert L == H * W
    ws, ss = window_size, shift_size
    N = ws * ws

    shortcut = x

    pad_r = (ws - W % ws) % ws
    pad_b = (ws - H % ws) % ws
    padded = (pad_r > 0) or (pad_b > 0)

    if padded:
        # norm1 must run before zero padding -> standalone row-tiled LN kernel
        xn = layernorm_pallas(x.reshape(B * L, C),
                              params["norm1_w"], params["norm1_b"])
        xp = jnp.pad(xn.reshape(B, H, W, C),
                     ((0, 0), (0, pad_b), (0, pad_r), (0, 0)))
        fuse_ln = False
    else:
        # no padding: fuse norm1 into the attention kernel (LN is pointwise per
        # token, so it commutes with the roll / window-partition permutations)
        xp = x.reshape(B, H, W, C)
        fuse_ln = True
    Hp, Wp = H + pad_b, W + pad_r

    if ss > 0:
        shifted = jnp.roll(xp, shift=(-ss, -ss), axis=(1, 2))
        use_mask = True
        attn_mask = mask_matrix.astype(jnp.float32)       # (nW, N, N)
    else:
        shifted = xp
        use_mask = False                                  # mask-free kernel variant
        attn_mask = None

    xw = window_partition(shifted, ws).reshape(-1, N, C)  # (B*nW, N, C)
    nW = (Hp // ws) * (Wp // ws)

    # relative position bias gather is glue; the add happens inside the kernel
    rpb = gather_rpb(params, ws, num_heads)

    head_dim = C // num_heads
    scale = head_dim ** (-0.5)

    aw = window_attention_pallas(xw, attn_mask,
                                 params["norm1_w"], params["norm1_b"],
                                 params["qkv_w"], params["qkv_b"], rpb,
                                 params["proj_w"], params["proj_b"],
                                 num_heads=num_heads, scale=scale, n_w=nW,
                                 use_mask=use_mask, fuse_ln=fuse_ln)

    # window reverse + reverse shift + unpad
    aw = aw.reshape(-1, ws, ws, C)
    shifted_out = window_reverse(aw, ws, Hp, Wp)
    if ss > 0:
        xo = jnp.roll(shifted_out, shift=(ss, ss), axis=(1, 2))
    else:
        xo = shifted_out
    xo = xo[:, :H, :W, :].reshape(B * L, C)

    # residual + norm2 + MLP + residual (Pallas, fused, row-tiled)
    out = mlp_residual_pallas(shortcut.reshape(B * L, C), xo,
                              params["norm2_w"], params["norm2_b"],
                              params["fc1_w"], params["fc1_b"],
                              params["fc2_w"], params["fc2_b"])
    return out.reshape(B, L, C)


# ----------------------------------------------------------------------------
# Pure-JAX reference (same numerics: bf16 matmul operands, f32 accumulation)
# ----------------------------------------------------------------------------

def swin_block_reference(x, mask_matrix, params, *, H, W, window_size, shift_size,
                         num_heads):
    B, L, C = x.shape
    ws, ss = window_size, shift_size
    N = ws * ws
    D = C // num_heads
    scale = D ** (-0.5)

    shortcut = x
    xn = _layernorm(x.astype(jnp.float32), params["norm1_w"], params["norm1_b"])
    xp = xn.reshape(B, H, W, C)
    pad_r = (ws - W % ws) % ws
    pad_b = (ws - H % ws) % ws
    xp = jnp.pad(xp, ((0, 0), (0, pad_b), (0, pad_r), (0, 0)))
    Hp, Wp = H + pad_b, W + pad_r
    if ss > 0:
        xp = jnp.roll(xp, shift=(-ss, -ss), axis=(1, 2))
    xw = window_partition(xp, ws).reshape(-1, N, C)

    qkv = jnp.einsum('bnc,cd->bnd', xw.astype(jnp.bfloat16), params["qkv_w"],
                     preferred_element_type=jnp.float32) + params["qkv_b"]
    qkv = qkv.reshape(-1, N, 3, num_heads, D).transpose(2, 0, 3, 1, 4)
    q, k, v = qkv[0], qkv[1], qkv[2]
    attn = jnp.einsum('bhnd,bhmd->bhnm', q.astype(jnp.bfloat16),
                      k.astype(jnp.bfloat16),
                      preferred_element_type=jnp.float32) * scale
    attn = attn + gather_rpb(params, ws, num_heads)[None]
    if ss > 0:
        nW = mask_matrix.shape[0]
        attn = attn.reshape(-1, nW, num_heads, N, N) + mask_matrix[None, :, None]
        attn = attn.reshape(-1, num_heads, N, N)
    attn = jax.nn.softmax(attn, axis=-1)
    out = jnp.einsum('bhnm,bhmd->bhnd', attn.astype(jnp.bfloat16),
                     v.astype(jnp.bfloat16),
                     preferred_element_type=jnp.float32)
    out = out.transpose(0, 2, 1, 3).reshape(-1, N, C)
    out = jnp.einsum('bnc,cd->bnd', out.astype(jnp.bfloat16), params["proj_w"],
                     preferred_element_type=jnp.float32) + params["proj_b"]

    out = window_reverse(out.reshape(-1, ws, ws, C), ws, Hp, Wp)
    if ss > 0:
        out = jnp.roll(out, shift=(ss, ss), axis=(1, 2))
    out = out[:, :H, :W, :].reshape(B, L, C)

    z = shortcut + out
    y = _layernorm(z.astype(jnp.float32), params["norm2_w"], params["norm2_b"])
    h = jnp.einsum('blc,ch->blh', y.astype(jnp.bfloat16), params["fc1_w"],
                   preferred_element_type=jnp.float32) + params["fc1_b"]
    h = _gelu_exact(h)
    m = jnp.einsum('blh,hc->blc', h.astype(jnp.bfloat16), params["fc2_w"],
                   preferred_element_type=jnp.float32) + params["fc2_b"]
    return z + m


# ----------------------------------------------------------------------------
# Deterministic parameter construction
# ----------------------------------------------------------------------------

def make_params(key, dim, num_heads, window_size, mlp_ratio):
    hidden = int(dim * mlp_ratio)
    num_rel = (2 * window_size - 1) * (2 * window_size - 1)
    ks = jax.random.split(key, 10)
    p = {
        "norm1_w": jnp.ones((dim,), jnp.float32),
        "norm1_b": jnp.zeros((dim,), jnp.float32),
        "norm2_w": jnp.ones((dim,), jnp.float32),
        "norm2_b": jnp.zeros((dim,), jnp.float32),
        # Linear weights stored in (in, out) layout, bf16 for MXU fast path;
        # accumulation stays f32 inside the kernels.
        "qkv_w": (0.02 * jax.random.normal(ks[0], (dim, 3 * dim), jnp.float32)
                  ).astype(jnp.bfloat16),
        "qkv_b": 0.01 * jax.random.normal(ks[1], (3 * dim,), jnp.float32),
        "proj_w": (0.02 * jax.random.normal(ks[2], (dim, dim), jnp.float32)
                   ).astype(jnp.bfloat16),
        "proj_b": 0.01 * jax.random.normal(ks[3], (dim,), jnp.float32),
        "fc1_w": (0.02 * jax.random.normal(ks[4], (dim, hidden), jnp.float32)
                  ).astype(jnp.bfloat16),
        "fc1_b": 0.01 * jax.random.normal(ks[5], (hidden,), jnp.float32),
        "fc2_w": (0.02 * jax.random.normal(ks[6], (hidden, dim), jnp.float32)
                  ).astype(jnp.bfloat16),
        "fc2_b": 0.01 * jax.random.normal(ks[7], (dim,), jnp.float32),
        # trunc_normal_(std=0.02) stand-in (ckpt_window_size == window_size,
        # so the bilinear rpb-table resize branch is never taken)
        "rpb_table": 0.02 * jax.random.normal(ks[8], (num_rel, num_heads),
                                              jnp.float32),
    }
    return p


# ----------------------------------------------------------------------------
# Main
# ----------------------------------------------------------------------------

if __name__ == "__main__":
    B, H, W, C = 2, 8, 8, 32
    num_heads = 4
    window_size = 4
    shift_size = 2          # exercises SW-MSA (cyclic shift + mask)
    mlp_ratio = 4.0

    key = jax.random.PRNGKey(0)
    k_x, k_p = jax.random.split(key)
    x = jax.random.normal(k_x, (B, H * W, C), jnp.float32)
    params = make_params(k_p, C, num_heads, window_size, mlp_ratio)

    # mask_matrix is an input to forward (built by BasicLayer in the original code)
    mask_matrix = compute_shift_mask(H, W, window_size, shift_size)

    fwd = jax.jit(functools.partial(
        swin_block_forward, H=H, W=W, window_size=window_size,
        shift_size=shift_size, num_heads=num_heads))
    ref_fn = jax.jit(functools.partial(
        swin_block_reference, H=H, W=W, window_size=window_size,
        shift_size=shift_size, num_heads=num_heads))

    out = fwd(x, mask_matrix, params)
    out = jax.block_until_ready(out)
    ref = jax.block_until_ready(ref_fn(x, mask_matrix, params))

    assert out.shape == (B, H * W, C)
    assert bool(jnp.all(jnp.isfinite(out)))
    assert bool(jnp.allclose(out, ref, atol=2e-2, rtol=2e-2))
    print("KERNEL_OK")
</pallas_src>

<mosaic_0001>
module attributes {stable_mosaic.version = 11 : i64} {
  func.func @_attn_kernel(%arg0: i32, %arg1: memref<8x16x32xf32, #tpu.memory_space<vmem>>, %arg2: memref<4x16x16xf32, #tpu.memory_space<vmem>>, %arg3: memref<1x32xf32, #tpu.memory_space<vmem>>, %arg4: memref<1x32xf32, #tpu.memory_space<vmem>>, %arg5: memref<32x96xbf16, #tpu.memory_space<vmem>>, %arg6: memref<1x96xf32, #tpu.memory_space<vmem>>, %arg7: memref<4x16x16xf32, #tpu.memory_space<vmem>>, %arg8: memref<32x32xbf16, #tpu.memory_space<vmem>>, %arg9: memref<1x32xf32, #tpu.memory_space<vmem>>, %arg10: memref<8x16x32xf32, #tpu.memory_space<vmem>>, %arg11: memref<8x16x32xf32, #tpu.memory_space<vmem>>) attributes {dimension_semantics = [#tpu.dimension_semantics<parallel>], iteration_bounds = array<i64: 1>, scalar_prefetch = 0 : i64, scratch_operands = 1 : i64, tpu.core_type = #tpu.core_type<tc>, window_params = [{transform_indices = @transform_0, window_bounds = array<i64: 8, 16, 32>}, {pipeline_mode = #tpu.pipeline_mode<synchronous>, transform_indices = @transform_1, window_bounds = array<i64: 4, 16, 16>}, {pipeline_mode = #tpu.pipeline_mode<synchronous>, transform_indices = @transform_2, window_bounds = array<i64: 1, 32>}, {pipeline_mode = #tpu.pipeline_mode<synchronous>, transform_indices = @transform_3, window_bounds = array<i64: 1, 32>}, {pipeline_mode = #tpu.pipeline_mode<synchronous>, transform_indices = @transform_4, window_bounds = array<i64: 32, 96>}, {pipeline_mode = #tpu.pipeline_mode<synchronous>, transform_indices = @transform_5, window_bounds = array<i64: 1, 96>}, {pipeline_mode = #tpu.pipeline_mode<synchronous>, transform_indices = @transform_6, window_bounds = array<i64: 4, 16, 16>}, {pipeline_mode = #tpu.pipeline_mode<synchronous>, transform_indices = @transform_7, window_bounds = array<i64: 32, 32>}, {pipeline_mode = #tpu.pipeline_mode<synchronous>, transform_indices = @transform_8, window_bounds = array<i64: 1, 32>}, {transform_indices = @transform_9, window_bounds = array<i64: 8, 16, 32>}]} {
    %c0 = arith.constant 0 : index
    %c0_0 = arith.constant 0 : index
    %c0_1 = arith.constant 0 : index
    %0 = vector.load %arg1[%c0, %c0_0, %c0_1] : memref<8x16x32xf32, #tpu.memory_space<vmem>>, vector<8x16x32xf32>
    %c0_2 = arith.constant 0 : index
    %c0_3 = arith.constant 0 : index
    %1 = vector.load %arg3[%c0_2, %c0_3] : memref<1x32xf32, #tpu.memory_space<vmem>>, vector<1x32xf32>
    %c0_4 = arith.constant 0 : index
    %c0_5 = arith.constant 0 : index
    %2 = vector.load %arg4[%c0_4, %c0_5] : memref<1x32xf32, #tpu.memory_space<vmem>>, vector<1x32xf32>
    %cst = arith.constant dense<0.000000e+00> : vector<8x16xf32>
    %3 = vector.multi_reduction <add>, %0, %cst [2] : vector<8x16x32xf32> to vector<8x16xf32>
    %4 = vector.shape_cast %3 : vector<8x16xf32> to vector<8x16x1xf32>
    %cst_6 = arith.constant 3.200000e+01 : f32
    %5 = vector.broadcast %cst_6 : f32 to vector<8x16x1xf32>
    %6 = arith.divf %4, %5 : vector<8x16x1xf32>
    %7 = vector.broadcast %6 : vector<8x16x1xf32> to vector<8x16x32xf32>
    %8 = arith.subf %0, %7 : vector<8x16x32xf32>
    %9 = vector.broadcast %6 : vector<8x16x1xf32> to vector<8x16x32xf32>
    %10 = arith.subf %0, %9 : vector<8x16x32xf32>
    %11 = arith.mulf %8, %10 : vector<8x16x32xf32>
    %cst_7 = arith.constant dense<0.000000e+00> : vector<8x16xf32>
    %12 = vector.multi_reduction <add>, %11, %cst_7 [2] : vector<8x16x32xf32> to vector<8x16xf32>
    %13 = vector.shape_cast %12 : vector<8x16xf32> to vector<8x16x1xf32>
    %cst_8 = arith.constant 3.200000e+01 : f32
    %14 = vector.broadcast %cst_8 : f32 to vector<8x16x1xf32>
    %15 = arith.divf %13, %14 : vector<8x16x1xf32>
    %16 = vector.broadcast %6 : vector<8x16x1xf32> to vector<8x16x32xf32>
    %17 = arith.subf %0, %16 : vector<8x16x32xf32>
    %cst_9 = arith.constant 9.99999974E-6 : f32
    %18 = vector.broadcast %cst_9 : f32 to vector<8x16x1xf32>
    %19 = arith.addf %15, %18 : vector<8x16x1xf32>
    %20 = math.rsqrt %19 : vector<8x16x1xf32>
    %21 = vector.broadcast %20 : vector<8x16x1xf32> to vector<8x16x32xf32>
    %22 = arith.mulf %17, %21 : vector<8x16x32xf32>
    %23 = vector.shape_cast %1 : vector<1x32xf32> to vector<1x1x32xf32>
    %24 = vector.broadcast %23 : vector<1x1x32xf32> to vector<8x16x32xf32>
    %25 = arith.mulf %22, %24 : vector<8x16x32xf32>
    %26 = vector.shape_cast %2 : vector<1x32xf32> to vector<1x1x32xf32>
    %27 = vector.broadcast %26 : vector<1x1x32xf32> to vector<8x16x32xf32>
    %28 = arith.addf %25, %27 : vector<8x16x32xf32>
    %29 = vector.shape_cast %28 : vector<8x16x32xf32> to vector<128x32xf32>
    %30 = arith.truncf %29 : vector<128x32xf32> to vector<128x32xbf16>
    %c0_10 = arith.constant 0 : index
    %c0_11 = arith.constant 0 : index
    %31 = vector.load %arg5[%c0_10, %c0_11] : memref<32x96xbf16, #tpu.memory_space<vmem>>, vector<32x96xbf16>
    %cst_12 = arith.constant dense<0.000000e+00> : vector<128x96xf32>
    %32 = tpu.matmul %30, %31, %cst_12 {dimension_numbers = #tpu.dot_dimension_numbers<[1], [0], [0], [1], [0, 0, 1, 1], [], []>} : vector<128x32xbf16>, vector<32x96xbf16>, vector<128x96xf32> -> vector<128x96xf32>
    %c0_13 = arith.constant 0 : index
    %c0_14 = arith.constant 0 : index
    %33 = vector.load %arg6[%c0_13, %c0_14] : memref<1x96xf32, #tpu.memory_space<vmem>>, vector<1x96xf32>
    %34 = vector.broadcast %33 : vector<1x96xf32> to vector<128x96xf32>
    %35 = arith.addf %32, %34 : vector<128x96xf32>
    %36 = arith.truncf %35 : vector<128x96xf32> to vector<128x96xbf16>
    %c0_15 = arith.constant 0 : index
    %c0_16 = arith.constant 0 : index
    %c0_17 = arith.constant 0 : index
    %37 = vector.load %arg2[%c0_15, %c0_16, %c0_17] : memref<4x16x16xf32, #tpu.memory_space<vmem>>, vector<4x16x16xf32>
    %38 = vector.shape_cast %37 : vector<4x16x16xf32> to vector<1x4x16x16xf32>
    %39 = vector.shape_cast %38 : vector<1x4x16x16xf32> to vector<1x4x16x16xf32>
    %40 = vector.broadcast %39 : vector<1x4x16x16xf32> to vector<2x4x16x16xf32>
    %41 = vector.shape_cast %40 : vector<2x4x16x16xf32> to vector<8x16x16xf32>
    %42 = vector.extract_strided_slice %36 {offsets = [0, 0], sizes = [128, 8], strides = [1, 1]} : vector<128x96xbf16> to vector<128x8xbf16>
    %43 = vector.shape_cast %42 : vector<128x8xbf16> to vector<8x16x8xbf16>
    %44 = vector.extract_strided_slice %36 {offsets = [0, 32], sizes = [128, 8], strides = [1, 1]} : vector<128x96xbf16> to vector<128x8xbf16>
    %45 = vector.shape_cast %44 : vector<128x8xbf16> to vector<8x16x8xbf16>
    %46 = vector.extract_strided_slice %36 {offsets = [0, 64], sizes = [128, 8], strides = [1, 1]} : vector<128x96xbf16> to vector<128x8xbf16>
    %47 = vector.shape_cast %46 : vector<128x8xbf16> to vector<8x16x8xbf16>
    %cst_18 = arith.constant dense<0.000000e+00> : vector<8x16x16xf32>
    %48 = tpu.matmul %43, %45, %cst_18 {dimension_numbers = #tpu.dot_dimension_numbers<[2], [2], [1], [1], [0, 0, 0, 1, 1, 1], [0], [0]>} : vector<8x16x8xbf16>, vector<8x16x8xbf16>, vector<8x16x16xf32> -> vector<8x16x16xf32>
    %cst_19 = arith.constant 0.353553385 : f32
    %49 = vector.broadcast %cst_19 : f32 to vector<8x16x16xf32>
    %50 = arith.mulf %48, %49 : vector<8x16x16xf32>
    %c0_20 = arith.constant 0 : index
    %c0_21 = arith.constant 0 : index
    %c0_22 = arith.constant 0 : index
    %51 = vector.load %arg7[%c0_20, %c0_21, %c0_22] : memref<4x16x16xf32, #tpu.memory_space<vmem>>, vector<1x16x16xf32>
    %52 = vector.shape_cast %51 : vector<1x16x16xf32> to vector<16x16xf32>
    %53 = vector.shape_cast %52 : vector<16x16xf32> to vector<1x16x16xf32>
    %54 = vector.broadcast %53 : vector<1x16x16xf32> to vector<8x16x16xf32>
    %55 = arith.addf %50, %54 : vector<8x16x16xf32>
    %56 = arith.addf %55, %41 : vector<8x16x16xf32>
    %cst_23 = arith.constant dense<0xFF800000> : vector<8x16xf32>
    %57 = vector.multi_reduction <maximumf>, %56, %cst_23 [2] : vector<8x16x16xf32> to vector<8x16xf32>
    %58 = vector.shape_cast %57 : vector<8x16xf32> to vector<8x16x1xf32>
    %59 = vector.broadcast %58 : vector<8x16x1xf32> to vector<8x16x16xf32>
    %60 = arith.subf %56, %59 : vector<8x16x16xf32>
    %61 = math.exp %60 : vector<8x16x16xf32>
    %cst_24 = arith.constant dense<0.000000e+00> : vector<8x16xf32>
    %62 = vector.multi_reduction <add>, %61, %cst_24 [2] : vector<8x16x16xf32> to vector<8x16xf32>
    %63 = vector.shape_cast %62 : vector<8x16xf32> to vector<8x16x1xf32>
    %64 = tpu.reciprocal %63 {approx = true} : vector<8x16x1xf32> -> vector<8x16x1xf32>
    %65 = vector.broadcast %64 : vector<8x16x1xf32> to vector<8x16x16xf32>
    %66 = arith.mulf %61, %65 : vector<8x16x16xf32>
    %67 = arith.truncf %66 : vector<8x16x16xf32> to vector<8x16x16xbf16>
    %cst_25 = arith.constant dense<0.000000e+00> : vector<8x16x8xf32>
    %68 = tpu.matmul %67, %47, %cst_25 {dimension_numbers = #tpu.dot_dimension_numbers<[2], [1], [1], [2], [0, 0, 0, 1, 1, 2], [0], [0]>} : vector<8x16x16xbf16>, vector<8x16x8xbf16>, vector<8x16x8xf32> -> vector<8x16x8xf32>
    %c0_26 = arith.constant 0 : index
    %c0_27 = arith.constant 0 : index
    %c0_28 = arith.constant 0 : index
    %69 = vector.load %arg11[%c0_26, %c0_27, %c0_28] : memref<8x16x32xf32, #tpu.memory_space<vmem>>, vector<8x16x8xf32>
    tpu.vector_store %arg11[%c0_26, %c0_27, %c0_28], %68 {strides = array<i32>} : memref<8x16x32xf32, #tpu.memory_space<vmem>>, vector<8x16x8xf32>,
    %70 = vector.extract_strided_slice %36 {offsets = [0, 8], sizes = [128, 8], strides = [1, 1]} : vector<128x96xbf16> to vector<128x8xbf16>
    %71 = vector.shape_cast %70 : vector<128x8xbf16> to vector<8x16x8xbf16>
    %72 = vector.extract_strided_slice %36 {offsets = [0, 40], sizes = [128, 8], strides = [1, 1]} : vector<128x96xbf16> to vector<128x8xbf16>
    %73 = vector.shape_cast %72 : vector<128x8xbf16> to vector<8x16x8xbf16>
    %74 = vector.extract_strided_slice %36 {offsets = [0, 72], sizes = [128, 8], strides = [1, 1]} : vector<128x96xbf16> to vector<128x8xbf16>
    %75 = vector.shape_cast %74 : vector<128x8xbf16> to vector<8x16x8xbf16>
    %cst_29 = arith.constant dense<0.000000e+00> : vector<8x16x16xf32>
    %76 = tpu.matmul %71, %73, %cst_29 {dimension_numbers = #tpu.dot_dimension_numbers<[2], [2], [1], [1], [0, 0, 0, 1, 1, 1], [0], [0]>} : vector<8x16x8xbf16>, vector<8x16x8xbf16>, vector<8x16x16xf32> -> vector<8x16x16xf32>
    %cst_30 = arith.constant 0.353553385 : f32
    %77 = vector.broadcast %cst_30 : f32 to vector<8x16x16xf32>
    %78 = arith.mulf %76, %77 : vector<8x16x16xf32>
    %c1 = arith.constant 1 : index
    %c0_31 = arith.constant 0 : index
    %c0_32 = arith.constant 0 : index
    %79 = vector.load %arg7[%c1, %c0_31, %c0_32] : memref<4x16x16xf32, #tpu.memory_space<vmem>>, vector<1x16x16xf32>
    %80 = vector.shape_cast %79 : vector<1x16x16xf32> to vector<16x16xf32>
    %81 = vector.shape_cast %80 : vector<16x16xf32> to vector<1x16x16xf32>
    %82 = vector.broadcast %81 : vector<1x16x16xf32> to vector<8x16x16xf32>
    %83 = arith.addf %78, %82 : vector<8x16x16xf32>
    %84 = arith.addf %83, %41 : vector<8x16x16xf32>
    %cst_33 = arith.constant dense<0xFF800000> : vector<8x16xf32>
    %85 = vector.multi_reduction <maximumf>, %84, %cst_33 [2] : vector<8x16x16xf32> to vector<8x16xf32>
    %86 = vector.shape_cast %85 : vector<8x16xf32> to vector<8x16x1xf32>
    %87 = vector.broadcast %86 : vector<8x16x1xf32> to vector<8x16x16xf32>
    %88 = arith.subf %84, %87 : vector<8x16x16xf32>
    %89 = math.exp %88 : vector<8x16x16xf32>
    %cst_34 = arith.constant dense<0.000000e+00> : vector<8x16xf32>
    %90 = vector.multi_reduction <add>, %89, %cst_34 [2] : vector<8x16x16xf32> to vector<8x16xf32>
    %91 = vector.shape_cast %90 : vector<8x16xf32> to vector<8x16x1xf32>
    %92 = tpu.reciprocal %91 {approx = true} : vector<8x16x1xf32> -> vector<8x16x1xf32>
    %93 = vector.broadcast %92 : vector<8x16x1xf32> to vector<8x16x16xf32>
    %94 = arith.mulf %89, %93 : vector<8x16x16xf32>
    %95 = arith.truncf %94 : vector<8x16x16xf32> to vector<8x16x16xbf16>
    %cst_35 = arith.constant dense<0.000000e+00> : vector<8x16x8xf32>
    %96 = tpu.matmul %95, %75, %cst_35 {dimension_numbers = #tpu.dot_dimension_numbers<[2], [1], [1], [2], [0, 0, 0, 1, 1, 2], [0], [0]>} : vector<8x16x16xbf16>, vector<8x16x8xbf16>, vector<8x16x8xf32> -> vector<8x16x8xf32>
    %c0_36 = arith.constant 0 : index
    %c0_37 = arith.constant 0 : index
    %c8 = arith.constant 8 : index
    %97 = vector.load %arg11[%c0_36, %c0_37, %c8] : memref<8x16x32xf32, #tpu.memory_space<vmem>>, vector<8x16x8xf32>
    tpu.vector_store %arg11[%c0_36, %c0_37, %c8], %96 {strides = array<i32>} : memref<8x16x32xf32, #tpu.memory_space<vmem>>, vector<8x16x8xf32>,
    %98 = vector.extract_strided_slice %36 {offsets = [0, 16], sizes = [128, 8], strides = [1, 1]} : vector<128x96xbf16> to vector<128x8xbf16>
    %99 = vector.shape_cast %98 : vector<128x8xbf16> to vector<8x16x8xbf16>
    %100 = vector.extract_strided_slice %36 {offsets = [0, 48], sizes = [128, 8], strides = [1, 1]} : vector<128x96xbf16> to vector<128x8xbf16>
    %101 = vector.shape_cast %100 : vector<128x8xbf16> to vector<8x16x8xbf16>
    %102 = vector.extract_strided_slice %36 {offsets = [0, 80], sizes = [128, 8], strides = [1, 1]} : vector<128x96xbf16> to vector<128x8xbf16>
    %103 = vector.shape_cast %102 : vector<128x8xbf16> to vector<8x16x8xbf16>
    %cst_38 = arith.constant dense<0.000000e+00> : vector<8x16x16xf32>
    %104 = tpu.matmul %99, %101, %cst_38 {dimension_numbers = #tpu.dot_dimension_numbers<[2], [2], [1], [1], [0, 0, 0, 1, 1, 1], [0], [0]>} : vector<8x16x8xbf16>, vector<8x16x8xbf16>, vector<8x16x16xf32> -> vector<8x16x16xf32>
    %cst_39 = arith.constant 0.353553385 : f32
    %105 = vector.broadcast %cst_39 : f32 to vector<8x16x16xf32>
    %106 = arith.mulf %104, %105 : vector<8x16x16xf32>
    %c2 = arith.constant 2 : index
    %c0_40 = arith.constant 0 : index
    %c0_41 = arith.constant 0 : index
    %107 = vector.load %arg7[%c2, %c0_40, %c0_41] : memref<4x16x16xf32, #tpu.memory_space<vmem>>, vector<1x16x16xf32>
    %108 = vector.shape_cast %107 : vector<1x16x16xf32> to vector<16x16xf32>
    %109 = vector.shape_cast %108 : vector<16x16xf32> to vector<1x16x16xf32>
    %110 = vector.broadcast %109 : vector<1x16x16xf32> to vector<8x16x16xf32>
    %111 = arith.addf %106, %110 : vector<8x16x16xf32>
    %112 = arith.addf %111, %41 : vector<8x16x16xf32>
    %cst_42 = arith.constant dense<0xFF800000> : vector<8x16xf32>
    %113 = vector.multi_reduction <maximumf>, %112, %cst_42 [2] : vector<8x16x16xf32> to vector<8x16xf32>
    %114 = vector.shape_cast %113 : vector<8x16xf32> to vector<8x16x1xf32>
    %115 = vector.broadcast %114 : vector<8x16x1xf32> to vector<8x16x16xf32>
    %116 = arith.subf %112, %115 : vector<8x16x16xf32>
    %117 = math.exp %116 : vector<8x16x16xf32>
    %cst_43 = arith.constant dense<0.000000e+00> : vector<8x16xf32>
    %118 = vector.multi_reduction <add>, %117, %cst_43 [2] : vector<8x16x16xf32> to vector<8x16xf32>
    %119 = vector.shape_cast %118 : vector<8x16xf32> to vector<8x16x1xf32>
    %120 = tpu.reciprocal %119 {approx = true} : vector<8x16x1xf32> -> vector<8x16x1xf32>
    %121 = vector.broadcast %120 : vector<8x16x1xf32> to vector<8x16x16xf32>
    %122 = arith.mulf %117, %121 : vector<8x16x16xf32>
    %123 = arith.truncf %122 : vector<8x16x16xf32> to vector<8x16x16xbf16>
    %cst_44 = arith.constant dense<0.000000e+00> : vector<8x16x8xf32>
    %124 = tpu.matmul %123, %103, %cst_44 {dimension_numbers = #tpu.dot_dimension_numbers<[2], [1], [1], [2], [0, 0, 0, 1, 1, 2], [0], [0]>} : vector<8x16x16xbf16>, vector<8x16x8xbf16>, vector<8x16x8xf32> -> vector<8x16x8xf32>
    %c0_45 = arith.constant 0 : index
    %c0_46 = arith.constant 0 : index
    %c16 = arith.constant 16 : index
    %125 = vector.load %arg11[%c0_45, %c0_46, %c16] : memref<8x16x32xf32, #tpu.memory_space<vmem>>, vector<8x16x8xf32>
    tpu.vector_store %arg11[%c0_45, %c0_46, %c16], %124 {strides = array<i32>} : memref<8x16x32xf32, #tpu.memory_space<vmem>>, vector<8x16x8xf32>,
    %126 = vector.extract_strided_slice %36 {offsets = [0, 24], sizes = [128, 8], strides = [1, 1]} : vector<128x96xbf16> to vector<128x8xbf16>
    %127 = vector.shape_cast %126 : vector<128x8xbf16> to vector<8x16x8xbf16>
    %128 = vector.extract_strided_slice %36 {offsets = [0, 56], sizes = [128, 8], strides = [1, 1]} : vector<128x96xbf16> to vector<128x8xbf16>
    %129 = vector.shape_cast %128 : vector<128x8xbf16> to vector<8x16x8xbf16>
    %130 = vector.extract_strided_slice %36 {offsets = [0, 88], sizes = [128, 8], strides = [1, 1]} : vector<128x96xbf16> to vector<128x8xbf16>
    %131 = vector.shape_cast %130 : vector<128x8xbf16> to vector<8x16x8xbf16>
    %cst_47 = arith.constant dense<0.000000e+00> : vector<8x16x16xf32>
    %132 = tpu.matmul %127, %129, %cst_47 {dimension_numbers = #tpu.dot_dimension_numbers<[2], [2], [1], [1], [0, 0, 0, 1, 1, 1], [0], [0]>} : vector<8x16x8xbf16>, vector<8x16x8xbf16>, vector<8x16x16xf32> -> vector<8x16x16xf32>
    %cst_48 = arith.constant 0.353553385 : f32
    %133 = vector.broadcast %cst_48 : f32 to vector<8x16x16xf32>
    %134 = arith.mulf %132, %133 : vector<8x16x16xf32>
    %c3 = arith.constant 3 : index
    %c0_49 = arith.constant 0 : index
    %c0_50 = arith.constant 0 : index
    %135 = vector.load %arg7[%c3, %c0_49, %c0_50] : memref<4x16x16xf32, #tpu.memory_space<vmem>>, vector<1x16x16xf32>
    %136 = vector.shape_cast %135 : vector<1x16x16xf32> to vector<16x16xf32>
    %137 = vector.shape_cast %136 : vector<16x16xf32> to vector<1x16x16xf32>
    %138 = vector.broadcast %137 : vector<1x16x16xf32> to vector<8x16x16xf32>
    %139 = arith.addf %134, %138 : vector<8x16x16xf32>
    %140 = arith.addf %139, %41 : vector<8x16x16xf32>
    %cst_51 = arith.constant dense<0xFF800000> : vector<8x16xf32>
    %141 = vector.multi_reduction <maximumf>, %140, %cst_51 [2] : vector<8x16x16xf32> to vector<8x16xf32>
    %142 = vector.shape_cast %141 : vector<8x16xf32> to vector<8x16x1xf32>
    %143 = vector.broadcast %142 : vector<8x16x1xf32> to vector<8x16x16xf32>
    %144 = arith.subf %140, %143 : vector<8x16x16xf32>
    %145 = math.exp %144 : vector<8x16x16xf32>
    %cst_52 = arith.constant dense<0.000000e+00> : vector<8x16xf32>
    %146 = vector.multi_reduction <add>, %145, %cst_52 [2] : vector<8x16x16xf32> to vector<8x16xf32>
    %147 = vector.shape_cast %146 : vector<8x16xf32> to vector<8x16x1xf32>
    %148 = tpu.reciprocal %147 {approx = true} : vector<8x16x1xf32> -> vector<8x16x1xf32>
    %149 = vector.broadcast %148 : vector<8x16x1xf32> to vector<8x16x16xf32>
    %150 = arith.mulf %145, %149 : vector<8x16x16xf32>
    %151 = arith.truncf %150 : vector<8x16x16xf32> to vector<8x16x16xbf16>
    %cst_53 = arith.constant dense<0.000000e+00> : vector<8x16x8xf32>
    %152 = tpu.matmul %151, %131, %cst_53 {dimension_numbers = #tpu.dot_dimension_numbers<[2], [1], [1], [2], [0, 0, 0, 1, 1, 2], [0], [0]>} : vector<8x16x16xbf16>, vector<8x16x8xbf16>, vector<8x16x8xf32> -> vector<8x16x8xf32>
    %c0_54 = arith.constant 0 : index
    %c0_55 = arith.constant 0 : index
    %c24 = arith.constant 24 : index
    %153 = vector.load %arg11[%c0_54, %c0_55, %c24] : memref<8x16x32xf32, #tpu.memory_space<vmem>>, vector<8x16x8xf32>
    tpu.vector_store %arg11[%c0_54, %c0_55, %c24], %152 {strides = array<i32>} : memref<8x16x32xf32, #tpu.memory_space<vmem>>, vector<8x16x8xf32>,
    %c0_56 = arith.constant 0 : index
    %c0_57 = arith.constant 0 : index
    %c0_58 = arith.constant 0 : index
    %154 = vector.load %arg11[%c0_56, %c0_57, %c0_58] : memref<8x16x32xf32, #tpu.memory_space<vmem>>, vector<8x16x32xf32>
    %155 = vector.shape_cast %154 : vector<8x16x32xf32> to vector<128x32xf32>
    %156 = arith.truncf %155 : vector<128x32xf32> to vector<128x32xbf16>
    %c0_59 = arith.constant 0 : index
    %c0_60 = arith.constant 0 : index
    %157 = vector.load %arg8[%c0_59, %c0_60] : memref<32x32xbf16, #tpu.memory_space<vmem>>, vector<32x32xbf16>
    %cst_61 = arith.constant dense<0.000000e+00> : vector<128x32xf32>
    %158 = tpu.matmul %156, %157, %cst_61 {dimension_numbers = #tpu.dot_dimension_numbers<[1], [0], [0], [1], [0, 0, 1, 1], [], []>} : vector<128x32xbf16>, vector<32x32xbf16>, vector<128x32xf32> -> vector<128x32xf32>
    %c0_62 = arith.constant 0 : index
    %c0_63 = arith.constant 0 : index
    %159 = vector.load %arg9[%c0_62, %c0_63] : memref<1x32xf32, #tpu.memory_space<vmem>>, vector<1x32xf32>
    %160 = vector.broadcast %159 : vector<1x32xf32> to vector<128x32xf32>
    %161 = arith.addf %158, %160 : vector<128x32xf32>
    %162 = vector.shape_cast %161 : vector<128x32xf32> to vector<8x16x32xf32>
    %c0_64 = arith.constant 0 : index
    %c0_65 = arith.constant 0 : index
    %c0_66 = arith.constant 0 : index
    %163 = vector.load %arg10[%c0_64, %c0_65, %c0_66] : memref<8x16x32xf32, #tpu.memory_space<vmem>>, vector<8x16x32xf32>
    tpu.vector_store %arg10[%c0_64, %c0_65, %c0_66], %162 {strides = array<i32>} : memref<8x16x32xf32, #tpu.memory_space<vmem>>, vector<8x16x32xf32>,
    return
  }
  func.func @transform_0(%arg0: i32) -> (i32, i32, i32) {
    %c0_i32 = arith.constant 0 : i32
    %c0_i32_0 = arith.constant 0 : i32
    %c0_i32_1 = arith.constant 0 : i32
    return %arg0, %c0_i32, %c0_i32_0 : i32, i32, i32
  }
  func.func @transform_1(%arg0: i32) -> (i32, i32, i32) {
    %c0_i32 = arith.constant 0 : i32
    %c0_i32_0 = arith.constant 0 : i32
    %c0_i32_1 = arith.constant 0 : i32
    %c0_i32_2 = arith.constant 0 : i32
    return %c0_i32, %c0_i32_0, %c0_i32_1 : i32, i32, i32
  }
  func.func @transform_2(%arg0: i32) -> (i32, i32) {
    %c0_i32 = arith.constant 0 : i32
    %c0_i32_0 = arith.constant 0 : i32
    %c0_i32_1 = arith.constant 0 : i32
    return %c0_i32, %c0_i32_0 : i32, i32
  }
  func.func @transform_3(%arg0: i32) -> (i32, i32) {
    %c0_i32 = arith.constant 0 : i32
    %c0_i32_0 = arith.constant 0 : i32
    %c0_i32_1 = arith.constant 0 : i32
    return %c0_i32, %c0_i32_0 : i32, i32
  }
  func.func @transform_4(%arg0: i32) -> (i32, i32) {
    %c0_i32 = arith.constant 0 : i32
    %c0_i32_0 = arith.constant 0 : i32
    %c0_i32_1 = arith.constant 0 : i32
    return %c0_i32, %c0_i32_0 : i32, i32
  }
  func.func @transform_5(%arg0: i32) -> (i32, i32) {
    %c0_i32 = arith.constant 0 : i32
    %c0_i32_0 = arith.constant 0 : i32
    %c0_i32_1 = arith.constant 0 : i32
    return %c0_i32, %c0_i32_0 : i32, i32
  }
  func.func @transform_6(%arg0: i32) -> (i32, i32, i32) {
    %c0_i32 = arith.constant 0 : i32
    %c0_i32_0 = arith.constant 0 : i32
    %c0_i32_1 = arith.constant 0 : i32
    %c0_i32_2 = arith.constant 0 : i32
    return %c0_i32, %c0_i32_0, %c0_i32_1 : i32, i32, i32
  }
  func.func @transform_7(%arg0: i32) -> (i32, i32) {
    %c0_i32 = arith.constant 0 : i32
    %c0_i32_0 = arith.constant 0 : i32
    %c0_i32_1 = arith.constant 0 : i32
    return %c0_i32, %c0_i32_0 : i32, i32
  }
  func.func @transform_8(%arg0: i32) -> (i32, i32) {
    %c0_i32 = arith.constant 0 : i32
    %c0_i32_0 = arith.constant 0 : i32
    %c0_i32_1 = arith.constant 0 : i32
    return %c0_i32, %c0_i32_0 : i32, i32
  }
  func.func @transform_9(%arg0: i32) -> (i32, i32, i32) {
    %c0_i32 = arith.constant 0 : i32
    %c0_i32_0 = arith.constant 0 : i32
    %c0_i32_1 = arith.constant 0 : i32
    return %arg0, %c0_i32, %c0_i32_0 : i32, i32, i32
  }
}

module attributes {stable_mosaic.version = 11 : i64} {
  func.func @_mlp_kernel(%arg0: i32, %arg1: memref<128x32xf32, #tpu.memory_space<vmem>>, %arg2: memref<128x32xf32, #tpu.memory_space<vmem>>, %arg3: memref<1x32xf32, #tpu.memory_space<vmem>>, %arg4: memref<1x32xf32, #tpu.memory_space<vmem>>, %arg5: memref<32x128xbf16, #tpu.memory_space<vmem>>, %arg6: memref<1x128xf32, #tpu.memory_space<vmem>>, %arg7: memref<128x32xbf16, #tpu.memory_space<vmem>>, %arg8: memref<1x32xf32, #tpu.memory_space<vmem>>, %arg9: memref<128x32xf32, #tpu.memory_space<vmem>>) attributes {dimension_semantics = [#tpu.dimension_semantics<parallel>], iteration_bounds = array<i64: 1>, scalar_prefetch = 0 : i64, scratch_operands = 0 : i64, tpu.core_type = #tpu.core_type<tc>, window_params = [{transform_indices = @transform_0, window_bounds = array<i64: 128, 32>}, {transform_indices = @transform_1, window_bounds = array<i64: 128, 32>}, {pipeline_mode = #tpu.pipeline_mode<synchronous>, transform_indices = @transform_2, window_bounds = array<i64: 1, 32>}, {pipeline_mode = #tpu.pipeline_mode<synchronous>, transform_indices = @transform_3, window_bounds = array<i64: 1, 32>}, {pipeline_mode = #tpu.pipeline_mode<synchronous>, transform_indices = @transform_4, window_bounds = array<i64: 32, 128>}, {pipeline_mode = #tpu.pipeline_mode<synchronous>, transform_indices = @transform_5, window_bounds = array<i64: 1, 128>}, {pipeline_mode = #tpu.pipeline_mode<synchronous>, transform_indices = @transform_6, window_bounds = array<i64: 128, 32>}, {pipeline_mode = #tpu.pipeline_mode<synchronous>, transform_indices = @transform_7, window_bounds = array<i64: 1, 32>}, {transform_indices = @transform_8, window_bounds = array<i64: 128, 32>}]} {
    %c0 = arith.constant 0 : index
    %c0_0 = arith.constant 0 : index
    %0 = vector.load %arg1[%c0, %c0_0] : memref<128x32xf32, #tpu.memory_space<vmem>>, vector<128x32xf32>
    %c0_1 = arith.constant 0 : index
    %c0_2 = arith.constant 0 : index
    %1 = vector.load %arg2[%c0_1, %c0_2] : memref<128x32xf32, #tpu.memory_space<vmem>>, vector<128x32xf32>
    %2 = arith.addf %0, %1 : vector<128x32xf32>
    %c0_3 = arith.constant 0 : index
    %c0_4 = arith.constant 0 : index
    %3 = vector.load %arg3[%c0_3, %c0_4] : memref<1x32xf32, #tpu.memory_space<vmem>>, vector<1x32xf32>
    %c0_5 = arith.constant 0 : index
    %c0_6 = arith.constant 0 : index
    %4 = vector.load %arg4[%c0_5, %c0_6] : memref<1x32xf32, #tpu.memory_space<vmem>>, vector<1x32xf32>
    %cst = arith.constant dense<0.000000e+00> : vector<128xf32>
    %5 = vector.multi_reduction <add>, %2, %cst [1] : vector<128x32xf32> to vector<128xf32>
    %6 = vector.shape_cast %5 : vector<128xf32> to vector<128x1xf32>
    %cst_7 = arith.constant 3.200000e+01 : f32
    %7 = vector.broadcast %cst_7 : f32 to vector<128x1xf32>
    %8 = arith.divf %6, %7 : vector<128x1xf32>
    %9 = vector.broadcast %8 : vector<128x1xf32> to vector<128x32xf32>
    %10 = arith.subf %2, %9 : vector<128x32xf32>
    %11 = vector.broadcast %8 : vector<128x1xf32> to vector<128x32xf32>
    %12 = arith.subf %2, %11 : vector<128x32xf32>
    %13 = arith.mulf %10, %12 : vector<128x32xf32>
    %cst_8 = arith.constant dense<0.000000e+00> : vector<128xf32>
    %14 = vector.multi_reduction <add>, %13, %cst_8 [1] : vector<128x32xf32> to vector<128xf32>
    %15 = vector.shape_cast %14 : vector<128xf32> to vector<128x1xf32>
    %cst_9 = arith.constant 3.200000e+01 : f32
    %16 = vector.broadcast %cst_9 : f32 to vector<128x1xf32>
    %17 = arith.divf %15, %16 : vector<128x1xf32>
    %18 = vector.broadcast %8 : vector<128x1xf32> to vector<128x32xf32>
    %19 = arith.subf %2, %18 : vector<128x32xf32>
    %cst_10 = arith.constant 9.99999974E-6 : f32
    %20 = vector.broadcast %cst_10 : f32 to vector<128x1xf32>
    %21 = arith.addf %17, %20 : vector<128x1xf32>
    %22 = math.rsqrt %21 : vector<128x1xf32>
    %23 = vector.broadcast %22 : vector<128x1xf32> to vector<128x32xf32>
    %24 = arith.mulf %19, %23 : vector<128x32xf32>
    %25 = vector.broadcast %3 : vector<1x32xf32> to vector<128x32xf32>
    %26 = arith.mulf %24, %25 : vector<128x32xf32>
    %27 = vector.broadcast %4 : vector<1x32xf32> to vector<128x32xf32>
    %28 = arith.addf %26, %27 : vector<128x32xf32>
    %29 = arith.truncf %28 : vector<128x32xf32> to vector<128x32xbf16>
    %c0_11 = arith.constant 0 : index
    %c0_12 = arith.constant 0 : index
    %30 = vector.load %arg5[%c0_11, %c0_12] : memref<32x128xbf16, #tpu.memory_space<vmem>>, vector<32x128xbf16>
    %cst_13 = arith.constant dense<0.000000e+00> : vector<128x128xf32>
    %31 = tpu.matmul %29, %30, %cst_13 {dimension_numbers = #tpu.dot_dimension_numbers<[1], [0], [0], [1], [0, 0, 1, 1], [], []>} : vector<128x32xbf16>, vector<32x128xbf16>, vector<128x128xf32> -> vector<128x128xf32>
    %c0_14 = arith.constant 0 : index
    %c0_15 = arith.constant 0 : index
    %32 = vector.load %arg6[%c0_14, %c0_15] : memref<1x128xf32, #tpu.memory_space<vmem>>, vector<1x128xf32>
    %33 = vector.broadcast %32 : vector<1x128xf32> to vector<128x128xf32>
    %34 = arith.addf %31, %33 : vector<128x128xf32>
    %cst_16 = arith.constant 5.000000e-01 : f32
    %35 = vector.broadcast %cst_16 : f32 to vector<128x128xf32>
    %36 = arith.mulf %35, %34 : vector<128x128xf32>
    %cst_17 = arith.constant 0.707106769 : f32
    %37 = vector.broadcast %cst_17 : f32 to vector<128x128xf32>
    %38 = arith.mulf %34, %37 : vector<128x128xf32>
    %cst_18 = arith.constant 0.000000e+00 : f32
    %39 = vector.broadcast %cst_18 : f32 to vector<128x128xf32>
    %40 = arith.cmpf oge, %38, %39 : vector<128x128xf32>
    %cst_19 = arith.constant 1.000000e+00 : f32
    %cst_20 = arith.constant -1.000000e+00 : f32
    %41 = vector.broadcast %cst_19 : f32 to vector<128x128xf32>
    %42 = vector.broadcast %cst_20 : f32 to vector<128x128xf32>
    %43 = arith.select %40, %41, %42 : vector<128x128xi1>, vector<128x128xf32>
    %44 = math.absf %38 : vector<128x128xf32>
    %cst_21 = arith.constant 0.327591091 : f32
    %45 = vector.broadcast %cst_21 : f32 to vector<128x128xf32>
    %46 = arith.mulf %45, %44 : vector<128x128xf32>
    %cst_22 = arith.constant 1.000000e+00 : f32
    %47 = vector.broadcast %cst_22 : f32 to vector<128x128xf32>
    %48 = arith.addf %47, %46 : vector<128x128xf32>
    %cst_23 = arith.constant 1.000000e+00 : f32
    %49 = vector.broadcast %cst_23 : f32 to vector<128x128xf32>
    %50 = arith.divf %49, %48 : vector<128x128xf32>
    %cst_24 = arith.constant 1.06140542 : f32
    %51 = vector.broadcast %cst_24 : f32 to vector<128x128xf32>
    %52 = arith.mulf %51, %50 : vector<128x128xf32>
    %cst_25 = arith.constant -1.45315206 : f32
    %53 = vector.broadcast %cst_25 : f32 to vector<128x128xf32>
    %54 = arith.addf %52, %53 : vector<128x128xf32>
    %55 = arith.mulf %54, %50 : vector<128x128xf32>
    %cst_26 = arith.constant 1.42141378 : f32
    %56 = vector.broadcast %cst_26 : f32 to vector<128x128xf32>
    %57 = arith.addf %55, %56 : vector<128x128xf32>
    %58 = arith.mulf %57, %50 : vector<128x128xf32>
    %cst_27 = arith.constant -0.284496725 : f32
    %59 = vector.broadcast %cst_27 : f32 to vector<128x128xf32>
    %60 = arith.addf %58, %59 : vector<128x128xf32>
    %61 = arith.mulf %60, %50 : vector<128x128xf32>
    %cst_28 = arith.constant 0.254829586 : f32
    %62 = vector.broadcast %cst_28 : f32 to vector<128x128xf32>
    %63 = arith.addf %61, %62 : vector<128x128xf32>
    %64 = arith.mulf %63, %50 : vector<128x128xf32>
    %cst_29 = arith.constant 0.000000e+00 : f32
    %65 = vector.broadcast %cst_29 : f32 to vector<128x128xf32>
    %66 = arith.subf %65, %44 : vector<128x128xf32>
    %67 = arith.mulf %66, %44 : vector<128x128xf32>
    %68 = math.exp %67 : vector<128x128xf32>
    %69 = arith.mulf %64, %68 : vector<128x128xf32>
    %cst_30 = arith.constant 1.000000e+00 : f32
    %70 = vector.broadcast %cst_30 : f32 to vector<128x128xf32>
    %71 = arith.subf %70, %69 : vector<128x128xf32>
    %72 = arith.mulf %43, %71 : vector<128x128xf32>
    %cst_31 = arith.constant 1.000000e+00 : f32
    %73 = vector.broadcast %cst_31 : f32 to vector<128x128xf32>
    %74 = arith.addf %73, %72 : vector<128x128xf32>
    %75 = arith.mulf %36, %74 : vector<128x128xf32>
    %76 = arith.truncf %75 : vector<128x128xf32> to vector<128x128xbf16>
    %c0_32 = arith.constant 0 : index
    %c0_33 = arith.constant 0 : index
    %77 = vector.load %arg7[%c0_32, %c0_33] : memref<128x32xbf16, #tpu.memory_space<vmem>>, vector<128x32xbf16>
    %cst_34 = arith.constant dense<0.000000e+00> : vector<128x32xf32>
    %78 = tpu.matmul %76, %77, %cst_34 {dimension_numbers = #tpu.dot_dimension_numbers<[1], [0], [0], [1], [0, 0, 1, 1], [], []>} : vector<128x128xbf16>, vector<128x32xbf16>, vector<128x32xf32> -> vector<128x32xf32>
    %c0_35 = arith.constant 0 : index
    %c0_36 = arith.constant 0 : index
    %79 = vector.load %arg8[%c0_35, %c0_36] : memref<1x32xf32, #tpu.memory_space<vmem>>, vector<1x32xf32>
    %80 = vector.broadcast %79 : vector<1x32xf32> to vector<128x32xf32>
    %81 = arith.addf %78, %80 : vector<128x32xf32>
    %82 = arith.addf %2, %81 : vector<128x32xf32>
    %c0_37 = arith.constant 0 : index
    %c0_38 = arith.constant 0 : index
    %83 = vector.load %arg9[%c0_37, %c0_38] : memref<128x32xf32, #tpu.memory_space<vmem>>, vector<128x32xf32>
    tpu.vector_store %arg9[%c0_37, %c0_38], %82 {strides = array<i32>} : memref<128x32xf32, #tpu.memory_space<vmem>>, vector<128x32xf32>,
    return
  }
  func.func @transform_0(%arg0: i32) -> (i32, i32) {
    %c0_i32 = arith.constant 0 : i32
    %c0_i32_0 = arith.constant 0 : i32
    return %arg0, %c0_i32 : i32, i32
  }
  func.func @transform_1(%arg0: i32) -> (i32, i32) {
    %c0_i32 = arith.constant 0 : i32
    %c0_i32_0 = arith.constant 0 : i32
    return %arg0, %c0_i32 : i32, i32
  }
  func.func @transform_2(%arg0: i32) -> (i32, i32) {
    %c0_i32 = arith.constant 0 : i32
    %c0_i32_0 = arith.constant 0 : i32
    %c0_i32_1 = arith.constant 0 : i32
    return %c0_i32, %c0_i32_0 : i32, i32
  }
  func.func @transform_3(%arg0: i32) -> (i32, i32) {
    %c0_i32 = arith.constant 0 : i32
    %c0_i32_0 = arith.constant 0 : i32
    %c0_i32_1 = arith.constant 0 : i32
    return %c0_i32, %c0_i32_0 : i32, i32
  }
  func.func @transform_4(%arg0: i32) -> (i32, i32) {
    %c0_i32 = arith.constant 0 : i32
    %c0_i32_0 = arith.constant 0 : i32
    %c0_i32_1 = arith.constant 0 : i32
    return %c0_i32, %c0_i32_0 : i32, i32
  }
  func.func @transform_5(%arg0: i32) -> (i32, i32) {
    %c0_i32 = arith.constant 0 : i32
    %c0_i32_0 = arith.constant 0 : i32
    %c0_i32_1 = arith.constant 0 : i32
    return %c0_i32, %c0_i32_0 : i32, i32
  }
  func.func @transform_6(%arg0: i32) -> (i32, i32) {
    %c0_i32 = arith.constant 0 : i32
    %c0_i32_0 = arith.constant 0 : i32
    %c0_i32_1 = arith.constant 0 : i32
    return %c0_i32, %c0_i32_0 : i32, i32
  }
  func.func @transform_7(%arg0: i32) -> (i32, i32) {
    %c0_i32 = arith.constant 0 : i32
    %c0_i32_0 = arith.constant 0 : i32
    %c0_i32_1 = arith.constant 0 : i32
    return %c0_i32, %c0_i32_0 : i32, i32
  }
  func.func @transform_8(%arg0: i32) -> (i32, i32) {
    %c0_i32 = arith.constant 0 : i32
    %c0_i32_0 = arith.constant 0 : i32
    return %arg0, %c0_i32 : i32, i32
  }
}

</mosaic_0001>

<bundles_post_ra>
// kernel: swin_block_forward.3
= control target key start
LH: loop header
LB: loop body
LE: loop exit
PB: predicated region body
PF: predicated region fallthrough
CT: control target
= control target key end

     0   :  { %vm80_vm0 = vcmask 261120   ;;  %s2229_s0 = inlined_call_operand.vmem [shape: f32[128,32], index: 0, kind: input, shape index: {}]   ;;  %s2230_s1 = inlined_call_operand.vmem [shape: f32[128,32], index: 1, kind: input, shape index: {}]   ;;  %s2231_s4 = inlined_call_operand.vmem [shape: bf16[32,128], index: 4, kind: input, shape index: {}]   ;;  %s2232_s2 = inlined_call_operand.vmem [shape: f32[1,32], index: 2, kind: input, shape index: {}]   ;;  %s2233_s3 = inlined_call_operand.vmem [shape: f32[1,32], index: 3, kind: input, shape index: {}]   ;;  %s2234_s6 = inlined_call_operand.vmem [shape: bf16[128,32], index: 6, kind: input, shape index: {}]   ;;  %s2235_s5 = inlined_call_operand.vmem [shape: f32[1,128], index: 5, kind: input, shape index: {}]   ;;  %s2236_s7 = inlined_call_operand.vmem [shape: f32[1,32], index: 7, kind: input, shape index: {}]   ;;  %s2237_s8 = inlined_call_operand.vmem [shape: f32[128,32], index: 8, kind: output, shape index: {}]  }
   0x1   :  { %v30_v0 = vld [vmem:[%s2229_s0] sm:$0xff]  ;;  %v32_v2 = vld [vmem:[%s2229_s0 + $0x10] sm:$0xff]  ;;  %v31_v5 = vld [vmem:[%s2229_s0 + $0x8] sm:$0xff] }
   0x2   :  { %v46_v1 = vld [vmem:[%s2230_s1] sm:$0xff]  ;;  %v48_v4 = vld [vmem:[%s2230_s1 + $0x10] sm:$0xff]  ;;  %v47_v6 = vld [vmem:[%s2230_s1 + $0x8] sm:$0xff] }
   0x3   :  { %v1408_v3 = vadd.f32 %v46_v1, %v30_v0  ;;  %v1419_v7 = vadd.f32 %v48_v4, %v32_v2  ;;  %v1421_v8 = vadd.f32 %v47_v6, %v31_v5  ;;  %v33_v9 = vld [vmem:[%s2229_s0 + $0x18] sm:$0xff]  ;;  %v34_v11 = vld [vmem:[%s2229_s0 + $0x20] sm:$0xff]  ;;  %v35_v15 = vld [vmem:[%s2229_s0 + $0x28] sm:$0xff] }
   0x4   :  { %v49_v10 = vld [vmem:[%s2230_s1 + $0x18] sm:$0xff]  ;;  %v50_v14 = vld [vmem:[%s2230_s1 + $0x20] sm:$0xff]  ;;  %v51_v16 = vld [vmem:[%s2230_s1 + $0x28] sm:$0xff] }
   0x5   :  { %2256 = vst [vmem:[#allocation2_spill] sm:$0xff] %v1408_v3  ;;  %2257 = vst [vmem:[#allocation3_spill] sm:$0xff] %v1419_v7  ;;  %v81_v12 = vsel %vm80_vm0, %v1408_v3, 0.0  ;;  %v1434_v13 = vadd.f32 %v49_v10, %v33_v9  ;;  %v87_v17 = vsel %vm80_vm0, %v1419_v7, 0.0  ;;  %v84_v18 = vsel %vm80_vm0, %v1421_v8, 0.0  ;;  %v36_v22 = vld [vmem:[%s2229_s0 + $0x30] sm:$0xff] }
   0x6   :  { %2258 = vst [vmem:[#allocation4_spill] sm:$0xff] %v1421_v8  ;;  %82 = vadd.xlane.f32.xlu0 %v81_v12  ;;  %88 = vadd.xlane.f32.xlu1 %v87_v17  ;;  %v1449_v19 = vadd.f32 %v50_v14, %v34_v11  ;;  %v1453_v21 = vadd.f32 %v51_v16, %v35_v15  ;;  %v52_v23 = vld [vmem:[%s2230_s1 + $0x30] sm:$0xff]  ;;  %v37_v24 = vld [vmem:[%s2229_s0 + $0x38] sm:$0xff]  ;;  %v38_v30 = vld [vmem:[%s2229_s0 + $0x40] sm:$0xff] }
   0x7   :  { %2259 = vst [vmem:[#allocation5_spill] sm:$0xff] %v1434_v13  ;;  %v90_v20 = vsel %vm80_vm0, %v1434_v13, 0.0  ;;  %v53_v25 = vld [vmem:[%s2230_s1 + $0x38] sm:$0xff]  ;;  %v1469_v27 = vadd.f32 %v52_v23, %v36_v22  ;;  %v54_v31 = vld [vmem:[%s2230_s1 + $0x40] sm:$0xff]  ;;  %v39_v32 = vld [vmem:[%s2229_s0 + $0x48] sm:$0xff] }
   0x8   :  { %2260 = vst [vmem:[#allocation6_spill] sm:$0xff] %v1449_v19  ;;  %2261 = vst [vmem:[#allocation7_spill] sm:$0xff] %v1453_v21  ;;  %v93_v26 = vsel %vm80_vm0, %v1449_v19, 0.0  ;;  %v96_v28 = vsel %vm80_vm0, %v1453_v21, 0.0  ;;  %v1473_v29 = vadd.f32 %v53_v25, %v37_v24  ;;  %v55_v33 = vld [vmem:[%s2230_s1 + $0x48] sm:$0xff]  ;;  %v1489_v35 = vadd.f32 %v54_v31, %v38_v30  ;;  %v40_v38 = vld [vmem:[%s2229_s0 + $0x50] sm:$0xff] }
   0x9   :  { %2262 = vst [vmem:[#allocation8_spill] sm:$0xff] %v1469_v27  ;;  %v99_v34 = vsel %vm80_vm0, %v1469_v27, 0.0  ;;  %v1493_v37 = vadd.f32 %v55_v33, %v39_v32  ;;  %v56_v39 = vld [vmem:[%s2230_s1 + $0x50] sm:$0xff]  ;;  %v41_v40 = vld [vmem:[%s2229_s0 + $0x58] sm:$0xff]  ;;  %v42_v46 = vld [vmem:[%s2229_s0 + $0x60] sm:$0xff] }
   0xa   :  { %85 = vadd.xlane.f32.xlu0 %v84_v18  ;;  %91 = vadd.xlane.f32.xlu1 %v90_v20  ;;  %2263 = vst [vmem:[#allocation9_spill] sm:$0xff] %v1473_v29  ;;  %2264 = vst [vmem:[#allocation10_spill] sm:$0xff] %v1489_v35  ;;  %v102_v36 = vsel %vm80_vm0, %v1473_v29, 0.0  ;;  %v57_v41 = vld [vmem:[%s2230_s1 + $0x58] sm:$0xff]  ;;  %v105_v42 = vsel %vm80_vm0, %v1489_v35, 0.0  ;;  %v1509_v43 = vadd.f32 %v56_v39, %v40_v38  ;;  %v58_v47 = vld [vmem:[%s2230_s1 + $0x60] sm:$0xff] }
   0xb   :  { %2265 = vst [vmem:[#allocation11_spill] sm:$0xff] %v1493_v37  ;;  %v108_v44 = vsel %vm80_vm0, %v1493_v37, 0.0  ;;  %v1513_v45 = vadd.f32 %v57_v41, %v41_v40  ;;  %v43_v48 = vld [vmem:[%s2229_s0 + $0x68] sm:$0xff]  ;;  %v1529_v51 = vadd.f32 %v58_v47, %v42_v46  ;;  %v44_v54 = vld [vmem:[%s2229_s0 + $0x70] sm:$0xff]  ;;  %v45_v56 = vld [vmem:[%s2229_s0 + $0x78] sm:$0xff] }
   0xc   :  { %2266 = vst [vmem:[#allocation12_spill] sm:$0xff] %v1509_v43  ;;  %v59_v49 = vld [vmem:[%s2230_s1 + $0x68] sm:$0xff]  ;;  %v111_v50 = vsel %vm80_vm0, %v1509_v43, 0.0  ;;  %v60_v55 = vld [vmem:[%s2230_s1 + $0x70] sm:$0xff]  ;;  %v61_v57 = vld [vmem:[%s2230_s1 + $0x78] sm:$0xff] }
   0xd   :  { %2267 = vst [vmem:[#allocation13_spill] sm:$0xff] %v1513_v45  ;;  %2268 = vst [vmem:[#allocation14_spill] sm:$0xff] %v1529_v51  ;;  %v114_v52 = vsel %vm80_vm0, %v1513_v45, 0.0  ;;  %v1533_v53 = vadd.f32 %v59_v49, %v43_v48  ;;  %v117_v58 = vsel %vm80_vm0, %v1529_v51, 0.0  ;;  %v1549_v59 = vadd.f32 %v60_v55, %v44_v54 }
   0xe   :  { %94 = vadd.xlane.f32.xlu0 %v93_v26  ;;  %97 = vadd.xlane.f32.xlu1 %v96_v28  ;;  %v1553_v61 = vadd.f32 %v61_v57, %v45_v56 }
   0xf   :  { %2269 = vst [vmem:[#allocation15_spill] sm:$0xff] %v1533_v53  ;;  %2270 = vst [vmem:[#allocation16_spill] sm:$0xff] %v1549_v59  ;;  %v120_v60 = vsel %vm80_vm0, %v1533_v53, 0.0  ;;  %v123_v62 = vsel %vm80_vm0, %v1549_v59, 0.0 }
  0x10   :  { %2271 = vst [vmem:[#allocation17_spill] sm:$0xff] %v1553_v61  ;;  %v126_v63 = vsel %vm80_vm0, %v1553_v61, 0.0 }
  0x12   :  { %100 = vadd.xlane.f32.xlu0 %v99_v34  ;;  %103 = vadd.xlane.f32.xlu1 %v102_v36 }
  0x16   :  { %106 = vadd.xlane.f32.xlu0 %v105_v42  ;;  %109 = vadd.xlane.f32.xlu1 %v108_v44 }
  0x1a   :  { %112 = vadd.xlane.f32.xlu0 %v111_v50  ;;  %115 = vadd.xlane.f32.xlu1 %v114_v52 }
  0x1e   :  { %118 = vadd.xlane.f32.xlu0 %v117_v58  ;;  %121 = vadd.xlane.f32.xlu1 %v120_v60 }
  0x22   :  { %124 = vadd.xlane.f32.xlu0 %v123_v62  ;;  %127 = vadd.xlane.f32.xlu1 %v126_v63 }
  0x8f   :  { %v83_v0 = vpop.xlane.xlu0 %82  ;;  %v89_v2 = vpop.xlane.xlu1 %88 }
  0x90   :  { %v130_v1 = vmul.f32 0.03125, %v83_v0  ;;  %v132_v4 = vmul.f32 0.03125, %v89_v2 }
  0x92   :  { %v1560_v5 = vsub.f32 %v1408_v3, %v130_v1  ;;  %v1563_v6 = vsub.f32 %v1419_v7, %v132_v4 }
  0x93   :  { %v86_v9 = vpop.xlane.xlu0 %85  ;;  %v92_v11 = vpop.xlane.xlu1 %91 }
  0x94   :  { %v131_v10 = vmul.f32 0.03125, %v86_v9  ;;  %v162_v12 = vmul.f32 %v1560_v5, %v1560_v5  ;;  %v133_v14 = vmul.f32 0.03125, %v92_v11  ;;  %v164_v15 = vmul.f32 %v1563_v6, %v1563_v6 }
  0x96   :  { %v1570_v16 = vsub.f32 %v1421_v8, %v131_v10  ;;  %v178_v17 = vsel %vm80_vm0, %v162_v12, 0.0  ;;  %v1574_v18 = vsub.f32 %v1434_v13, %v133_v14  ;;  %v184_v24 = vsel %vm80_vm0, %v164_v15, 0.0 }
  0x97   :  { %179 = vadd.xlane.f32.xlu0 %v178_v17  ;;  %v95_v20 = vpop.xlane.xlu0 %94  ;;  %v98_v23 = vpop.xlane.xlu1 %97 }
  0x98   :  { %v134_v22 = vmul.f32 0.03125, %v95_v20  ;;  %v163_v25 = vmul.f32 %v1570_v16, %v1570_v16  ;;  %v135_v26 = vmul.f32 0.03125, %v98_v23  ;;  %v165_v28 = vmul.f32 %v1574_v18, %v1574_v18 }
  0x9a   :  { %v1582_v30 = vsub.f32 %v1449_v19, %v134_v22  ;;  %v181_v31 = vsel %vm80_vm0, %v163_v25, 0.0  ;;  %v1586_v32 = vsub.f32 %v1453_v21, %v135_v26  ;;  %v187_v38 = vsel %vm80_vm0, %v165_v28, 0.0 }
  0x9b   :  { %185 = vadd.xlane.f32.xlu0 %v184_v24  ;;  %182 = vadd.xlane.f32.xlu1 %v181_v31  ;;  %v101_v33 = vpop.xlane.xlu0 %100  ;;  %v104_v36 = vpop.xlane.xlu1 %103 }
  0x9c   :  { %v136_v34 = vmul.f32 0.03125, %v101_v33  ;;  %v166_v39 = vmul.f32 %v1582_v30, %v1582_v30  ;;  %v137_v40 = vmul.f32 0.03125, %v104_v36  ;;  %v167_v41 = vmul.f32 %v1586_v32, %v1586_v32 }
  0x9e   :  { %v1594_v42 = vsub.f32 %v1469_v27, %v136_v34  ;;  %v190_v44 = vsel %vm80_vm0, %v166_v39, 0.0  ;;  %v1598_v46 = vsub.f32 %v1473_v29, %v137_v40  ;;  %v193_v50 = vsel %vm80_vm0, %v167_v41, 0.0 }
  0x9f   :  { %188 = vadd.xlane.f32.xlu1 %v187_v38  ;;  %191 = vadd.xlane.f32.xlu0 %v190_v44  ;;  %v107_v47 = vpop.xlane.xlu0 %106  ;;  %v110_v49 = vpop.xlane.xlu1 %109 }
  0xa0   :  { %v138_v48 = vmul.f32 0.03125, %v107_v47  ;;  %v168_v52 = vmul.f32 %v1594_v42, %v1594_v42  ;;  %v139_v54 = vmul.f32 0.03125, %v110_v49  ;;  %v169_v55 = vmul.f32 %v1598_v46, %v1598_v46 }
  0xa2   :  { %v1606_v56 = vsub.f32 %v1489_v35, %v138_v48  ;;  %v196_v57 = vsel %vm80_vm0, %v168_v52, 0.0  ;;  %v1610_v58 = vsub.f32 %v1493_v37, %v139_v54  ;;  %v199_v0 = vsel %vm80_vm0, %v169_v55, 0.0  ;;  %v1247_v54 = vld [vmem:[%s2231_s4 + $0x8] sm:$0xff]   ;;  %v1248_v55 = vld [vmem:[%s2231_s4] sm:$0xff]  }
  0xa3   :  { %194 = vadd.xlane.f32.xlu1 %v193_v50  ;;  %197 = vadd.xlane.f32.xlu0 %v196_v57  ;;  %v113_v60 = vpop.xlane.xlu0 %112  ;;  %v116_v63 = vpop.xlane.xlu1 %115 }
  0xa4   :  { %v140_v62 = vmul.f32 0.03125, %v113_v60  ;;  %v170_v1 = vmul.f32 %v1606_v56, %v1606_v56  ;;  %v141_v2 = vmul.f32 0.03125, %v116_v63  ;;  %v171_v4 = vmul.f32 %v1610_v58, %v1610_v58  ;;  %1178 = vmatprep.subr.bf16.mxu0 %v1247_v54 }
  0xa5   :  { %1179 = vmatpush3.bf16.msra.mxu0 %v1247_v54 }
  0xa6   :  { %v1618_v9 = vsub.f32 %v1509_v43, %v140_v62  ;;  %v202_v10 = vsel %vm80_vm0, %v170_v1, 0.0  ;;  %v1622_v11 = vsub.f32 %v1513_v45, %v141_v2  ;;  %v205_v17 = vsel %vm80_vm0, %v171_v4, 0.0  ;;  %1180 = vmatprep.subr.bf16.mxu0 %v1248_v55 }
  0xa7   :  { %200 = vadd.xlane.f32.xlu1 %v199_v0  ;;  %203 = vadd.xlane.f32.xlu0 %v202_v10  ;;  %v119_v12 = vpop.xlane.xlu0 %118  ;;  %v122_v15 = vpop.xlane.xlu1 %121 }
  0xa8   :  { %v142_v14 = vmul.f32 0.03125, %v119_v12  ;;  %v172_v20 = vmul.f32 %v1618_v9, %v1618_v9  ;;  %v143_v22 = vmul.f32 0.03125, %v122_v15  ;;  %v173_v23 = vmul.f32 %v1622_v11, %v1622_v11 }
  0xa9   :  { %1181 = vmatpush3.bf16.msra.mxu0 %v1248_v55 }
  0xaa   :  { %v1630_v24 = vsub.f32 %v1529_v51, %v142_v14  ;;  %v208_v25 = vsel %vm80_vm0, %v172_v20, 0.0  ;;  %v1634_v26 = vsub.f32 %v1533_v53, %v143_v22  ;;  %v211_v34 = vsel %vm80_vm0, %v173_v23, 0.0 }
  0xab   :  { %206 = vadd.xlane.f32.xlu1 %v205_v17  ;;  %209 = vadd.xlane.f32.xlu0 %v208_v25  ;;  %v125_v28 = vpop.xlane.xlu0 %124  ;;  %v128_v33 = vpop.xlane.xlu1 %127 }
  0xac   :  { %v144_v31 = vmul.f32 0.03125, %v125_v28  ;;  %v174_v36 = vmul.f32 %v1630_v24, %v1630_v24  ;;  %v145_v38 = vmul.f32 0.03125, %v128_v33  ;;  %v175_v39 = vmul.f32 %v1634_v26, %v1634_v26 }
  0xae   :  { %v1642_v40 = vsub.f32 %v1549_v59, %v144_v31  ;;  %v214_v41 = vsel %vm80_vm0, %v174_v36, 0.0  ;;  %v1646_v44 = vsub.f32 %v1553_v61, %v145_v38  ;;  %v217_v47 = vsel %vm80_vm0, %v175_v39, 0.0 }
  0xaf   :  { %212 = vadd.xlane.f32.xlu1 %v211_v34  ;;  %215 = vadd.xlane.f32.xlu0 %v214_v41 }
  0xb0   :  { %v176_v48 = vmul.f32 %v1642_v40, %v1642_v40  ;;  %v177_v49 = vmul.f32 %v1646_v44, %v1646_v44 }
  0xb2   :  { %v220_v50 = vsel %vm80_vm0, %v176_v48, 0.0  ;;  %v223_v52 = vsel %vm80_vm0, %v177_v49, 0.0 }
  0xb3   :  { %218 = vadd.xlane.f32.xlu1 %v217_v47  ;;  %221 = vadd.xlane.f32.xlu0 %v220_v50  ;;  %v1664_v50 = vld [vmem:[%s2232_s2] ss:$0 sm:$0xff] }
  0xb7   :  { %224 = vadd.xlane.f32.xlu1 %v223_v52 }
 0x120   :  { %v180_v57 = vpop.xlane.xlu0 %179 }
 0x121   :  { %v226_v60 = vmul.f32 0.03125, %v180_v57 }
 0x123   :  { %v242_v62 = vadd.f32 1e-05, %v226_v60 }
 0x124   :  { %v183_v63 = vpop.xlane.xlu1 %182  ;;  %v186_v0 = vpop.xlane.xlu0 %185 }
 0x125   :  { %1257 = vrsqrt.f32 %v242_v62  ;;  %v227_v1 = vmul.f32 0.03125, %v183_v63  ;;  %v228_v2 = vmul.f32 0.03125, %v186_v0 }
 0x127   :  { %v243_v4 = vadd.f32 1e-05, %v227_v1  ;;  %v244_v10 = vadd.f32 1e-05, %v228_v2 }
 0x128   :  { %v189_v12 = vpop.xlane.xlu1 %188  ;;  %v192_v14 = vpop.xlane.xlu0 %191 }
 0x129   :  { %1259 = vrsqrt.f32 %v243_v4  ;;  %v229_v15 = vmul.f32 0.03125, %v189_v12  ;;  %v230_v17 = vmul.f32 0.03125, %v192_v14  ;;  %v1671_v4 = vld [vmem:[%s2233_s3] ss:$0 sm:$0xff] }
 0x12a   :  { %1261 = vrsqrt.f32 %v244_v10 }
 0x12b   :  { %v245_v20 = vadd.f32 1e-05, %v229_v15  ;;  %v246_v22 = vadd.f32 1e-05, %v230_v17 }
 0x12c   :  { %v195_v23 = vpop.xlane.xlu1 %194  ;;  %v198_v25 = vpop.xlane.xlu0 %197 }
 0x12d   :  { %1263 = vrsqrt.f32 %v245_v20  ;;  %v231_v28 = vmul.f32 0.03125, %v195_v23  ;;  %v232_v31 = vmul.f32 0.03125, %v198_v25 }
 0x12e   :  { %1265 = vrsqrt.f32 %v246_v22 }
 0x12f   :  { %v247_v33 = vadd.f32 1e-05, %v231_v28  ;;  %v248_v34 = vadd.f32 1e-05, %v232_v31 }
 0x130   :  { %v201_v36 = vpop.xlane.xlu1 %200  ;;  %v204_v38 = vpop.xlane.xlu0 %203 }
 0x131   :  { %1267 = vrsqrt.f32 %v247_v33  ;;  %v233_v39 = vmul.f32 0.03125, %v201_v36  ;;  %v234_v41 = vmul.f32 0.03125, %v204_v38 }
 0x132   :  { %v1258_v47 = vpop.eup %1257  ;;  %1269 = vrsqrt.f32 %v248_v34 }
 0x133   :  { %v249_v48 = vadd.f32 1e-05, %v233_v39  ;;  %v250_v49 = vadd.f32 1e-05, %v234_v41  ;;  %v274_v52 = vmul.f32 %v1258_v47, %v1560_v5 }
 0x134   :  { %v207_v54 = vpop.xlane.xlu1 %206  ;;  %v210_v55 = vpop.xlane.xlu0 %209 }
 0x135   :  { %1271 = vrsqrt.f32 %v249_v48  ;;  %v235_v57 = vmul.f32 0.03125, %v207_v54  ;;  %v236_v60 = vmul.f32 0.03125, %v210_v55  ;;  %v296_v63 = vmul.f32 %v1664_v50, %v274_v52 }
 0x136   :  { %v1260_v62 = vpop.eup %1259  ;;  %1273 = vrsqrt.f32 %v250_v49 }
 0x137   :  { %v1262_v0 = vpop.eup %1261  ;;  %v251_v1 = vadd.f32 1e-05, %v235_v57  ;;  %v252_v2 = vadd.f32 1e-05, %v236_v60  ;;  %v275_v10 = vmul.f32 %v1260_v62, %v1570_v16  ;;  %v318_v23 = vadd.f32 %v1671_v4, %v296_v63 }
 0x138   :  { %v213_v5 = vpop.xlane.xlu1 %212  ;;  %v216_v12 = vpop.xlane.xlu0 %215  ;;  %v276_v14 = vmul.f32 %v1262_v0, %v1563_v6 }
 0x139   :  { %1275 = vrsqrt.f32 %v251_v1  ;;  %v237_v15 = vmul.f32 0.03125, %v213_v5  ;;  %v238_v17 = vmul.f32 0.03125, %v216_v12  ;;  %v297_v20 = vmul.f32 %v1664_v50, %v275_v10 }
 0x13a   :  { %v1264_v22 = vpop.eup %1263  ;;  %1277 = vrsqrt.f32 %v252_v2  ;;  %v298_v6 = vmul.f32 %v1664_v50, %v276_v14 }
 0x13b   :  { %v1266_v25 = vpop.eup %1265  ;;  %v253_v28 = vadd.f32 1e-05, %v237_v15  ;;  %v254_v31 = vadd.f32 1e-05, %v238_v17  ;;  %v319_v33 = vadd.f32 %v1671_v4, %v297_v20  ;;  %v277_v16 = vmul.f32 %v1264_v22, %v1574_v18 }
 0x13c   :  { %v219_v34 = vpop.xlane.xlu1 %218  ;;  %v222_v36 = vpop.xlane.xlu0 %221  ;;  %v278_v38 = vmul.f32 %v1266_v25, %v1582_v30  ;;  %v320_v30 = vadd.f32 %v1671_v4, %v298_v6 }
 0x13d   :  { %1279 = vrsqrt.f32 %v253_v28  ;;  %v239_v39 = vmul.f32 0.03125, %v219_v34  ;;  %v240_v41 = vmul.f32 0.03125, %v222_v36  ;;  %v334_v47 = vpack.c.bf16 %v319_v33, %v318_v23 }
 0x13e   :  { %v1268_v48 = vpop.eup %1267  ;;  %1281 = vrsqrt.f32 %v254_v31  ;;  %v299_v49 = vmul.f32 %v1664_v50, %v277_v16  ;;  %v300_v52 = vmul.f32 %v1664_v50, %v278_v38 }
 0x13f   :  { %v1270_v54 = vpop.eup %1269  ;;  %v255_v55 = vadd.f32 1e-05, %v239_v39  ;;  %v256_v57 = vadd.f32 1e-05, %v240_v41  ;;  %1182 = vmatprep.mubr.msk.bf16.mxu0 %vm80_vm0, %v334_v47  ;;  %v279_v18 = vmul.f32 %v1268_v48, %v1586_v32 }
 0x140   :  { %v225_v60 = vpop.xlane.xlu1 %224  ;;  %v321_v62 = vadd.f32 %v1671_v4, %v299_v49  ;;  %v280_v63 = vmul.f32 %v1270_v54, %v1594_v42  ;;  %v322_v5 = vadd.f32 %v1671_v4, %v300_v52 }
 0x141   :  { %1283 = vrsqrt.f32 %v255_v55  ;;  %v241_v0 = vmul.f32 0.03125, %v225_v60  ;;  %v301_v1 = vmul.f32 %v1664_v50, %v279_v18 }
 0x142   :  { %v1272_v2 = vpop.eup %1271  ;;  %1285 = vrsqrt.f32 %v256_v57  ;;  %v335_v10 = vpack.c.bf16 %v321_v62, %v320_v30  ;;  %v302_v17 = vmul.f32 %v1664_v50, %v280_v63 }
 0x143   :  { %v1274_v12 = vpop.eup %1273  ;;  %v257_v14 = vadd.f32 1e-05, %v241_v0  ;;  %v323_v32 = vadd.f32 %v1671_v4, %v301_v1  ;;  %v281_v15 = vmul.f32 %v1272_v2, %v1598_v46 }
 0x144   :  { %1183 = vmatmul.mubr.msk.bf16.vlgmr.msra.gmra.mxu0 %vm80_vm0, %v335_v10  ;;  %v282_v42 = vmul.f32 %v1274_v12, %v1606_v56  ;;  %v324_v28 = vadd.f32 %v1671_v4, %v302_v17  ;;  %v1252_v12 = vld [vmem:[%s2234_s6 + $0x20] sm:$0xff]  }
 0x145   :  { %1287 = vrsqrt.f32 %v257_v14  ;;  %v336_v20 = vpack.c.bf16 %v323_v32, %v322_v5  ;;  %v303_v22 = vmul.f32 %v1664_v50, %v281_v15  ;;  %v1253_v14 = vld [vmem:[%s2234_s6 + $0x18] sm:$0xff]   ;;  %v1254_v32 = vld [vmem:[%s2234_s6 + $0x10] sm:$0xff]   ;;  %v1255_v15 = vld [vmem:[%s2234_s6 + $0x8] sm:$0xff]  }
 0x146   :  { %v1276_v23 = vpop.eup %1275  ;;  %v304_v33 = vmul.f32 %v1664_v50, %v282_v42  ;;  %v1256_v17 = vld [vmem:[%s2234_s6] sm:$0xff]  }
 0x147   :  { %v1278_v25 = vpop.eup %1277  ;;  %1186 = vmatprep.mubr.msk.bf16.mxu0 %vm80_vm0, %v336_v20  ;;  %v325_v31 = vadd.f32 %v1671_v4, %v303_v22  ;;  %v283_v46 = vmul.f32 %v1276_v23, %v1610_v58  ;;  %v1754_v42 = vld [vmem:[%s2235_s5] ss:$0 sm:$0xff] }
 0x148   :  { %v284_v16 = vmul.f32 %v1278_v25, %v1618_v9  ;;  %v326_v38 = vadd.f32 %v1671_v4, %v304_v33 }
 0x149   :  { %v337_v34 = vpack.c.bf16 %v325_v31, %v324_v28  ;;  %v305_v56 = vmul.f32 %v1664_v50, %v283_v46 }
 0x14a   :  { %v1280_v36 = vpop.eup %1279  ;;  %v306_v47 = vmul.f32 %v1664_v50, %v284_v16 }
 0x14b   :  { %v1282_v6 = vpop.eup %1281  ;;  %v327_v39 = vadd.f32 %v1671_v4, %v305_v56  ;;  %v285_v41 = vmul.f32 %v1280_v36, %v1622_v11 }
 0x14c   :  { %1187 = vmatmul.mubr.msk.bf16.gmra.mxu0 %vm80_vm0, %v337_v34  ;;  %v286_v58 = vmul.f32 %v1282_v6, %v1630_v24  ;;  %v328_v54 = vadd.f32 %v1671_v4, %v306_v47 }
 0x14d   :  { %v338_v48 = vpack.c.bf16 %v327_v39, %v326_v38  ;;  %v307_v9 = vmul.f32 %v1664_v50, %v285_v41 }
 0x14e   :  { %v1284_v49 = vpop.eup %1283  ;;  %v308_v11 = vmul.f32 %v1664_v50, %v286_v58 }
 0x14f   :  { %v1286_v52 = vpop.eup %1285  ;;  %1190 = vmatprep.mubr.msk.bf16.mxu0 %vm80_vm0, %v338_v48  ;;  %v329_v55 = vadd.f32 %v1671_v4, %v307_v9  ;;  %v287_v57 = vmul.f32 %v1284_v49, %v1634_v26 }
 0x150   :  { %v288_v18 = vmul.f32 %v1286_v52, %v1642_v40  ;;  %v330_v62 = vadd.f32 %v1671_v4, %v308_v11 }
 0x151   :  { %v339_v60 = vpack.c.bf16 %v329_v55, %v328_v54  ;;  %v309_v24 = vmul.f32 %v1664_v50, %v287_v57 }
 0x152   :  { %v1288_v30 = vpop.eup %1287  ;;  %v310_v1 = vmul.f32 %v1664_v50, %v288_v18 }
 0x153   :  { %v331_v63 = vadd.f32 %v1671_v4, %v309_v24  ;;  %v289_v0 = vmul.f32 %v1288_v30, %v1646_v44  ;;  %v1249_v44 = vld [vmem:[%s2234_s6 + $0x38] sm:$0xff]  }
 0x154   :  { %1191 = vmatmul.mubr.msk.bf16.gmra.mxu0 %vm80_vm0, %v339_v60  ;;  %v332_v40 = vadd.f32 %v1671_v4, %v310_v1  ;;  %1198 = vmatprep.subr.bf16.mxu0 %v1249_v44 }
 0x155   :  { %v340_v2 = vpack.c.bf16 %v331_v63, %v330_v62  ;;  %v311_v26 = vmul.f32 %v1664_v50, %v289_v0  ;;  %1230 = vmatprep.subr.bf16.mxu1 %v1249_v44  ;;  %1199 = vmatpush3.bf16.msra.mxu0 %v1249_v44  ;;  %v1250_v50 = vld [vmem:[%s2234_s6 + $0x30] sm:$0xff]  }
 0x156   :  { %1238 = vmatpush3.bf16.msra.mxu1 %v1249_v44  ;;  %1200 = vmatprep.subr.bf16.mxu0 %v1250_v50 }
 0x157   :  { %1194 = vmatprep.mubr.msk.bf16.mxu0 %vm80_vm0, %v340_v2  ;;  %v333_v10 = vadd.f32 %v1671_v4, %v311_v26  ;;  %1231 = vmatprep.subr.bf16.mxu1 %v1250_v50  ;;  %v1251_v4 = vld [vmem:[%s2234_s6 + $0x28] sm:$0xff]  }
 0x159   :  { %v341_v5 = vpack.c.bf16 %v333_v10, %v332_v40  ;;  %1201 = vmatpush3.bf16.msra.mxu0 %v1250_v50 }
 0x15a   :  { %1239 = vmatpush3.bf16.msra.mxu1 %v1250_v50  ;;  %1202 = vmatprep.subr.bf16.mxu0 %v1251_v4 }
 0x15b   :  { %1232 = vmatprep.subr.bf16.mxu1 %v1251_v4 }
 0x15c   :  { %1195 = vmatmul.mubr.msk.bf16.gmra.mxu0 %vm80_vm0, %v341_v5 }
 0x15d   :  { %1203 = vmatpush3.bf16.msra.mxu0 %v1251_v4 }
 0x15e   :  { %1240 = vmatpush3.bf16.msra.mxu1 %v1251_v4  ;;  %1204 = vmatprep.subr.bf16.mxu0 %v1252_v12 }
 0x15f   :  { %1233 = vmatprep.subr.bf16.mxu1 %v1252_v12 }
 0x161   :  { %1205 = vmatpush3.bf16.msra.mxu0 %v1252_v12 }
 0x162   :  { %1241 = vmatpush3.bf16.msra.mxu1 %v1252_v12  ;;  %1206 = vmatprep.subr.bf16.mxu0 %v1253_v14 }
 0x163   :  { %1234 = vmatprep.subr.bf16.mxu1 %v1253_v14 }
 0x165   :  { %1207 = vmatpush3.bf16.msra.mxu0 %v1253_v14 }
 0x166   :  { %1242 = vmatpush3.bf16.msra.mxu1 %v1253_v14  ;;  %1208 = vmatprep.subr.bf16.mxu0 %v1254_v32 }
 0x167   :  { %1235 = vmatprep.subr.bf16.mxu1 %v1254_v32 }
 0x169   :  { %1209 = vmatpush3.bf16.msra.mxu0 %v1254_v32 }
 0x16a   :  { %1243 = vmatpush3.bf16.msra.mxu1 %v1254_v32  ;;  %1210 = vmatprep.subr.bf16.mxu0 %v1255_v15 }
 0x16b   :  { %1236 = vmatprep.subr.bf16.mxu1 %v1255_v15 }
 0x16d   :  { %1211 = vmatpush3.bf16.msra.mxu0 %v1255_v15 }
 0x16e   :  { %1244 = vmatpush3.bf16.msra.mxu1 %v1255_v15  ;;  %1212 = vmatprep.subr.bf16.mxu0 %v1256_v17 }
 0x16f   :  { %1237 = vmatprep.subr.bf16.mxu1 %v1256_v17 }
 0x171   :  { %1213 = vmatpush3.bf16.msra.mxu0 %v1256_v17 }
 0x172   :  { %1245 = vmatpush3.bf16.msra.mxu1 %v1256_v17 }
 0x204   :  { %v1184_v20 = vpop.f32.mrf.mxu0 }
 0x205   :  { %v432_v22 = vadd.f32 %v1184_v20, %v1754_v42  ;;  %v2238_v20 = vmov -1.0  }
 0x206   :  { %v423_v23 = vpop.f32.mrf.mxu0 }
 0x207   :  { %v504_v25 = vmul.f32 0.70710677, %v432_v22  ;;  %v424_v28 = vadd.f32 %v1754_v42, %v423_v23  ;;  %v1796_v14 = vmul.f32 0.5, %v432_v22 }
 0x208   :  { %v1185_v31 = vpop.f32.mrf.mxu0 }
 0x209   :  { %v552_v46 = vand.u32 2147483647, %v504_v25  ;;  %v502_v33 = vmul.f32 0.70710677, %v424_v28  ;;  %v435_v16 = vadd.f32 %v1185_v31, %v1754_v42  ;;  %vm520_vm1 = vcmp.ge.f32.partialorder %v504_v25, 0.0 }
 0x20a   :  { %v426_v34 = vpop.f32.mrf.mxu0  ;;  %v1799_v23 = vsel %vm520_vm1, 1.0, %v2238_v20  ;;  %v1801_v31 = vmul.f32 0.5, %v424_v28 }
 0x20b   :  { %v568_v56 = vmul.f32 0.3275911, %v552_v46  ;;  %v550_v36 = vand.u32 2147483647, %v502_v33  ;;  %v1759_v6 = vmul.f32 0.70710677, %v435_v16  ;;  %v427_v38 = vadd.f32 %v1754_v42, %v426_v34 }
 0x20c   :  { %v1188_v39 = vpop.f32.mrf.mxu0  ;;  %v776_v26 = vsub.f32 0.0, %v552_v46  ;;  %vm518_vm2 = vcmp.ge.f32.partialorder %v502_v33, 0.0 }
 0x20d   :  { %v584_v41 = vadd.f32 1.0, %v568_v56  ;;  %v566_v47 = vmul.f32 0.3275911, %v550_v36  ;;  %v553_v58 = vand.u32 2147483647, %v1759_v6  ;;  %v1769_v57 = vadd.f32 %v1188_v39, %v1754_v42 }
 0x20e   :  { %v1763_v48 = vmul.f32 0.70710677, %v427_v38  ;;  %v439_v49 = vpop.f32.mrf.mxu0  ;;  %v774_v5 = vsub.f32 0.0, %v550_v36  ;;  %v792_v15 = vmul.f32 %v776_v26, %v552_v46  ;;  %v1808_v39 = vsel %vm518_vm2, 1.0, %v2238_v20 }
 0x20f   :  { %1289 = vrcp.f32 %v584_v41  ;;  %v582_v9 = vadd.f32 1.0, %v566_v47  ;;  %v569_v52 = vmul.f32 0.3275911, %v553_v58  ;;  %v1773_v60 = vmul.f32 0.70710677, %v1769_v57 }
 0x210   :  { %v1766_v54 = vand.u32 2147483647, %v1763_v48  ;;  %v1189_v18 = vpop.f32.mrf.mxu0  ;;  %v790_v34 = vmul.f32 %v774_v5, %v550_v36  ;;  %v777_v22 = vsub.f32 0.0, %v553_v58  ;;  %v1810_v41 = vmul.f32 0.5, %v435_v16 }
 0x211   :  { %1291 = vrcp.f32 %v582_v9  ;;  %v585_v55 = vadd.f32 1.0, %v569_v52  ;;  %v1776_v30 = vand.u32 2147483647, %v1773_v60  ;;  %v1779_v62 = vadd.f32 %v1189_v18, %v1754_v42 }
 0x212   :  { %v567_v11 = vmul.f32 0.3275911, %v1766_v54  ;;  %v1785_v2 = vpop.f32.mrf.mxu0  ;;  %v810_v36 = vmul.f32 1.442695, %v792_v15  ;;  %vm521_vm3 = vcmp.ge.f32.partialorder %v1759_v6, 0.0  ;;  %v440_v16 = vadd.f32 %v1754_v42, %v439_v49 }
 0x213   :  { %1293 = vrcp.f32 %v585_v55  ;;  %v572_v63 = vmul.f32 0.3275911, %v1776_v30  ;;  %v1783_v0 = vmul.f32 0.70710677, %v1779_v62  ;;  %v1817_v55 = vmul.f32 0.5, %v427_v38 }
 0x214   :  { %v583_v24 = vadd.f32 1.0, %v567_v11  ;;  %v1192_v4 = vpop.f32.mrf.mxu0  ;;  %vm519_vm4 = vcmp.ge.f32.partialorder %v1763_v48, 0.0  ;;  %vm524_vm5 = vcmp.ge.f32.partialorder %v1773_v60, 0.0 }
 0x215   :  { %v588_v1 = vadd.f32 1.0, %v572_v63  ;;  %v1788_v40 = vand.u32 2147483647, %v1783_v0  ;;  %v1814_v28 = vadd.f32 %v1192_v4, %v1754_v42  ;;  %v1840_v15 = vsel %vm519_vm4, 1.0, %v2238_v20 }
 0x216   :  { %1295 = vrcp.f32 %v583_v24  ;;  %v455_v9 = vpop.f32.mrf.mxu0  ;;  %v806_v24 = vmul.f32 1.442695, %v790_v34  ;;  %vm525_vm6 = vcmp.ge.f32.partialorder %v1783_v0, 0.0 }
 0x217   :  { %1297 = vrcp.f32 %v588_v1  ;;  %v573_v50 = vmul.f32 0.3275911, %v1788_v40  ;;  %v793_v1 = vmul.f32 %v777_v22, %v553_v58  ;;  %v1826_v5 = vadd.f32 %v1754_v42, %v455_v9 }
 0x218   :  { %v1831_v4 = vmul.f32 0.70710677, %v1814_v28  ;;  %v1837_v58 = vsel %vm521_vm3, 1.0, %v2238_v20  ;;  %v443_v9 = vadd.f32 %v1754_v42, %v1785_v2 }
 0x219   :  { %v589_v17 = vadd.f32 1.0, %v573_v50  ;;  %v775_v50 = vsub.f32 0.0, %v1766_v54 }
 0x21a   :  { %vm528_vm7 = vcmp.ge.f32.partialorder %v1831_v4, 0.0 }
 0x21b   :  { %1299 = vrcp.f32 %v589_v17  ;;  %v1842_v17 = vmul.f32 0.70710677, %v440_v16  ;;  %v791_v6 = vmul.f32 %v775_v50, %v1766_v54  ;;  %v1864_v54 = vmul.f32 0.5, %v440_v16 }
 0x21c   :  { %v1790_v10 = vpop.eup %1289  ;;  %1301 = vpow2.f32 %v810_v36 }
 0x21d   :  { %v632_v44 = vmul.f32 1.0614054, %v1790_v10  ;;  %1303 = vpow2.f32 %v806_v24  ;;  %vm522_vm11 = vcmp.ge.f32.partialorder %v1842_v17, 0.0 }
 0x21e   :  { %v1794_v12 = vpop.eup %1291 }
 0x21f   :  { %v648_v32 = vadd.f32 -1.4531521, %v632_v44  ;;  %v630_v25 = vmul.f32 1.0614054, %v1794_v12 }
 0x220   :  { %v1804_v56 = vpop.eup %1293 }
 0x221   :  { %v664_v33 = vmul.f32 %v1790_v10, %v648_v32  ;;  %v646_v46 = vadd.f32 -1.4531521, %v630_v25  ;;  %v633_v47 = vmul.f32 1.0614054, %v1804_v56 }
 0x223   :  { %v680_v52 = vadd.f32 1.4214138, %v664_v33  ;;  %v1819_v11 = vpop.eup %1295  ;;  %v662_v18 = vmul.f32 %v1794_v12, %v646_v46  ;;  %v649_v63 = vadd.f32 -1.4531521, %v633_v47  ;;  %v812_v33 = vmul.f32 1.442695, %v793_v1 }
 0x224   :  { %v631_v26 = vmul.f32 1.0614054, %v1819_v11  ;;  %v1844_v25 = vpop.eup %1297  ;;  %v1849_v46 = vmul.f32 0.70710677, %v1826_v5  ;;  %v780_v1 = vsub.f32 0.0, %v1776_v30 }
 0x225   :  { %v678_v44 = vadd.f32 1.4214138, %v662_v18  ;;  %v665_v38 = vmul.f32 %v1804_v56, %v649_v63  ;;  %v696_v32 = vmul.f32 %v1790_v10, %v680_v52  ;;  %v636_v47 = vmul.f32 1.0614054, %v1844_v25 }
 0x226   :  { %v647_v48 = vadd.f32 -1.4531521, %v631_v26  ;;  %v1856_v52 = vand.u32 2147483647, %v1831_v4  ;;  %v1860_v63 = vmul.f32 0.5, %v1769_v57  ;;  %1305 = vpow2.f32 %v812_v33  ;;  %v1193_v33 = vpop.f32.mrf.mxu0 }
 0x227   :  { %v681_v49 = vadd.f32 1.4214138, %v665_v38  ;;  %v694_v34 = vmul.f32 %v1794_v12, %v678_v44  ;;  %v712_v36 = vadd.f32 -0.28449672, %v696_v32  ;;  %v554_v26 = vand.u32 2147483647, %v1842_v17 }
 0x228   :  { %v663_v22 = vmul.f32 %v1819_v11, %v647_v48  ;;  %v652_v2 = vadd.f32 -1.4531521, %v636_v47  ;;  %v1868_v38 = vand.u32 2147483647, %v1849_v46  ;;  %v1870_v50 = vpop.eup %1299  ;;  %v808_v57 = vmul.f32 1.442695, %v791_v6 }
 0x229   :  { %v697_v18 = vmul.f32 %v1804_v56, %v681_v49  ;;  %v710_v44 = vadd.f32 -0.28449672, %v694_v34  ;;  %v1873_v48 = vmul.f32 0.70710677, %v443_v9  ;;  %v576_v49 = vmul.f32 0.3275911, %v1856_v52 }
 0x22a   :  { %v679_v24 = vadd.f32 1.4214138, %v663_v22  ;;  %v728_v16 = vmul.f32 %v1790_v10, %v712_v36  ;;  %v637_v20 = vmul.f32 1.0614054, %v1870_v50  ;;  %v574_v34 = vmul.f32 0.3275911, %v1868_v38 }
 0x22b   :  { %v713_v22 = vadd.f32 -0.28449672, %v697_v18  ;;  %v2272_v47 = vmov -1.0   ;;  %v570_v6 = vmul.f32 0.3275911, %v554_v26  ;;  %v778_v61 = vsub.f32 0.0, %v554_v26 }
 0x22c   :  { %v695_v32 = vmul.f32 %v1819_v11, %v679_v24  ;;  %v1882_v53 = vsel %vm524_vm5, 1.0, %v2272_v47  ;;  %v796_v24 = vmul.f32 %v780_v1, %v1776_v30  ;;  %v726_v51 = vmul.f32 %v1794_v12, %v710_v44  ;;  %v1302_v1 = vpop.eup %1301 }
 0x22d   :  { %v668_v59 = vmul.f32 %v1844_v25, %v652_v2  ;;  %v781_v36 = vsub.f32 0.0, %v1788_v40  ;;  %v590_v18 = vadd.f32 1.0, %v574_v34  ;;  %v555_v45 = vand.u32 2147483647, %v1873_v48 }
 0x22e   :  { %v711_v37 = vadd.f32 -0.28449672, %v695_v32  ;;  %v592_v35 = vadd.f32 1.0, %v576_v49  ;;  %v1890_v43 = vadd.f32 %v1193_v33, %v1754_v42  ;;  %v744_v60 = vadd.f32 0.2548296, %v728_v16  ;;  %v1304_v32 = vpop.eup %1303  ;;  %v458_v33 = vpop.f32.mrf.mxu0 }
 0x22f   :  { %v729_v21 = vmul.f32 %v1804_v56, %v713_v22  ;;  %v653_v30 = vadd.f32 -1.4531521, %v637_v20  ;;  %1307 = vrcp.f32 %v590_v18  ;;  %v818_v44 = vmul.f32 1.442695, %v796_v24 }
 0x230   :  { %1309 = vpow2.f32 %v808_v57  ;;  %v1894_v2 = vmul.f32 0.5, %v1779_v62  ;;  %v742_v34 = vadd.f32 0.2548296, %v726_v51  ;;  %v684_v29 = vadd.f32 1.4214138, %v668_v59 }
 0x231   :  { %v586_v49 = vadd.f32 1.0, %v570_v6  ;;  %v794_v19 = vmul.f32 %v778_v61, %v554_v26  ;;  %v727_v16 = vmul.f32 %v1819_v11, %v711_v37  ;;  %v797_v22 = vmul.f32 %v781_v36, %v1788_v40 }
 0x232   :  { %v779_v20 = vsub.f32 0.0, %v555_v45  ;;  %1311 = vrcp.f32 %v592_v35  ;;  %v760_v57 = vmul.f32 %v1790_v10, %v744_v60  ;;  %v745_v24 = vadd.f32 0.2548296, %v729_v21 }
 0x233   :  { %v669_v62 = vmul.f32 %v1870_v50, %v653_v30  ;;  %v1902_v18 = vmul.f32 0.70710677, %v1890_v43  ;;  %v1905_v51 = vsel %vm525_vm6, 1.0, %v2272_v47  ;;  %v1907_v59 = vmul.f32 0.5, %v443_v9  ;;  %v1306_v40 = vpop.eup %1305 }
 0x234   :  { %v571_v61 = vmul.f32 0.3275911, %v555_v45  ;;  %v1910_v37 = vadd.f32 %v1754_v42, %v458_v33  ;;  %v758_v0 = vmul.f32 %v1794_v12, %v742_v34  ;;  %v700_v35 = vmul.f32 %v1844_v25, %v684_v29 }
 0x235   :  { %1313 = vpow2.f32 %v818_v44  ;;  %v814_v21 = vmul.f32 1.442695, %v794_v19  ;;  %v743_v10 = vadd.f32 0.2548296, %v727_v16  ;;  %v820_v26 = vmul.f32 1.442695, %v797_v22 }
 0x236   :  { %1315 = vrcp.f32 %v586_v49  ;;  %v795_v6 = vmul.f32 %v779_v20, %v555_v45  ;;  %v840_v36 = vmul.f32 %v1302_v1, %v760_v57  ;;  %v761_v60 = vmul.f32 %v1804_v56, %v745_v24  ;;  %v1196_v1 = vpop.f32.mrf.mxu0 }
 0x237   :  { %v685_v9 = vadd.f32 1.4214138, %v669_v62  ;;  %v1916_v30 = vand.u32 2147483647, %v1902_v18  ;;  %v587_v33 = vadd.f32 1.0, %v571_v61  ;;  %v784_v27 = vsub.f32 0.0, %v1856_v52 }
 0x238   :  { %v782_v12 = vsub.f32 0.0, %v1868_v38  ;;  %v1921_v29 = vmul.f32 0.70710677, %v1910_v37  ;;  %v838_v19 = vmul.f32 %v1304_v32, %v758_v0  ;;  %v716_v44 = vadd.f32 -0.28449672, %v700_v35 }
 0x239   :  { %1317 = vpow2.f32 %v814_v21  ;;  %v577_v45 = vmul.f32 0.3275911, %v1916_v30  ;;  %v759_v56 = vmul.f32 %v1819_v11, %v743_v10  ;;  %v816_v34 = vmul.f32 1.442695, %v795_v6  ;;  %v471_v21 = vpop.f32.mrf.mxu0 }
 0x23a   :  { %1319 = vpow2.f32 %v820_v26  ;;  %v856_v49 = vsub.f32 1.0, %v840_v36  ;;  %v841_v16 = vmul.f32 %v1306_v40, %v761_v60  ;;  %v701_v22 = vmul.f32 %v1870_v50, %v685_v9 }
 0x23b   :  { %v593_v20 = vadd.f32 1.0, %v577_v45  ;;  %1321 = vrcp.f32 %v587_v33  ;;  %v800_v32 = vmul.f32 %v784_v27, %v1856_v52  ;;  %v798_v24 = vmul.f32 %v782_v12, %v1868_v38  ;;  %v1197_v45 = vpop.f32.mrf.mxu0 }
 0x23c   :  { %v1927_v57 = vpop.eup %1307  ;;  %v1932_v62 = vand.u32 2147483647, %v1921_v29  ;;  %v854_v61 = vsub.f32 1.0, %v838_v19  ;;  %v732_v0 = vmul.f32 %v1844_v25, %v716_v44  ;;  %v1939_v10 = vsel %vm528_vm7, 1.0, %v2272_v47 }
 0x23d   :  { %v1310_v11 = vpop.eup %1309  ;;  %v638_v35 = vmul.f32 1.0614054, %v1927_v57  ;;  %1323 = vrcp.f32 %v593_v20  ;;  %v872_v38 = vmul.f32 %v856_v49, %v1799_v23  ;;  %v857_v26 = vsub.f32 1.0, %v841_v16 }
 0x23e   :  { %v839_v40 = vmul.f32 %v1310_v11, %v759_v56  ;;  %1325 = vpow2.f32 %v816_v34  ;;  %v575_v27 = vmul.f32 0.3275911, %v1932_v62  ;;  %v717_v6 = vadd.f32 -0.28449672, %v701_v22 }
 0x23f   :  { %v1942_v52 = vpop.eup %1311  ;;  %v1946_v36 = vadd.f32 %v1196_v1, %v1754_v42  ;;  %v826_v60 = vmul.f32 1.442695, %v800_v32  ;;  %v1949_v9 = vmul.f32 0.5, %v1826_v5  ;;  %vm526_vm8 = vcmp.ge.f32.partialorder %v1849_v46, 0.0 }
 0x240   :  { %v591_v4 = vadd.f32 1.0, %v575_v27  ;;  %v870_v33 = vmul.f32 %v854_v61, %v1808_v39  ;;  %v748_v12 = vadd.f32 0.2548296, %v732_v0  ;;  %v654_v19 = vadd.f32 -1.4531521, %v638_v35 }
 0x241   :  { %v822_v44 = vmul.f32 1.442695, %v798_v24  ;;  %v855_v23 = vsub.f32 1.0, %v839_v40  ;;  %v1954_v34 = vmul.f32 0.70710677, %v1946_v36  ;;  %v1957_v1 = vadd.f32 %v1754_v42, %v471_v21 }
 0x242   :  { %v1314_v56 = vpop.eup %1313  ;;  %1327 = vrcp.f32 %v591_v4  ;;  %v888_v49 = vadd.f32 1.0, %v872_v38  ;;  %v873_v16 = vmul.f32 %v857_v26, %v1837_v58  ;;  %v733_v39 = vmul.f32 %v1870_v50, %v717_v6 }
 0x243   :  { %v1959_v5 = vpop.eup %1315  ;;  %v640_v22 = vmul.f32 1.0614054, %v1942_v52  ;;  %1329 = vpow2.f32 %v826_v60  ;;  %v1967_v20 = vsel %vm526_vm8, 1.0, %v2272_v47  ;;  %v1970_v32 = vand.u32 2147483647, %v1954_v34 }
 0x244   :  { %v1973_v24 = vadd.f32 %v1197_v45, %v1754_v42  ;;  %v886_v11 = vadd.f32 1.0, %v870_v33  ;;  %v764_v61 = vmul.f32 %v1844_v25, %v748_v12  ;;  %v670_v58 = vmul.f32 %v1927_v57, %v654_v19  ;;  %v474_v33 = vpop.f32.mrf.mxu0 }
 0x245   :  { %1331 = vpow2.f32 %v822_v44  ;;  %v871_v35 = vmul.f32 %v855_v23, %v1840_v15  ;;  %vm529_vm9 = vcmp.ge.f32.partialorder %v1902_v18, 0.0  ;;  %v580_v46 = vmul.f32 0.3275911, %v1970_v32 }
 0x246   :  { %v1977_v0 = vpop.eup %1317  ;;  %v1983_v21 = vmul.f32 0.70710677, %v1957_v1  ;;  %v1986_v27 = vmul.f32 %v888_v49, %v1796_v14  ;;  %v889_v38 = vadd.f32 1.0, %v873_v16  ;;  %v749_v25 = vadd.f32 0.2548296, %v733_v39 }
 0x247   :  { %v1320_v40 = vpop.eup %1319  ;;  %v656_v26 = vadd.f32 -1.4531521, %v640_v22  ;;  %v783_v6 = vsub.f32 0.0, %v1932_v62  ;;  %v596_v60 = vadd.f32 1.0, %v580_v46  ;;  %v1993_v15 = vmul.f32 0.70710677, %v1973_v24 }
 0x248   :  { %v1990_v4 = vand.u32 2147483647, %v1983_v21  ;;  %v1995_v12 = vpop.eup %1321  ;;  %v902_v19 = vmul.f32 %v886_v11, %v1801_v31  ;;  %v844_v44 = vmul.f32 %v1314_v56, %v764_v61  ;;  %v686_v14 = vadd.f32 1.4214138, %v670_v58 }
 0x249   :  { %v2001_v45 = vsel %vm529_vm9, 1.0, %v2272_v47  ;;  %v887_v49 = vadd.f32 1.0, %v871_v35  ;;  %v785_v16 = vsub.f32 0.0, %v1916_v30  ;;  %1333 = vrcp.f32 %v596_v60 }
 0x24a   :  { %v2003_v23 = vpop.eup %1323  ;;  %v578_v39 = vmul.f32 0.3275911, %v1990_v4  ;;  %v765_v46 = vmul.f32 %v1870_v50, %v749_v25  ;;  %v672_v31 = vmul.f32 %v1942_v52, %v656_v26  ;;  %v2013_v18 = vadd.f32 %v1754_v42, %v474_v33 }
 0x24b   :  { %v2007_v22 = vpop.eup %1325  ;;  %v641_v56 = vmul.f32 1.0614054, %v2003_v23  ;;  %v905_v11 = vmul.f32 %v889_v38, %v1810_v41  ;;  %v799_v61 = vmul.f32 %v783_v6, %v1932_v62  ;;  %v2018_v35 = vand.u32 2147483647, %v1993_v15 }
 0x24c   :  { %v594_v58 = vadd.f32 1.0, %v578_v39  ;;  %v860_v60 = vsub.f32 1.0, %v844_v44  ;;  %v702_v8 = vmul.f32 %v1927_v57, %v686_v14  ;;  %v2022_v50 = vmul.f32 0.5, %v1910_v37 }
 0x24d   :  { %v657_v13 = vadd.f32 -1.4531521, %v641_v56  ;;  %v903_v25 = vmul.f32 %v887_v49, %v1817_v55  ;;  %v801_v42 = vmul.f32 %v785_v16, %v1916_v30  ;;  %v581_v41 = vmul.f32 0.3275911, %v2018_v35 }
 0x24e   :  { %1335 = vrcp.f32 %v594_v58  ;;  %v845_v62 = vmul.f32 %v1320_v40, %v765_v46  ;;  %v688_v26 = vadd.f32 1.4214138, %v672_v31  ;;  %v2031_v33 = vmul.f32 0.70710677, %v2013_v18 }
 0x24f   :  { %v2027_v38 = vpop.eup %1327  ;;  %v673_v6 = vmul.f32 %v2003_v23, %v657_v13  ;;  %v824_v37 = vmul.f32 1.442695, %v799_v61  ;;  %v788_v14 = vsub.f32 0.0, %v1970_v32  ;;  %v597_v55 = vadd.f32 1.0, %v581_v41 }
 0x250   :  { %v639_v44 = vmul.f32 1.0614054, %v2027_v38  ;;  %v2035_v49 = vpop.eup %1329  ;;  %v919_v30 = vpack.c.bf16 %v905_v11, %v1986_v27  ;;  %v718_v16 = vadd.f32 -0.28449672, %v702_v8  ;;  %v563_v40 = vand.u32 2147483647, %v2031_v33 }
 0x251   :  { %v689_v39 = vadd.f32 1.4214138, %v673_v6  ;;  %v828_v13 = vmul.f32 1.442695, %v801_v42  ;;  %vm527_vm10 = vcmp.ge.f32.partialorder %v1921_v29, 0.0  ;;  %1337 = vrcp.f32 %v597_v55 }
 0x252   :  { %v2039_v46 = vpop.eup %1331  ;;  %v655_v31 = vadd.f32 -1.4531521, %v639_v44  ;;  %v2043_v56 = vmul.f32 %v860_v60, %v1882_v53  ;;  %v861_v61 = vsub.f32 1.0, %v845_v62  ;;  %v704_v58 = vmul.f32 %v1942_v52, %v688_v26 }
 0x253   :  { %v579_v41 = vmul.f32 0.3275911, %v563_v40  ;;  %1339 = vpow2.f32 %v824_v37  ;;  %v804_v8 = vmul.f32 %v788_v14, %v1970_v32  ;;  %v918_v11 = vpack.c.bf16 %v903_v25, %v902_v19 }
 0x254   :  { %v671_v27 = vmul.f32 %v2027_v38, %v655_v31  ;;  %v734_v6 = vmul.f32 %v1927_v57, %v718_v16  ;;  %v705_v42 = vmul.f32 %v2003_v23, %v689_v39  ;;  %v786_v44 = vsub.f32 0.0, %v1990_v4 }
 0x255   :  { %v595_v55 = vadd.f32 1.0, %v579_v41  ;;  %1341 = vpow2.f32 %v828_v13  ;;  %v2054_v53 = vsel %vm527_vm10, 1.0, %v2272_v47  ;;  %1214 = vmatprep.mubr.bf16.mxu0 %v918_v11  ;;  %v634_v62 = vmul.f32 1.0614054, %v1959_v5 }
 0x256   :  { %v687_v60 = vadd.f32 1.4214138, %v671_v27  ;;  %v2057_v26 = vpop.eup %1333  ;;  %v877_v32 = vmul.f32 %v861_v61, %v1905_v51  ;;  %v720_v19 = vadd.f32 -0.28449672, %v704_v58  ;;  %v789_v25 = vsub.f32 0.0, %v2018_v35  ;;  %1215 = vmatmul.mubr.bf16.vlgmr.msra.gmra.mxu0 %v919_v30 }
 0x257   :  { %1343 = vrcp.f32 %v595_v55  ;;  %v644_v14 = vmul.f32 1.0614054, %v2057_v26  ;;  %v635_v29 = vmul.f32 1.0614054, %v1995_v12  ;;  %v650_v16 = vadd.f32 -1.4531521, %v634_v62 }
 0x258   :  { %v703_v37 = vmul.f32 %v2027_v38, %v687_v60  ;;  %v750_v39 = vadd.f32 0.2548296, %v734_v6  ;;  %v721_v13 = vadd.f32 -0.28449672, %v705_v42  ;;  %v834_v31 = vmul.f32 1.442695, %v804_v8 }
 0x259   :  { %v802_v41 = vmul.f32 %v786_v44, %v1990_v4  ;;  %v660_v11 = vadd.f32 -1.4531521, %v644_v14  ;;  %v651_v51 = vadd.f32 -1.4531521, %v635_v29  ;;  %v666_v61 = vmul.f32 %v1959_v5, %v650_v16 }
 0x25a   :  { %v719_v27 = vadd.f32 -0.28449672, %v703_v37  ;;  %v2068_v30 = vadd.f32 1.0, %v877_v32  ;;  %v736_v55 = vmul.f32 %v1942_v52, %v720_v19  ;;  %v805_v60 = vmul.f32 %v789_v25, %v2018_v35 }
 0x25b   :  { %v2066_v58 = vpop.eup %1335  ;;  %v787_v3 = vsub.f32 0.0, %v563_v40  ;;  %v676_v8 = vmul.f32 %v2057_v26, %v660_v11  ;;  %v667_v42 = vmul.f32 %v1995_v12, %v651_v51  ;;  %v766_v44 = vmul.f32 %v1927_v57, %v750_v39 }
 0x25c   :  { %v735_v6 = vmul.f32 %v2027_v38, %v719_v27  ;;  %v642_v4 = vmul.f32 1.0614054, %v2066_v58  ;;  %1345 = vpow2.f32 %v834_v31  ;;  %v830_v62 = vmul.f32 1.442695, %v802_v41 }
 0x25d   :  { %v682_v37 = vadd.f32 1.4214138, %v666_v61  ;;  %v737_v32 = vmul.f32 %v2003_v23, %v721_v13  ;;  %v692_v19 = vadd.f32 1.4214138, %v676_v8  ;;  %v836_v25 = vmul.f32 1.442695, %v805_v60 }
 0x25e   :  { %v751_v14 = vadd.f32 0.2548296, %v735_v6  ;;  %v658_v29 = vadd.f32 -1.4531521, %v642_v4  ;;  %v2078_v35 = vpop.eup %1337  ;;  %v803_v16 = vmul.f32 %v787_v3, %v563_v40  ;;  %v683_v27 = vadd.f32 1.4214138, %v667_v42 }
 0x25f   :  { %v698_v11 = vmul.f32 %v1959_v5, %v682_v37  ;;  %v708_v51 = vmul.f32 %v2057_v26, %v692_v19  ;;  %v645_v39 = vmul.f32 1.0614054, %v2078_v35  ;;  %v846_v13 = vmul.f32 %v2039_v46, %v766_v44 }
 0x260   :  { %v767_v7 = vmul.f32 %v2027_v38, %v751_v14  ;;  %v674_v57 = vmul.f32 %v2066_v58, %v658_v29  ;;  %v1340_v31 = vpop.eup %1339  ;;  %1347 = vpow2.f32 %v830_v62  ;;  %v699_v41 = vmul.f32 %v1995_v12, %v683_v27 }
 0x261   :  { %v714_v3 = vadd.f32 -0.28449672, %v698_v11  ;;  %v753_v40 = vadd.f32 0.2548296, %v737_v32  ;;  %v661_v6 = vadd.f32 -1.4531521, %v645_v39  ;;  %1349 = vpow2.f32 %v836_v25 }
 0x262   :  { %v847_v61 = vmul.f32 %v1340_v31, %v767_v7  ;;  %v690_v60 = vadd.f32 1.4214138, %v674_v57  ;;  %v1342_v38 = vpop.eup %1341  ;;  %vm523_vm12 = vcmp.ge.f32.partialorder %v1873_v48, 0.0  ;;  %v752_v8 = vadd.f32 0.2548296, %v736_v55 }
 0x263   :  { %v715_v4 = vadd.f32 -0.28449672, %v699_v41  ;;  %v730_v42 = vmul.f32 %v1959_v5, %v714_v3  ;;  %v724_v14 = vadd.f32 -0.28449672, %v708_v51  ;;  %v677_v44 = vmul.f32 %v2078_v35, %v661_v6 }
 0x264   :  { %v2090_v37 = vpop.eup %1343  ;;  %v706_v46 = vmul.f32 %v2066_v58, %v690_v60  ;;  %v832_v62 = vmul.f32 1.442695, %v803_v16  ;;  %v863_v32 = vsub.f32 1.0, %v847_v61  ;;  %v862_v27 = vsub.f32 1.0, %v846_v13 }
 0x265   :  { %v643_v7 = vmul.f32 1.0614054, %v2090_v37  ;;  %v731_v19 = vmul.f32 %v1995_v12, %v715_v4  ;;  %v746_v29 = vadd.f32 0.2548296, %v730_v42  ;;  %v769_v55 = vmul.f32 %v2003_v23, %v753_v40 }
 0x266   :  { %v722_v25 = vadd.f32 -0.28449672, %v706_v46  ;;  %v693_v11 = vadd.f32 1.4214138, %v677_v44  ;;  %v768_v57 = vmul.f32 %v1942_v52, %v752_v8  ;;  %v740_v41 = vmul.f32 %v2057_v26, %v724_v14 }
 0x267   :  { %v659_v39 = vadd.f32 -1.4531521, %v643_v7  ;;  %v747_v51 = vadd.f32 0.2548296, %v731_v19  ;;  %v762_v31 = vmul.f32 %v1959_v5, %v746_v29  ;;  %1351 = vpow2.f32 %v832_v62 }
 0x268   :  { %v738_v16 = vmul.f32 %v2066_v58, %v722_v25  ;;  %v709_v3 = vmul.f32 %v2078_v35, %v693_v11  ;;  %v879_v61 = vmul.f32 %v863_v32, %v2054_v53  ;;  %v878_v60 = vmul.f32 %v862_v27, %v1967_v20 }
 0x269   :  { %v675_v13 = vmul.f32 %v2090_v37, %v659_v39  ;;  %v763_v23 = vmul.f32 %v1995_v12, %v747_v51  ;;  %v842_v40 = vmul.f32 %v1977_v0, %v762_v31  ;;  %v1346_v52 = vpop.eup %1345  ;;  %v849_v6 = vmul.f32 %v1342_v38, %v769_v55 }
 0x26a   :  { %v754_v5 = vadd.f32 0.2548296, %v738_v16  ;;  %v725_v8 = vadd.f32 -0.28449672, %v709_v3  ;;  %v848_v4 = vmul.f32 %v2035_v49, %v768_v57  ;;  %v756_v44 = vadd.f32 0.2548296, %v740_v41 }
 0x26b   :  { %v691_v42 = vadd.f32 1.4214138, %v675_v13  ;;  %v843_v14 = vmul.f32 %v2007_v22, %v763_v23  ;;  %v858_v46 = vsub.f32 1.0, %v842_v40  ;;  %v538_v0 = vsel %vm522_vm11, 1.0, %v2272_v47 }
 0x26c   :  { %v770_v53 = vmul.f32 %v2066_v58, %v754_v5  ;;  %v741_v62 = vmul.f32 %v2078_v35, %v725_v8  ;;  %v895_v12 = vadd.f32 1.0, %v879_v61  ;;  %v894_v49 = vadd.f32 1.0, %v878_v60 }
 0x26d   :  { %v707_v20 = vmul.f32 %v2090_v37, %v691_v42  ;;  %v859_v38 = vsub.f32 1.0, %v843_v14  ;;  %v874_v32 = vmul.f32 %v858_v46, %v538_v0  ;;  %v1348_v7 = vpop.eup %1347  ;;  %v865_v19 = vsub.f32 1.0, %v849_v6 }
 0x26e   :  { %v757_v29 = vadd.f32 0.2548296, %v741_v62  ;;  %v539_v22 = vsel %vm523_vm12, 1.0, %v2272_v47  ;;  %v850_v58 = vmul.f32 %v1348_v7, %v770_v53  ;;  %v1350_v11 = vpop.eup %1349  ;;  %v892_v17 = vadd.f32 1.0, %v2043_v56 }
 0x26f   :  { %v723_v27 = vadd.f32 -0.28449672, %v707_v20  ;;  %v875_v55 = vmul.f32 %v859_v38, %v539_v22  ;;  %v890_v25 = vadd.f32 1.0, %v874_v32  ;;  %v864_v57 = vsub.f32 1.0, %v848_v4 }
 0x270   :  { %v772_v39 = vmul.f32 %v2057_v26, %v756_v44  ;;  %v773_v51 = vmul.f32 %v2078_v35, %v757_v29  ;;  %v909_v31 = vmul.f32 %v2068_v30, %v1894_v2  ;;  %v911_v41 = vmul.f32 %v895_v12, %v2022_v50 }
 0x271   :  { %v739_v48 = vmul.f32 %v2090_v37, %v723_v27  ;;  %v891_v16 = vadd.f32 1.0, %v875_v55  ;;  %v910_v3 = vmul.f32 %v894_v49, %v1949_v9  ;;  %v881_v61 = vmul.f32 %v865_v19, %v2001_v45 }
 0x272   :  { %vm530_vm13 = vcmp.ge.f32.partialorder %v1983_v21, 0.0  ;;  %v853_v56 = vmul.f32 %v1350_v11, %v773_v51  ;;  %v866_v13 = vsub.f32 1.0, %v850_v58  ;;  %v906_v26 = vmul.f32 %v890_v25, %v1864_v54  ;;  %v2273_v25 = vld [vmem:[#allocation3_spill] sm:$0xff] }
 0x273   :  { %v755_v23 = vadd.f32 0.2548296, %v739_v48  ;;  %v907_v35 = vmul.f32 %v891_v16, %v1907_v59  ;;  %v908_v2 = vmul.f32 %v892_v17, %v1860_v63  ;;  %v880_v50 = vmul.f32 %v864_v57, %v1939_v10  ;;  %v2276_v16 = vld [vmem:[#allocation4_spill] sm:$0xff] }
 0x274   :  { %v852_v30 = vmul.f32 %v1346_v52, %v772_v39  ;;  %v1352_v40 = vpop.eup %1351  ;;  %v546_v60 = vsel %vm530_vm13, 1.0, %v2272_v47  ;;  %v922_v6 = vpack.c.bf16 %v911_v41, %v910_v3  ;;  %v897_v21 = vadd.f32 1.0, %v881_v61 }
 0x275   :  { %v771_v9 = vmul.f32 %v2090_v37, %v755_v23  ;;  %v920_v45 = vpack.c.bf16 %v907_v35, %v906_v26  ;;  %vm533_vm14 = vcmp.ge.f32.partialorder %v1993_v15, 0.0  ;;  %v869_v5 = vsub.f32 1.0, %v853_v56  ;;  %v2277_v23 = vld [vmem:[#allocation8_spill] sm:$0xff] }
 0x276   :  { %v921_v8 = vpack.c.bf16 %v909_v31, %v908_v2  ;;  %v882_v54 = vmul.f32 %v866_v13, %v546_v60  ;;  %vm531_vm15 = vcmp.ge.f32.partialorder %v2031_v33, 0.0  ;;  %v896_v63 = vadd.f32 1.0, %v880_v50  ;;  %v2275_v31 = vld [vmem:[#allocation5_spill] sm:$0xff]  ;;  %v2278_v50 = vld [vmem:[#allocation6_spill] sm:$0xff] }
 0x277   :  { %v851_v59 = vmul.f32 %v1352_v40, %v771_v9  ;;  %1218 = vmatprep.mubr.bf16.mxu1 %v920_v45  ;;  %v497_v10 = vmul.f32 0.5, %v1890_v43  ;;  %vm532_vm1 = vcmp.ge.f32.partialorder %v1954_v34, 0.0  ;;  %v868_v52 = vsub.f32 1.0, %v852_v30  ;;  %v2279_v9 = vld [vmem:[#allocation9_spill] sm:$0xff] }
 0x278   :  { %1219 = vmatmul.mubr.bf16.vlgmr.msra.gmra.mxu1 %v921_v8  ;;  %v549_v37 = vsel %vm533_vm14, 1.0, %v2272_v47  ;;  %v496_v15 = vmul.f32 0.5, %v1814_v28  ;;  %v547_v46 = vsel %vm531_vm15, 1.0, %v2272_v47  ;;  %v548_v33 = vsel %vm532_vm1, 1.0, %v2272_v47 }
 0x279   :  { %v867_v4 = vsub.f32 1.0, %v851_v59  ;;  %1222 = vmatprep.mubr.bf16.mxu1 %v922_v6  ;;  %v913_v42 = vmul.f32 %v897_v21, %v497_v10  ;;  %v885_v14 = vmul.f32 %v869_v5, %v549_v37  ;;  %v898_v44 = vadd.f32 1.0, %v882_v54  ;;  %v2280_v5 = vld [vmem:[#allocation7_spill] sm:$0xff] }
 0x27a   :  { %v912_v62 = vmul.f32 %v896_v63, %v496_v15  ;;  %v884_v43 = vmul.f32 %v868_v52, %v548_v33  ;;  %v498_v34 = vmul.f32 0.5, %v1957_v1  ;;  %v499_v0 = vmul.f32 0.5, %v2013_v18  ;;  %v1143_v1 = vld [vmem:[%s2236_s7] ss:$0 sm:$0xff]  ;;  %v2281_v63 = vld [vmem:[#allocation12_spill] sm:$0xff] }
 0x27b   :  { %v883_v53 = vmul.f32 %v867_v4, %v547_v46  ;;  %v901_v20 = vadd.f32 1.0, %v885_v14  ;;  %v501_v49 = vmul.f32 0.5, %v1973_v24  ;;  %v500_v47 = vmul.f32 0.5, %v1946_v36  ;;  %v2274_v36 = vld [vmem:[#allocation2_spill] sm:$0xff]  ;;  %v2283_v46 = vld [vmem:[#allocation13_spill] sm:$0xff] }
 0x27c   :  { %v923_v38 = vpack.c.bf16 %v913_v42, %v912_v62  ;;  %v914_v32 = vmul.f32 %v898_v44, %v498_v34  ;;  %v900_v28 = vadd.f32 1.0, %v884_v43  ;;  %v2282_v4 = vld [vmem:[#allocation10_spill] sm:$0xff]  ;;  %v2284_v62 = vld [vmem:[#allocation11_spill] sm:$0xff] }
 0x27d   :  { %v899_v12 = vadd.f32 1.0, %v883_v53  ;;  %v917_v29 = vmul.f32 %v901_v20, %v501_v49 }
 0x27e   :  { %v916_v22 = vmul.f32 %v900_v28, %v500_v47  ;;  %v2287_v47 = vld [vmem:[#allocation17_spill] sm:$0xff] }
 0x27f   :  { %v915_v7 = vmul.f32 %v899_v12, %v499_v0  ;;  %v2285_v12 = vld [vmem:[#allocation16_spill] sm:$0xff] }
 0x280   :  { %1223 = vmatmul.mubr.bf16.gmra.mxu1 %v923_v38  ;;  %v925_v58 = vpack.c.bf16 %v917_v29, %v916_v22 }
 0x281   :  { %v924_v19 = vpack.c.bf16 %v915_v7, %v914_v32  ;;  %v2286_v7 = vld [vmem:[#allocation14_spill] sm:$0xff] }
 0x283   :  { %1226 = vmatprep.mubr.bf16.mxu1 %v924_v19 }
 0x288   :  { %1227 = vmatmul.mubr.bf16.gmra.mxu1 %v925_v58  ;;  %v2288_v58 = vld [vmem:[#allocation15_spill] sm:$0xff] }
 0x316   :  { %v1216_v18 = vpop.f32.mrf.mxu0 }
 0x317   :  { %v1040_v27 = vadd.f32 %v1216_v18, %v1143_v1 }
 0x318   :  { %v1031_v55 = vpop.f32.mrf.mxu0 }
 0x319   :  { %v1096_v11 = vadd.f32 %v1040_v27, %v2273_v25  ;;  %v1032_v17 = vadd.f32 %v1143_v1, %v1031_v55 }
 0x31a   :  { %v1217_v24 = vpop.f32.mrf.mxu0 }
 0x31b   :  { %1112 = vst.msk [vmem:[%s2237_s8 + $0x10] sm:$0xff] %vm80_vm0, %v1096_v11  ;;  %v1094_v57 = vadd.f32 %v1032_v17, %v2274_v36  ;;  %v1043_v39 = vadd.f32 %v1217_v24, %v1143_v1 }
 0x31c   :  { %v1034_v51 = vpop.f32.mrf.mxu0 }
 0x31d   :  { %1110 = vst.msk [vmem:[%s2237_s8] sm:$0xff] %vm80_vm0, %v1094_v57  ;;  %v1097_v41 = vadd.f32 %v1043_v39, %v2275_v31  ;;  %v1035_v48 = vadd.f32 %v1143_v1, %v1034_v51 }
 0x31f   :  { %1113 = vst.msk [vmem:[%s2237_s8 + $0x18] sm:$0xff] %vm80_vm0, %v1097_v41  ;;  %v1095_v3 = vadd.f32 %v1035_v48, %v2276_v16 }
 0x321   :  { %1111 = vst.msk [vmem:[%s2237_s8 + $0x8] sm:$0xff] %vm80_vm0, %v1095_v3 }
 0x338   :  { %v1220_v61 = vpop.f32.mrf.mxu1 }
 0x339   :  { %v1056_v56 = vadd.f32 %v1220_v61, %v1143_v1 }
 0x33a   :  { %v1047_v13 = vpop.f32.mrf.mxu1 }
 0x33b   :  { %v1100_v26 = vadd.f32 %v1056_v56, %v2277_v23  ;;  %v1048_v35 = vadd.f32 %v1143_v1, %v1047_v13 }
 0x33c   :  { %v1221_v2 = vpop.f32.mrf.mxu1 }
 0x33d   :  { %1116 = vst.msk [vmem:[%s2237_s8 + $0x30] sm:$0xff] %vm80_vm0, %v1100_v26  ;;  %v1098_v30 = vadd.f32 %v1048_v35, %v2278_v50  ;;  %v1059_v40 = vadd.f32 %v1221_v2, %v1143_v1 }
 0x33e   :  { %v1050_v60 = vpop.f32.mrf.mxu1 }
 0x33f   :  { %1114 = vst.msk [vmem:[%s2237_s8 + $0x20] sm:$0xff] %vm80_vm0, %v1098_v30  ;;  %v1101_v45 = vadd.f32 %v1059_v40, %v2279_v9  ;;  %v1051_v6 = vadd.f32 %v1143_v1, %v1050_v60 }
 0x340   :  { %v1224_v21 = vpop.f32.mrf.mxu1 }
 0x341   :  { %1117 = vst.msk [vmem:[%s2237_s8 + $0x38] sm:$0xff] %vm80_vm0, %v1101_v45  ;;  %v1099_v8 = vadd.f32 %v1051_v6, %v2280_v5  ;;  %v1072_v54 = vadd.f32 %v1224_v21, %v1143_v1 }
 0x342   :  { %v1063_v59 = vpop.f32.mrf.mxu1 }
 0x343   :  { %1115 = vst.msk [vmem:[%s2237_s8 + $0x28] sm:$0xff] %vm80_vm0, %v1099_v8  ;;  %v1104_v10 = vadd.f32 %v1072_v54, %v2281_v63  ;;  %v1064_v52 = vadd.f32 %v1143_v1, %v1063_v59 }
 0x344   :  { %v1225_v37 = vpop.f32.mrf.mxu1 }
 0x345   :  { %1120 = vst.msk [vmem:[%s2237_s8 + $0x50] sm:$0xff] %vm80_vm0, %v1104_v10  ;;  %v1102_v15 = vadd.f32 %v1064_v52, %v2282_v4  ;;  %v1075_v42 = vadd.f32 %v1225_v37, %v1143_v1 }
 0x346   :  { %v1066_v14 = vpop.f32.mrf.mxu1 }
 0x347   :  { %1118 = vst.msk [vmem:[%s2237_s8 + $0x40] sm:$0xff] %vm80_vm0, %v1102_v15  ;;  %v1105_v33 = vadd.f32 %v1075_v42, %v2283_v46  ;;  %v1067_v44 = vadd.f32 %v1143_v1, %v1066_v14 }
 0x348   :  { %v1228_v53 = vpop.f32.mrf.mxu1 }
 0x349   :  { %1121 = vst.msk [vmem:[%s2237_s8 + $0x58] sm:$0xff] %vm80_vm0, %v1105_v33  ;;  %v1103_v43 = vadd.f32 %v1067_v44, %v2284_v62  ;;  %v1088_v34 = vadd.f32 %v1228_v53, %v1143_v1 }
 0x34a   :  { %v1079_v0 = vpop.f32.mrf.mxu1 }
 0x34b   :  { %1119 = vst.msk [vmem:[%s2237_s8 + $0x48] sm:$0xff] %vm80_vm0, %v1103_v43  ;;  %v1108_v20 = vadd.f32 %v1088_v34, %v2285_v12  ;;  %v1080_v38 = vadd.f32 %v1143_v1, %v1079_v0 }
 0x34c   :  { %v1229_v32 = vpop.f32.mrf.mxu1 }
 0x34d   :  { %1124 = vst.msk [vmem:[%s2237_s8 + $0x70] sm:$0xff] %vm80_vm0, %v1108_v20  ;;  %v1106_v28 = vadd.f32 %v1080_v38, %v2286_v7  ;;  %v1091_v49 = vadd.f32 %v1229_v32, %v1143_v1 }
 0x34e   :  { %v1082_v19 = vpop.f32.mrf.mxu1 }
 0x34f   :  { %1122 = vst.msk [vmem:[%s2237_s8 + $0x60] sm:$0xff] %vm80_vm0, %v1106_v28  ;;  %v1109_v29 = vadd.f32 %v1091_v49, %v2287_v47  ;;  %v1083_v22 = vadd.f32 %v1143_v1, %v1082_v19 }
 0x351   :  { %1125 = vst.msk [vmem:[%s2237_s8 + $0x78] sm:$0xff] %vm80_vm0, %v1109_v29  ;;  %v1107_v18 = vadd.f32 %v1083_v22, %v2288_v58 }
 0x353   :  { %1123 = vst.msk [vmem:[%s2237_s8 + $0x68] sm:$0xff] %vm80_vm0, %v1107_v18 }

// kernel: swin_block_forward.2
= control target key start
LH: loop header
LB: loop body
LE: loop exit
PB: predicated region body
PF: predicated region fallthrough
CT: control target
= control target key end

     0   :  { %vm51_vm0 = vcmask 261120   ;;  %vm5980_vm1 = vmmov 0   ;;  %s5982_s26 = smov 64   ;;  %vm476_vm2 = vcmask 64512   ;;  %vm924_vm3 = vcmask 130048   ;;  %s5983_s24 = smov 88   ;;  %s8017_s0 = inlined_call_operand.vmem [shape: f32[8,16,32], index: 0, kind: input, shape index: {}]   ;;  %s8018_s4 = inlined_call_operand.vmem [shape: bf16[32,96], index: 4, kind: input, shape index: {}]   ;;  %s8019_s2 = inlined_call_operand.vmem [shape: f32[1,32], index: 2, kind: input, shape index: {}]   ;;  %s8020_s3 = inlined_call_operand.vmem [shape: f32[1,32], index: 3, kind: input, shape index: {}]   ;;  %s8021_s5 = inlined_call_operand.vmem [shape: f32[1,96], index: 5, kind: input, shape index: {}]   ;;  %s8022_s6 = inlined_call_operand.vmem [shape: f32[4,16,16], index: 6, kind: input, shape index: {}]   ;;  %s8023_s1 = inlined_call_operand.vmem [shape: f32[4,16,16], index: 1, kind: input, shape index: {}]   ;;  %s8024_s7 = inlined_call_operand.vmem [shape: bf16[32,32], index: 7, kind: input, shape index: {}]   ;;  %s8025_s8 = inlined_call_operand.vmem [shape: f32[1,32], index: 8, kind: input, shape index: {}]   ;;  %s8026_s9 = inlined_call_operand.vmem [shape: f32[8,16,32], index: 9, kind: output, shape index: {}]  }
   0x1   :  { %v33_v0 = vld [vmem:[%s8017_s0] sm:$0xff]  ;;  %v35_v1 = vld [vmem:[%s8017_s0 + $0x10] sm:$0xff]  ;;  %v34_v2 = vld [vmem:[%s8017_s0 + $0x8] sm:$0xff]  ;;  %s5984_s25 = smov 120   ;;  %s5985_s12 = smov 56   ;;  %vm2584_vm4 = vcmask 130112  }
   0x2   :  { %v52_v3 = vsel %vm51_vm0, %v33_v0, 0.0  ;;  %v58_v4 = vsel %vm51_vm0, %v35_v1, 0.0  ;;  %v36_v5 = vld [vmem:[%s8017_s0 + $0x18] sm:$0xff]  ;;  %v55_v6 = vsel %vm51_vm0, %v34_v2, 0.0  ;;  %v37_v8 = vld [vmem:[%s8017_s0 + $0x20] sm:$0xff]  ;;  %v38_v9 = vld [vmem:[%s8017_s0 + $0x28] sm:$0xff] }
   0x3   :  { %53 = vadd.xlane.f32.xlu0 %v52_v3  ;;  %59 = vadd.xlane.f32.xlu1 %v58_v4  ;;  %v61_v7 = vsel %vm51_vm0, %v36_v5, 0.0  ;;  %v64_v10 = vsel %vm51_vm0, %v37_v8, 0.0  ;;  %v67_v11 = vsel %vm51_vm0, %v38_v9, 0.0  ;;  %v6072_v12 = vld [vmem:[%s8017_s0 + $0x30] sm:$0xff]  ;;  %v6077_v13 = vld [vmem:[%s8017_s0 + $0x38] sm:$0xff]  ;;  %v6086_v16 = vld [vmem:[%s8017_s0 + $0x40] sm:$0xff] }
   0x4   :  { %v70_v14 = vsel %vm51_vm0, %v6072_v12, 0.0  ;;  %v73_v15 = vsel %vm51_vm0, %v6077_v13, 0.0  ;;  %v6091_v17 = vld [vmem:[%s8017_s0 + $0x48] sm:$0xff]  ;;  %v76_v18 = vsel %vm51_vm0, %v6086_v16, 0.0  ;;  %v6100_v20 = vld [vmem:[%s8017_s0 + $0x50] sm:$0xff]  ;;  %v6105_v21 = vld [vmem:[%s8017_s0 + $0x58] sm:$0xff] }
   0x5   :  { %v79_v19 = vsel %vm51_vm0, %v6091_v17, 0.0  ;;  %v82_v22 = vsel %vm51_vm0, %v6100_v20, 0.0  ;;  %v85_v23 = vsel %vm51_vm0, %v6105_v21, 0.0  ;;  %v6114_v24 = vld [vmem:[%s8017_s0 + $0x60] sm:$0xff]  ;;  %v6119_v25 = vld [vmem:[%s8017_s0 + $0x68] sm:$0xff]  ;;  %v6128_v28 = vld [vmem:[%s8017_s0 + $0x70] sm:$0xff] }
   0x6   :  { %v88_v26 = vsel %vm51_vm0, %v6114_v24, 0.0  ;;  %v91_v27 = vsel %vm51_vm0, %v6119_v25, 0.0  ;;  %v6133_v29 = vld [vmem:[%s8017_s0 + $0x78] sm:$0xff]  ;;  %v94_v30 = vsel %vm51_vm0, %v6128_v28, 0.0  ;;  %s5986_s13 = smov 80   ;;  %s5987_s14 = smov 112  }
   0x7   :  { %56 = vadd.xlane.f32.xlu0 %v55_v6  ;;  %62 = vadd.xlane.f32.xlu1 %v61_v7  ;;  %v97_v31 = vsel %vm51_vm0, %v6133_v29, 0.0  ;;  %s5992_s17 = smov 8   ;;  %s5993_s18 = smov 16   ;;  %vm3684_vm5 = vcmask 195712   ;;  %vm4784_vm6 = vcmask 261312  }
   0x8   :  { %s5994_s19 = smov 24  }
   0xb   :  { %65 = vadd.xlane.f32.xlu0 %v64_v10  ;;  %68 = vadd.xlane.f32.xlu1 %v67_v11 }
   0xf   :  { %71 = vadd.xlane.f32.xlu0 %v70_v14  ;;  %74 = vadd.xlane.f32.xlu1 %v73_v15 }
  0x13   :  { %77 = vadd.xlane.f32.xlu0 %v76_v18  ;;  %80 = vadd.xlane.f32.xlu1 %v79_v19 }
  0x17   :  { %83 = vadd.xlane.f32.xlu0 %v82_v22  ;;  %86 = vadd.xlane.f32.xlu1 %v85_v23 }
  0x1b   :  { %89 = vadd.xlane.f32.xlu0 %v88_v26  ;;  %92 = vadd.xlane.f32.xlu1 %v91_v27 }
  0x1f   :  { %95 = vadd.xlane.f32.xlu0 %v94_v30  ;;  %98 = vadd.xlane.f32.xlu1 %v97_v31 }
  0x8c   :  { %v54_v32 = vpop.xlane.xlu0 %53  ;;  %v60_v33 = vpop.xlane.xlu1 %59 }
  0x8d   :  { %v101_v34 = vmul.f32 0.03125, %v54_v32  ;;  %v103_v35 = vmul.f32 0.03125, %v60_v33 }
  0x8f   :  { %v6139_v36 = vsub.f32 %v33_v0, %v101_v34  ;;  %v6141_v37 = vsub.f32 %v35_v1, %v103_v35 }
  0x90   :  { %v57_v38 = vpop.xlane.xlu0 %56  ;;  %v63_v39 = vpop.xlane.xlu1 %62 }
  0x91   :  { %v102_v40 = vmul.f32 0.03125, %v57_v38  ;;  %v104_v41 = vmul.f32 0.03125, %v63_v39  ;;  %v133_v42 = vmul.f32 %v6139_v36, %v6139_v36  ;;  %v135_v43 = vmul.f32 %v6141_v37, %v6141_v37 }
  0x93   :  { %v6147_v44 = vsub.f32 %v34_v2, %v102_v40  ;;  %v6149_v45 = vsub.f32 %v36_v5, %v104_v41  ;;  %v149_v46 = vsel %vm51_vm0, %v133_v42, 0.0  ;;  %v155_v49 = vsel %vm51_vm0, %v135_v43, 0.0 }
  0x94   :  { %150 = vadd.xlane.f32.xlu0 %v149_v46  ;;  %v66_v47 = vpop.xlane.xlu0 %65  ;;  %v69_v48 = vpop.xlane.xlu1 %68 }
  0x95   :  { %v105_v50 = vmul.f32 0.03125, %v66_v47  ;;  %v106_v51 = vmul.f32 0.03125, %v69_v48  ;;  %v134_v52 = vmul.f32 %v6147_v44, %v6147_v44  ;;  %v136_v53 = vmul.f32 %v6149_v45, %v6149_v45 }
  0x97   :  { %v6157_v54 = vsub.f32 %v37_v8, %v105_v50  ;;  %v6159_v55 = vsub.f32 %v38_v9, %v106_v51  ;;  %v152_v56 = vsel %vm51_vm0, %v134_v52, 0.0  ;;  %v158_v59 = vsel %vm51_vm0, %v136_v53, 0.0  ;;  %v5676_v53 = vld [vmem:[%s8018_s4] sm:$0xff]  }
  0x98   :  { %156 = vadd.xlane.f32.xlu0 %v155_v49  ;;  %153 = vadd.xlane.f32.xlu1 %v152_v56  ;;  %v72_v57 = vpop.xlane.xlu0 %71  ;;  %v75_v58 = vpop.xlane.xlu1 %74 }
  0x99   :  { %v107_v60 = vmul.f32 0.03125, %v72_v57  ;;  %v108_v61 = vmul.f32 0.03125, %v75_v58  ;;  %v137_v62 = vmul.f32 %v6157_v54, %v6157_v54  ;;  %v138_v63 = vmul.f32 %v6159_v55, %v6159_v55 }
  0x9b   :  { %v6168_v0 = vsub.f32 %v6072_v12, %v107_v60  ;;  %v6171_v1 = vsub.f32 %v6077_v13, %v108_v61  ;;  %v161_v2 = vsel %vm51_vm0, %v137_v62, 0.0  ;;  %v164_v5 = vsel %vm51_vm0, %v138_v63, 0.0 }
  0x9c   :  { %159 = vadd.xlane.f32.xlu1 %v158_v59  ;;  %162 = vadd.xlane.f32.xlu0 %v161_v2  ;;  %v78_v3 = vpop.xlane.xlu0 %77  ;;  %v81_v4 = vpop.xlane.xlu1 %80 }
  0x9d   :  { %v109_v6 = vmul.f32 0.03125, %v78_v3  ;;  %v110_v7 = vmul.f32 0.03125, %v81_v4  ;;  %v139_v8 = vmul.f32 %v6168_v0, %v6168_v0  ;;  %v140_v9 = vmul.f32 %v6171_v1, %v6171_v1 }
  0x9f   :  { %v6180_v10 = vsub.f32 %v6086_v16, %v109_v6  ;;  %v6183_v11 = vsub.f32 %v6091_v17, %v110_v7  ;;  %v167_v12 = vsel %vm51_vm0, %v139_v8, 0.0  ;;  %v170_v15 = vsel %vm51_vm0, %v140_v9, 0.0 }
  0xa0   :  { %165 = vadd.xlane.f32.xlu1 %v164_v5  ;;  %168 = vadd.xlane.f32.xlu0 %v167_v12  ;;  %v84_v13 = vpop.xlane.xlu0 %83  ;;  %v87_v14 = vpop.xlane.xlu1 %86 }
  0xa1   :  { %v111_v18 = vmul.f32 0.03125, %v84_v13  ;;  %v112_v19 = vmul.f32 0.03125, %v87_v14  ;;  %v141_v22 = vmul.f32 %v6180_v10, %v6180_v10  ;;  %v142_v16 = vmul.f32 %v6183_v11, %v6183_v11 }
  0xa3   :  { %v6192_v23 = vsub.f32 %v6100_v20, %v111_v18  ;;  %v6195_v17 = vsub.f32 %v6105_v21, %v112_v19  ;;  %v173_v26 = vsel %vm51_vm0, %v141_v22, 0.0  ;;  %v176_v31 = vsel %vm51_vm0, %v142_v16, 0.0 }
  0xa4   :  { %171 = vadd.xlane.f32.xlu1 %v170_v15  ;;  %174 = vadd.xlane.f32.xlu0 %v173_v26  ;;  %v90_v27 = vpop.xlane.xlu0 %89  ;;  %v93_v30 = vpop.xlane.xlu1 %92 }
  0xa5   :  { %v113_v32 = vmul.f32 0.03125, %v90_v27  ;;  %v114_v33 = vmul.f32 0.03125, %v93_v30  ;;  %v143_v34 = vmul.f32 %v6192_v23, %v6192_v23  ;;  %v144_v20 = vmul.f32 %v6195_v17, %v6195_v17 }
  0xa7   :  { %v6204_v35 = vsub.f32 %v6114_v24, %v113_v32  ;;  %v6207_v21 = vsub.f32 %v6119_v25, %v114_v33  ;;  %v179_v38 = vsel %vm51_vm0, %v143_v34, 0.0  ;;  %v182_v41 = vsel %vm51_vm0, %v144_v20, 0.0  ;;  %v6238_v32 = vld [vmem:[%s8019_s2] ss:$0 sm:$0xff] }
  0xa8   :  { %177 = vadd.xlane.f32.xlu1 %v176_v31  ;;  %180 = vadd.xlane.f32.xlu0 %v179_v38  ;;  %v96_v39 = vpop.xlane.xlu0 %95  ;;  %v99_v40 = vpop.xlane.xlu1 %98 }
  0xa9   :  { %v115_v42 = vmul.f32 0.03125, %v96_v39  ;;  %v116_v43 = vmul.f32 0.03125, %v99_v40  ;;  %v145_v46 = vmul.f32 %v6204_v35, %v6204_v35  ;;  %v146_v24 = vmul.f32 %v6207_v21, %v6207_v21 }
  0xab   :  { %v6216_v47 = vsub.f32 %v6128_v28, %v115_v42  ;;  %v6219_v25 = vsub.f32 %v6133_v29, %v116_v43  ;;  %v185_v48 = vsel %vm51_vm0, %v145_v46, 0.0  ;;  %v188_v49 = vsel %vm51_vm0, %v146_v24, 0.0  ;;  %v5675_v29 = vld [vmem:[%s8018_s4 + $0x8] sm:$0xff]   ;;  %v6245_v24 = vld [vmem:[%s8020_s3] ss:$0 sm:$0xff]  ;;  %s5988_s3 = smov 48  }
  0xac   :  { %183 = vadd.xlane.f32.xlu1 %v182_v41  ;;  %186 = vadd.xlane.f32.xlu0 %v185_v48 }
  0xad   :  { %v147_v50 = vmul.f32 %v6216_v47, %v6216_v47  ;;  %v148_v51 = vmul.f32 %v6219_v25, %v6219_v25  ;;  %5231 = vmatprep.subr.bf16.mxu0 %v5675_v29  ;;  %5655 = vmatprep.subr.bf16.mxu1 %v5675_v29 }
  0xae   :  { %5232 = vmatpush3.bf16.msra.mxu0 %v5675_v29  ;;  %5657 = vmatpush3.bf16.msra.mxu1 %v5675_v29 }
  0xaf   :  { %v191_v52 = vsel %vm51_vm0, %v147_v50, 0.0  ;;  %v194_v28 = vsel %vm51_vm0, %v148_v51, 0.0  ;;  %5233 = vmatprep.subr.bf16.mxu0 %v5676_v53  ;;  %5656 = vmatprep.subr.bf16.mxu1 %v5676_v53 }
  0xb0   :  { %189 = vadd.xlane.f32.xlu1 %v188_v49  ;;  %192 = vadd.xlane.f32.xlu0 %v191_v52 }
  0xb2   :  { %5234 = vmatpush3.bf16.msra.mxu0 %v5676_v53  ;;  %5658 = vmatpush3.bf16.msra.mxu1 %v5676_v53 }
  0xb4   :  { %195 = vadd.xlane.f32.xlu1 %v194_v28 }
 0x11d   :  { %v151_v56 = vpop.xlane.xlu0 %150 }
 0x11e   :  { %v197_v57 = vmul.f32 0.03125, %v151_v56 }
 0x120   :  { %v213_v58 = vadd.f32 1e-05, %v197_v57 }
 0x121   :  { %v154_v59 = vpop.xlane.xlu1 %153  ;;  %v157_v60 = vpop.xlane.xlu0 %156 }
 0x122   :  { %5679 = vrsqrt.f32 %v213_v58  ;;  %v198_v61 = vmul.f32 0.03125, %v154_v59  ;;  %v199_v62 = vmul.f32 0.03125, %v157_v60 }
 0x124   :  { %v214_v63 = vadd.f32 1e-05, %v198_v61  ;;  %v215_v2 = vadd.f32 1e-05, %v199_v62 }
 0x125   :  { %v160_v3 = vpop.xlane.xlu1 %159  ;;  %v163_v4 = vpop.xlane.xlu0 %162 }
 0x126   :  { %5681 = vrsqrt.f32 %v214_v63  ;;  %v200_v5 = vmul.f32 0.03125, %v160_v3  ;;  %v201_v6 = vmul.f32 0.03125, %v163_v4 }
 0x127   :  { %5683 = vrsqrt.f32 %v215_v2 }
 0x128   :  { %v216_v7 = vadd.f32 1e-05, %v200_v5  ;;  %v217_v8 = vadd.f32 1e-05, %v201_v6 }
 0x129   :  { %v166_v9 = vpop.xlane.xlu1 %165  ;;  %v169_v12 = vpop.xlane.xlu0 %168 }
 0x12a   :  { %5685 = vrsqrt.f32 %v216_v7  ;;  %v202_v13 = vmul.f32 0.03125, %v166_v9  ;;  %v203_v14 = vmul.f32 0.03125, %v169_v12 }
 0x12b   :  { %5687 = vrsqrt.f32 %v217_v8 }
 0x12c   :  { %v218_v15 = vadd.f32 1e-05, %v202_v13  ;;  %v219_v18 = vadd.f32 1e-05, %v203_v14 }
 0x12d   :  { %v172_v19 = vpop.xlane.xlu1 %171  ;;  %v175_v22 = vpop.xlane.xlu0 %174 }
 0x12e   :  { %5689 = vrsqrt.f32 %v218_v15  ;;  %v204_v16 = vmul.f32 0.03125, %v172_v19  ;;  %v205_v26 = vmul.f32 0.03125, %v175_v22 }
 0x12f   :  { %v5680_v27 = vpop.eup %5679  ;;  %5691 = vrsqrt.f32 %v219_v18 }
 0x130   :  { %v220_v30 = vadd.f32 1e-05, %v204_v16  ;;  %v221_v31 = vadd.f32 1e-05, %v205_v26  ;;  %v245_v33 = vmul.f32 %v5680_v27, %v6139_v36 }
 0x131   :  { %v178_v34 = vpop.xlane.xlu1 %177  ;;  %v181_v20 = vpop.xlane.xlu0 %180 }
 0x132   :  { %5693 = vrsqrt.f32 %v220_v30  ;;  %v206_v38 = vmul.f32 0.03125, %v178_v34  ;;  %v207_v39 = vmul.f32 0.03125, %v181_v20  ;;  %v267_v41 = vmul.f32 %v6238_v32, %v245_v33 }
 0x133   :  { %v5682_v40 = vpop.eup %5681  ;;  %5695 = vrsqrt.f32 %v221_v31 }
 0x134   :  { %v5684_v42 = vpop.eup %5683  ;;  %v222_v43 = vadd.f32 1e-05, %v206_v38  ;;  %v223_v46 = vadd.f32 1e-05, %v207_v39  ;;  %v246_v48 = vmul.f32 %v5682_v40, %v6147_v44  ;;  %v289_v53 = vadd.f32 %v6245_v24, %v267_v41 }
 0x135   :  { %v184_v36 = vpop.xlane.xlu1 %183  ;;  %v187_v49 = vpop.xlane.xlu0 %186  ;;  %v247_v50 = vmul.f32 %v5684_v42, %v6141_v37 }
 0x136   :  { %5697 = vrsqrt.f32 %v222_v43  ;;  %v208_v51 = vmul.f32 0.03125, %v184_v36  ;;  %v209_v52 = vmul.f32 0.03125, %v187_v49  ;;  %v268_v28 = vmul.f32 %v6238_v32, %v246_v48 }
 0x137   :  { %v5686_v29 = vpop.eup %5685  ;;  %5699 = vrsqrt.f32 %v223_v46  ;;  %v269_v37 = vmul.f32 %v6238_v32, %v247_v50 }
 0x138   :  { %v5688_v56 = vpop.eup %5687  ;;  %v224_v57 = vadd.f32 1e-05, %v208_v51  ;;  %v225_v58 = vadd.f32 1e-05, %v209_v52  ;;  %v290_v59 = vadd.f32 %v6245_v24, %v268_v28  ;;  %v248_v44 = vmul.f32 %v5686_v29, %v6149_v45 }
 0x139   :  { %v190_v60 = vpop.xlane.xlu1 %189  ;;  %v193_v61 = vpop.xlane.xlu0 %192  ;;  %v249_v62 = vmul.f32 %v5688_v56, %v6157_v54  ;;  %v291_v54 = vadd.f32 %v6245_v24, %v269_v37 }
 0x13a   :  { %5701 = vrsqrt.f32 %v224_v57  ;;  %v210_v63 = vmul.f32 0.03125, %v190_v60  ;;  %v211_v2 = vmul.f32 0.03125, %v193_v61  ;;  %v305_v3 = vpack.c.bf16 %v290_v59, %v289_v53 }
 0x13b   :  { %v5690_v4 = vpop.eup %5689  ;;  %5703 = vrsqrt.f32 %v225_v58  ;;  %v270_v5 = vmul.f32 %v6238_v32, %v248_v44  ;;  %v271_v6 = vmul.f32 %v6238_v32, %v249_v62 }
 0x13c   :  { %v5692_v7 = vpop.eup %5691  ;;  %v226_v8 = vadd.f32 1e-05, %v210_v63  ;;  %v227_v9 = vadd.f32 1e-05, %v211_v2  ;;  %5235 = vmatprep.mubr.msk.bf16.mxu0 %vm51_vm0, %v305_v3  ;;  %v250_v45 = vmul.f32 %v5690_v4, %v6159_v55  ;;  %v8027_v4 = vmov 0.0  }
 0x13d   :  { %v196_v12 = vpop.xlane.xlu1 %195  ;;  %v292_v13 = vadd.f32 %v6245_v24, %v270_v5  ;;  %v251_v14 = vmul.f32 %v5692_v7, %v6168_v0  ;;  %v293_v16 = vadd.f32 %v6245_v24, %v271_v6  ;;  %5251 = vmatprep.subr.bf16.mxu1 %v8027_v4  ;;  %5275 = vmatprep.subr.bf16.mxu0 %v8027_v4  ;;  %v4991_v5 = vld [vmem:[%s8021_s5] ss:$0 sm:$0xff]  ;;  %s5981_s5 = smov 96  }
 0x13e   :  { %5705 = vrsqrt.f32 %v226_v8  ;;  %v212_v15 = vmul.f32 0.03125, %v196_v12  ;;  %v272_v18 = vmul.f32 %v6238_v32, %v250_v45 }
 0x13f   :  { %v5694_v19 = vpop.eup %5693  ;;  %5707 = vrsqrt.f32 %v227_v9  ;;  %v306_v22 = vpack.c.bf16 %v292_v13, %v291_v54  ;;  %v273_v31 = vmul.f32 %v6238_v32, %v251_v14 }
 0x140   :  { %v5696_v26 = vpop.eup %5695  ;;  %v228_v27 = vadd.f32 1e-05, %v212_v15  ;;  %v294_v55 = vadd.f32 %v6245_v24, %v272_v18  ;;  %v252_v30 = vmul.f32 %v5694_v19, %v6171_v1 }
 0x141   :  { %5236 = vmatmul.mubr.msk.bf16.vlgmr.msra.gmra.mxu0 %vm51_vm0, %v306_v22  ;;  %v253_v0 = vmul.f32 %v5696_v26, %v6180_v10  ;;  %v295_v39 = vadd.f32 %v6245_v24, %v273_v31 }
 0x142   :  { %5709 = vrsqrt.f32 %v228_v27  ;;  %v307_v33 = vpack.c.bf16 %v294_v55, %v293_v16  ;;  %v274_v34 = vmul.f32 %v6238_v32, %v252_v30 }
 0x143   :  { %v5698_v20 = vpop.eup %5697  ;;  %v275_v41 = vmul.f32 %v6238_v32, %v253_v0 }
 0x144   :  { %v5700_v38 = vpop.eup %5699  ;;  %5239 = vmatprep.mubr.msk.bf16.mxu0 %vm51_vm0, %v307_v33  ;;  %v296_v40 = vadd.f32 %v6245_v24, %v274_v34  ;;  %v254_v1 = vmul.f32 %v5698_v20, %v6183_v11 }
 0x145   :  { %v255_v42 = vmul.f32 %v5700_v38, %v6192_v23  ;;  %v297_v36 = vadd.f32 %v6245_v24, %v275_v41 }
 0x146   :  { %v308_v43 = vpack.c.bf16 %v296_v40, %v295_v39  ;;  %v276_v10 = vmul.f32 %v6238_v32, %v254_v1 }
 0x147   :  { %v5702_v46 = vpop.eup %5701  ;;  %v277_v51 = vmul.f32 %v6238_v32, %v255_v42 }
 0x148   :  { %v5704_v48 = vpop.eup %5703  ;;  %v298_v49 = vadd.f32 %v6245_v24, %v276_v10  ;;  %v256_v50 = vmul.f32 %v5702_v46, %v6195_v17 }
 0x149   :  { %5240 = vmatmul.mubr.msk.bf16.gmra.mxu0 %vm51_vm0, %v308_v43  ;;  %v257_v11 = vmul.f32 %v5704_v48, %v6204_v35  ;;  %v299_v53 = vadd.f32 %v6245_v24, %v277_v51 }
 0x14a   :  { %v309_v52 = vpack.c.bf16 %v298_v49, %v297_v36  ;;  %v278_v23 = vmul.f32 %v6238_v32, %v256_v50  ;;  %5277 = vmatprep.mubr.msk.bf16.mxu0 %vm5980_vm1, %v8027_v4 }
 0x14b   :  { %v5706_v28 = vpop.eup %5705  ;;  %v279_v17 = vmul.f32 %v6238_v32, %v257_v11 }
 0x14c   :  { %v5708_v29 = vpop.eup %5707  ;;  %5243 = vmatprep.mubr.msk.bf16.mxu1 %vm51_vm0, %v309_v52  ;;  %v300_v56 = vadd.f32 %v6245_v24, %v278_v23  ;;  %v258_v57 = vmul.f32 %v5706_v28, %v6207_v21 }
 0x14d   :  { %v259_v58 = vmul.f32 %v5708_v29, %v6216_v47  ;;  %v301_v60 = vadd.f32 %v6245_v24, %v279_v17 }
 0x14e   :  { %v310_v59 = vpack.c.bf16 %v300_v56, %v299_v53  ;;  %v280_v35 = vmul.f32 %v6238_v32, %v258_v57 }
 0x14f   :  { %v5710_v44 = vpop.eup %5709  ;;  %v281_v62 = vmul.f32 %v6238_v32, %v259_v58 }
 0x150   :  { %5244 = vmatmul.mubr.msk.bf16.vlgmr.msra.gmra.mxu1 %vm51_vm0, %v310_v59  ;;  %v302_v61 = vadd.f32 %v6245_v24, %v280_v35  ;;  %v260_v37 = vmul.f32 %v5710_v44, %v6219_v25 }
 0x151   :  { %v303_v47 = vadd.f32 %v6245_v24, %v281_v62 }
 0x152   :  { %v311_v63 = vpack.c.bf16 %v302_v61, %v301_v60  ;;  %v282_v21 = vmul.f32 %v6238_v32, %v260_v37 }
 0x154   :  { %5247 = vmatprep.mubr.msk.bf16.mxu1 %vm51_vm0, %v311_v63  ;;  %v304_v2 = vadd.f32 %v6245_v24, %v282_v21 }
 0x156   :  { %v312_v3 = vpack.c.bf16 %v304_v2, %v303_v47  ;;  %v6403_v47 = vld [vmem:[%s8022_s6] sm:$0xff] }
 0x158   :  { %5248 = vmatmul.mubr.msk.bf16.gmra.mxu1 %vm51_vm0, %v312_v3 }
 0x159   :  { %5253 = vmatprep.mubr.msk.bf16.mxu1 %vm5980_vm1, %v8027_v4 }
 0x201   :  { %v5237_v25 = vpop.f32.mrf.mxu0 }
 0x202   :  { %v403_v7 = vadd.f32 %v5237_v25, %v4991_v5  ;;  %v6408_v25 = vld [vmem:[%s8023_s1] sm:$0xff] }
 0x203   :  { %v394_v32 = vpop.f32.mrf.mxu0 }
 0x204   :  { %v395_v9 = vadd.f32 %v4991_v5, %v394_v32 }
 0x205   :  { %v5238_v6 = vpop.f32.mrf.mxu0 }
 0x206   :  { %v406_v8 = vadd.f32 %v5238_v6, %v4991_v5  ;;  %v6414_v6 = vld [vmem:[%s8022_s6 + $0x8] sm:$0xff] }
 0x207   :  { %v397_v24 = vpop.f32.mrf.mxu0 }
 0x208   :  { %v6310_v45 = vpack.c.bf16 %v406_v8, %v403_v7  ;;  %v398_v12 = vadd.f32 %v4991_v5, %v397_v24 }
 0x209   :  { %v5241_v54 = vpop.f32.mrf.mxu0 }
 0x20a   :  { %v6312_v13 = vpack.c.bf16 %v398_v12, %v395_v9  ;;  %525 = vrot.lane.b32.xlu1 %v6310_v45, %s5981_s5  ;;  %v419_v30 = vadd.f32 %v5241_v54, %v4991_v5  ;;  %v6422_v9 = vld [vmem:[%s8023_s1 + $0x8] sm:$0xff] }
 0x20b   :  { %v410_v14 = vpop.f32.mrf.mxu0 }
 0x20c   :  { %474 = vrot.lane.b32.xlu0 %v6312_v13, %s5981_s5  ;;  %v411_v19 = vadd.f32 %v4991_v5, %v410_v14 }
 0x20d   :  { %v5242_v15 = vpop.f32.mrf.mxu0 }
 0x20e   :  { %v422_v26 = vadd.f32 %v5242_v15, %v4991_v5 }
 0x20f   :  { %v413_v18 = vpop.f32.mrf.mxu0 }
 0x210   :  { %v414_v22 = vadd.f32 %v4991_v5, %v413_v18  ;;  %v5245_v16 = vpop.f32.mrf.mxu1  ;;  %v6322_v0 = vpack.c.bf16 %v422_v26, %v419_v30 }
 0x211   :  { %v435_v39 = vadd.f32 %v5245_v16, %v4991_v5 }
 0x212   :  { %v6318_v27 = vpack.c.bf16 %v414_v22, %v411_v19  ;;  %v426_v55 = vpop.f32.mrf.mxu1 }
 0x213   :  { %v427_v20 = vadd.f32 %v4991_v5, %v426_v55 }
 0x214   :  { %575 = vrot.lane.b32.xlu1 %v6318_v27, %s5981_s5  ;;  %v5246_v31 = vpop.f32.mrf.mxu1 }
 0x215   :  { %v438_v33 = vadd.f32 %v5246_v31, %v4991_v5 }
 0x216   :  { %v429_v34 = vpop.f32.mrf.mxu1 }
 0x217   :  { %v430_v38 = vadd.f32 %v4991_v5, %v429_v34  ;;  %v6328_v41 = vpack.c.bf16 %v438_v33, %v435_v39 }
 0x218   :  { %625 = vrot.lane.b32.xlu1 %v6322_v0, %s5981_s5  ;;  %v5249_v40 = vpop.f32.mrf.mxu1 }
 0x219   :  { %v6326_v1 = vpack.c.bf16 %v430_v38, %v427_v20  ;;  %v451_v10 = vadd.f32 %v5249_v40, %v4991_v5  ;;  %v6437_v40 = vld [vmem:[%s8023_s1 + $0x10] sm:$0xff] }
 0x21a   :  { %v442_v42 = vpop.f32.mrf.mxu1 }
 0x21b   :  { %675 = vrot.lane.b32.xlu0 %v6326_v1, %s5981_s5  ;;  %v443_v36 = vadd.f32 %v4991_v5, %v442_v42 }
 0x21c   :  { %725 = vrot.lane.b32.xlu1 %v6328_v41, %s5981_s5  ;;  %v5250_v43 = vpop.f32.mrf.mxu1 }
 0x21d   :  { %v454_v46 = vadd.f32 %v5250_v43, %v4991_v5 }
 0x21e   :  { %v445_v48 = vpop.f32.mrf.mxu1 }
 0x21f   :  { %v6334_v49 = vpack.c.bf16 %v454_v46, %v451_v10  ;;  %v446_v50 = vadd.f32 %v4991_v5, %v445_v48 }
 0x221   :  { %v6336_v51 = vpack.c.bf16 %v446_v50, %v443_v36  ;;  %825 = vrot.lane.b32.xlu1 %v6334_v49, %s5981_s5 }
 0x223   :  { %775 = vrot.lane.b32.xlu0 %v6336_v51, %s5981_s5  ;;  %s5989_s5 = smov 72  }
 0x225   :  { %1156 = vrot.lane.b32.xlu1 %v6310_v45, %s5982_s26 }
 0x227   :  { %1109 = vrot.lane.b32.xlu0 %v6312_v13, %s5982_s26 }
 0x229   :  { %1250 = vrot.lane.b32.xlu1 %v6322_v0, %s5982_s26 }
 0x22d   :  { %1203 = vrot.lane.b32.xlu1 %v6318_v27, %s5982_s26 }
 0x27c   :  { %v526_v23 = vpop.permute.xlu1 %525 }
 0x27d   :  { %v531_v28 = vsel %vm476_vm2, %v526_v23, 0 }
 0x27e   :  { %v475_v11 = vpop.permute.xlu0 %474 }
 0x27f   :  { %v481_v52 = vsel %vm476_vm2, %v475_v11, 0 }
 0x280   :  { %5252 = vmatpush3.bf16.xpose.msra.mxu1 %v481_v52 }
 0x281   :  { %5257 = vmatprep.subr.bf16.mxu1 %v8027_v4 }
 0x286   :  { %v576_v29 = vpop.permute.xlu1 %575 }
 0x287   :  { %5254 = vmatmul.mubr.msk.bf16.vlgmr.msra.gmra.mxu1 %vm476_vm2, %v6312_v13  ;;  %v581_v57 = vsel %vm476_vm2, %v576_v29, 0 }
 0x288   :  { %5258 = vmatpush3.bf16.xpose.msra.mxu1 %v531_v28  ;;  %5259 = vmatprep.mubr.msk.bf16.mxu1 %vm5980_vm1, %v8027_v4 }
 0x289   :  { %5263 = vmatprep.subr.bf16.mxu1 %v8027_v4 }
 0x28a   :  { %v626_v17 = vpop.permute.xlu1 %625 }
 0x28b   :  { %v631_v35 = vsel %vm476_vm2, %v626_v17, 0 }
 0x28d   :  { %v676_v53 = vpop.permute.xlu0 %675 }
 0x28e   :  { %v681_v56 = vsel %vm476_vm2, %v676_v53, 0  ;;  %v726_v44 = vpop.permute.xlu1 %725 }
 0x28f   :  { %5260 = vmatmul.mubr.msk.bf16.vlgmr.msra.gmra.mxu1 %vm476_vm2, %v6310_v45  ;;  %5276 = vmatpush3.bf16.xpose.msra.mxu0 %v681_v56  ;;  %v731_v61 = vsel %vm476_vm2, %v726_v44, 0 }
 0x290   :  { %5264 = vmatpush3.bf16.xpose.msra.mxu1 %v581_v57  ;;  %5265 = vmatprep.mubr.msk.bf16.mxu1 %vm5980_vm1, %v8027_v4 }
 0x291   :  { %5269 = vmatprep.subr.bf16.mxu1 %v8027_v4  ;;  %5287 = vmatprep.subr.bf16.mxu0 %v8027_v4 }
 0x293   :  { %v826_v37 = vpop.permute.xlu1 %825 }
 0x294   :  { %v831_v62 = vsel %vm476_vm2, %v826_v37, 0 }
 0x295   :  { %v776_v58 = vpop.permute.xlu0 %775 }
 0x296   :  { %v781_v59 = vsel %vm476_vm2, %v776_v58, 0  ;;  %5278 = vmatmul.mubr.msk.bf16.vlgmr.msra.gmra.mxu0 %vm476_vm2, %v6326_v1 }
 0x297   :  { %5266 = vmatmul.mubr.msk.bf16.vlgmr.msra.gmra.mxu1 %vm476_vm2, %v6318_v27  ;;  %5288 = vmatpush3.bf16.xpose.msra.mxu0 %v781_v59  ;;  %v1157_v63 = vpop.permute.xlu1 %1156 }
 0x298   :  { %5270 = vmatpush3.bf16.xpose.msra.mxu1 %v631_v35  ;;  %5271 = vmatprep.mubr.msk.bf16.mxu1 %vm5980_vm1, %v8027_v4 }
 0x299   :  { %5289 = vmatprep.mubr.msk.bf16.mxu0 %vm5980_vm1, %v8027_v4  ;;  %5281 = vmatprep.subr.bf16.mxu1 %v8027_v4  ;;  %v1110_v60 = vpop.permute.xlu0 %1109 }
 0x29a   :  { %5299 = vmatprep.subr.bf16.mxu0 %v8027_v4 }
 0x29e   :  { %5290 = vmatmul.mubr.msk.bf16.vlgmr.msra.gmra.mxu0 %vm476_vm2, %v6336_v51 }
 0x29f   :  { %5272 = vmatmul.mubr.msk.bf16.vlgmr.msra.gmra.mxu1 %vm476_vm2, %v6322_v0  ;;  %5300 = vmatpush3.bf16.msra.mxu0 %v1110_v60 }
 0x2a0   :  { %5282 = vmatpush3.bf16.xpose.msra.mxu1 %v731_v61  ;;  %5283 = vmatprep.mubr.msk.bf16.mxu1 %vm5980_vm1, %v8027_v4  ;;  %v6460_v61 = vld [vmem:[%s8023_s1 + $0x18] sm:$0xff] }
 0x2a1   :  { %5293 = vmatprep.subr.bf16.mxu1 %v8027_v4  ;;  %5301 = vmatprep.mubr.msk.bf16.mxu0 %vm5980_vm1, %v8027_v4 }
 0x2a2   :  { %5311 = vmatprep.subr.bf16.mxu0 %v8027_v4 }
 0x2a7   :  { %5284 = vmatmul.mubr.msk.bf16.vlgmr.msra.gmra.mxu1 %vm476_vm2, %v6328_v41 }
 0x2a8   :  { %5294 = vmatpush3.bf16.xpose.msra.mxu1 %v831_v62  ;;  %5295 = vmatprep.mubr.msk.bf16.mxu1 %vm5980_vm1, %v8027_v4  ;;  %v6465_v62 = vld [vmem:[%s8023_s1 + $0x20] sm:$0xff] }
 0x2a9   :  { %5305 = vmatprep.subr.bf16.mxu1 %v8027_v4 }
 0x2af   :  { %5296 = vmatmul.mubr.msk.bf16.vlgmr.msra.gmra.mxu1 %vm476_vm2, %v6334_v49 }
 0x2b0   :  { %5306 = vmatpush3.bf16.msra.mxu1 %v1157_v63  ;;  %5307 = vmatprep.mubr.msk.bf16.mxu1 %vm5980_vm1, %v8027_v4 }
 0x2b1   :  { %5317 = vmatprep.subr.bf16.mxu1 %v8027_v4 }
 0x347   :  { %v517_v21 = vpop.f32.mrf.mxu1 }
 0x348   :  { %v874_v2 = vmul.f32 0.35355338, %v517_v21 }
 0x349   :  { %v5255_v3 = vpop.f32.mrf.mxu1 }
 0x34a   :  { %v892_v5 = vadd.f32 %v6403_v47, %v874_v2 }
 0x34b   :  { %v520_v32 = vpop.f32.mrf.mxu1 }
 0x34c   :  { %v875_v7 = vmul.f32 0.35355338, %v520_v32  ;;  %v6417_v8 = vadd.f32 %v892_v5, %v6408_v25 }
 0x34d   :  { %v5256_v24 = vpop.f32.mrf.mxu1 }
 0x34e   :  { %v893_v12 = vadd.f32 %v6414_v6, %v875_v7  ;;  %v925_v54 = vsel %vm924_vm3, %v6417_v8, -inf }
 0x34f   :  { %926 = vmax.xlane.f32.xlu0 %v925_v54  ;;  %v567_v14 = vpop.f32.mrf.mxu1 }
 0x350   :  { %v6428_v15 = vadd.f32 %v893_v12, %v6422_v9  ;;  %v876_v16 = vmul.f32 0.35355338, %v567_v14 }
 0x351   :  { %v5261_v18 = vpop.f32.mrf.mxu1 }
 0x352   :  { %v928_v19 = vsel %vm924_vm3, %v6428_v15, -inf  ;;  %v894_v34 = vadd.f32 %v6403_v47, %v876_v16 }
 0x353   :  { %929 = vmax.xlane.f32.xlu1 %v928_v19  ;;  %v570_v22 = vpop.f32.mrf.mxu1  ;;  %v6481_v19 = vld [vmem:[%s8023_s1 + $0x28] sm:$0xff] }
 0x354   :  { %v877_v46 = vmul.f32 0.35355338, %v570_v22  ;;  %v6446_v52 = vadd.f32 %v894_v34, %v6437_v40 }
 0x355   :  { %v5262_v26 = vpop.f32.mrf.mxu1 }
 0x356   :  { %v717_v55 = vpop.f32.mrf.mxu0  ;;  %v895_v56 = vadd.f32 %v6414_v6, %v877_v46  ;;  %v931_v44 = vsel %vm924_vm3, %v6446_v52, -inf }
 0x357   :  { %v617_v30 = vpop.f32.mrf.mxu1  ;;  %v882_v31 = vmul.f32 0.35355338, %v717_v55 }
 0x358   :  { %v5279_v33 = vpop.f32.mrf.mxu0  ;;  %v878_v57 = vmul.f32 0.35355338, %v617_v30  ;;  %v6473_v7 = vadd.f32 %v895_v56, %v6460_v61 }
 0x359   :  { %v900_v20 = vadd.f32 %v6403_v47, %v882_v31  ;;  %v5267_v38 = vpop.f32.mrf.mxu1 }
 0x35a   :  { %v720_v39 = vpop.f32.mrf.mxu0  ;;  %v896_v3 = vadd.f32 %v6403_v47, %v878_v57  ;;  %v934_v26 = vsel %vm924_vm3, %v6473_v7, -inf }
 0x35b   :  { %v620_v42 = vpop.f32.mrf.mxu1  ;;  %v883_v43 = vmul.f32 0.35355338, %v720_v39  ;;  %v6440_v10 = vadd.f32 %v900_v20, %v6408_v25  ;;  %v6501_v39 = vld [vmem:[%s8023_s1 + $0x30] sm:$0xff] }
 0x35c   :  { %v5280_v48 = vpop.f32.mrf.mxu0  ;;  %v879_v17 = vmul.f32 0.35355338, %v620_v42  ;;  %v6489_v55 = vadd.f32 %v896_v3, %v6465_v62  ;;  %v6506_v42 = vld [vmem:[%s8023_s1 + $0x38] sm:$0xff] }
 0x35d   :  { %v901_v36 = vadd.f32 %v6414_v6, %v883_v43  ;;  %v5268_v50 = vpop.f32.mrf.mxu1  ;;  %v949_v11 = vsel %vm924_vm3, %v6440_v10, -inf }
 0x35e   :  { %950 = vmax.xlane.f32.xlu0 %v949_v11  ;;  %v817_v23 = vpop.f32.mrf.mxu0  ;;  %v897_v5 = vadd.f32 %v6414_v6, %v879_v17  ;;  %v937_v48 = vsel %vm924_vm3, %v6489_v55, -inf }
 0x35f   :  { %v667_v28 = vpop.f32.mrf.mxu1  ;;  %v886_v29 = vmul.f32 0.35355338, %v817_v23  ;;  %v6449_v53 = vadd.f32 %v901_v36, %v6422_v9 }
 0x360   :  { %v5291_v58 = vpop.f32.mrf.mxu0  ;;  %v880_v24 = vmul.f32 0.35355338, %v667_v28  ;;  %v6492_v30 = vadd.f32 %v897_v5, %v6481_v19 }
 0x361   :  { %v904_v59 = vadd.f32 %v6403_v47, %v886_v29  ;;  %v5273_v35 = vpop.f32.mrf.mxu1  ;;  %v952_v60 = vsel %vm924_vm3, %v6449_v53, -inf }
 0x362   :  { %932 = vmax.xlane.f32.xlu0 %v931_v44  ;;  %953 = vmax.xlane.f32.xlu1 %v952_v60  ;;  %v820_v37 = vpop.f32.mrf.mxu0  ;;  %v898_v31 = vadd.f32 %v6403_v47, %v880_v24  ;;  %v940_v11 = vsel %vm924_vm3, %v6492_v30, -inf }
 0x363   :  { %v670_v63 = vpop.f32.mrf.mxu1  ;;  %v887_v21 = vmul.f32 0.35355338, %v820_v37  ;;  %v6468_v2 = vadd.f32 %v904_v59, %v6465_v62 }
 0x364   :  { %v5292_v32 = vpop.f32.mrf.mxu0  ;;  %v881_v12 = vmul.f32 0.35355338, %v670_v63  ;;  %v6514_v23 = vadd.f32 %v898_v31, %v6501_v39 }
 0x365   :  { %v905_v54 = vadd.f32 %v6414_v6, %v887_v21  ;;  %v5274_v14 = vpop.f32.mrf.mxu1  ;;  %v961_v18 = vsel %vm924_vm3, %v6468_v2, -inf }
 0x366   :  { %962 = vmax.xlane.f32.xlu0 %v961_v18  ;;  %v899_v33 = vadd.f32 %v6414_v6, %v881_v12  ;;  %v943_v58 = vsel %vm924_vm3, %v6514_v23, -inf  ;;  %v6550_v14 = vpop.permute.xlu1 %1250 }
 0x367   :  { %v767_v22 = vpop.f32.mrf.mxu1  ;;  %v6484_v16 = vadd.f32 %v905_v54, %v6481_v19 }
 0x368   :  { %v884_v34 = vmul.f32 0.35355338, %v767_v22  ;;  %v6517_v28 = vadd.f32 %v899_v33, %v6506_v42 }
 0x369   :  { %v5285_v20 = vpop.f32.mrf.mxu1  ;;  %v964_v38 = vsel %vm924_vm3, %v6484_v16, -inf }
 0x36a   :  { %935 = vmax.xlane.f32.xlu0 %v934_v26  ;;  %965 = vmax.xlane.f32.xlu1 %v964_v38  ;;  %v902_v36 = vadd.f32 %v6403_v47, %v884_v34  ;;  %v946_v59 = vsel %vm924_vm3, %v6517_v28, -inf  ;;  %v6552_v18 = vpop.permute.xlu1 %1203 }
 0x36b   :  { %v770_v43 = vpop.f32.mrf.mxu1 }
 0x36c   :  { %v885_v46 = vmul.f32 0.35355338, %v770_v43  ;;  %v6525_v35 = vadd.f32 %v902_v36, %v6437_v40 }
 0x36d   :  { %v5286_v50 = vpop.f32.mrf.mxu1 }
 0x36e   :  { %v903_v29 = vadd.f32 %v6414_v6, %v885_v46  ;;  %938 = vmax.xlane.f32.xlu0 %v937_v48  ;;  %941 = vmax.xlane.f32.xlu1 %v940_v11  ;;  %v955_v21 = vsel %vm924_vm3, %v6525_v35, -inf }
 0x36f   :  { %v867_v56 = vpop.f32.mrf.mxu1 }
 0x370   :  { %v888_v57 = vmul.f32 0.35355338, %v867_v56  ;;  %v6528_v44 = vadd.f32 %v903_v29, %v6460_v61 }
 0x371   :  { %v5297_v17 = vpop.f32.mrf.mxu1 }
 0x372   :  { %v906_v60 = vadd.f32 %v6403_v47, %v888_v57  ;;  %944 = vmax.xlane.f32.xlu0 %v943_v58  ;;  %947 = vmax.xlane.f32.xlu1 %v946_v59  ;;  %v958_v3 = vsel %vm924_vm3, %v6528_v44, -inf }
 0x373   :  { %v870_v37 = vpop.f32.mrf.mxu1 }
 0x374   :  { %v6536_v5 = vadd.f32 %v906_v60, %v6501_v39  ;;  %v889_v47 = vmul.f32 0.35355338, %v870_v37 }
 0x375   :  { %v5298_v63 = vpop.f32.mrf.mxu1 }
 0x376   :  { %956 = vmax.xlane.f32.xlu0 %v955_v21  ;;  %959 = vmax.xlane.f32.xlu1 %v958_v3  ;;  %v967_v32 = vsel %vm924_vm3, %v6536_v5, -inf  ;;  %v907_v24 = vadd.f32 %v6414_v6, %v889_v47 }
 0x378   :  { %v6546_v12 = vadd.f32 %v907_v24, %v6506_v42 }
 0x37a   :  { %968 = vmax.xlane.f32.xlu0 %v967_v32  ;;  %v970_v54 = vsel %vm924_vm3, %v6546_v12, -inf }
 0x387   :  { %1344 = vrot.lane.b32.xlu1 %v6328_v41, %s5982_s26 }
 0x390   :  { %1297 = vrot.lane.b32.xlu0 %v6326_v1, %s5982_s26 }
 0x3ab   :  { %971 = vmax.xlane.f32.xlu1 %v970_v54 }
 0x3d8   :  { %v927_v22 = vpop.xlane.xlu0 %926 }
 0x3d9   :  { %v973_v26 = vsub.f32 %v6417_v8, %v927_v22 }
 0x3db   :  { %v989_v31 = vmul.f32 1.442695, %v973_v26 }
 0x3dc   :  { %v930_v33 = vpop.xlane.xlu1 %929 }
 0x3dd   :  { %5711 = vpow2.f32 %v989_v31  ;;  %v974_v34 = vsub.f32 %v6428_v15, %v930_v33 }
 0x3df   :  { %v991_v6 = vmul.f32 1.442695, %v974_v34 }
 0x3e1   :  { %5713 = vpow2.f32 %v991_v6 }
 0x3e7   :  { %v951_v20 = vpop.xlane.xlu0 %950 }
 0x3e8   :  { %v981_v38 = vsub.f32 %v6440_v10, %v951_v20 }
 0x3ea   :  { %v6557_v43 = vpop.eup %5711  ;;  %v1005_v46 = vmul.f32 1.442695, %v981_v38 }
 0x3eb   :  { %v954_v48 = vpop.xlane.xlu1 %953  ;;  %v1021_v36 = vsel %vm924_vm3, %v6557_v43, 0.0  ;;  %v933_v50 = vpop.xlane.xlu0 %932 }
 0x3ec   :  { %5715 = vpow2.f32 %v1005_v46  ;;  %v982_v8 = vsub.f32 %v6449_v53, %v954_v48  ;;  %1022 = vadd.xlane.f32.xlu0 %v1021_v36  ;;  %v975_v11 = vsub.f32 %v6446_v52, %v933_v50 }
 0x3ee   :  { %v6563_v15 = vpop.eup %5713  ;;  %v1007_v29 = vmul.f32 1.442695, %v982_v8  ;;  %v993_v56 = vmul.f32 1.442695, %v975_v11 }
 0x3ef   :  { %v1024_v10 = vsel %vm924_vm3, %v6563_v15, 0.0  ;;  %v963_v57 = vpop.xlane.xlu0 %962 }
 0x3f0   :  { %5717 = vpow2.f32 %v1007_v29  ;;  %1025 = vadd.xlane.f32.xlu1 %v1024_v10  ;;  %v985_v17 = vsub.f32 %v6468_v2, %v963_v57 }
 0x3f1   :  { %5719 = vpow2.f32 %v993_v56 }
 0x3f2   :  { %v1013_v58 = vmul.f32 1.442695, %v985_v17 }
 0x3f3   :  { %v966_v59 = vpop.xlane.xlu1 %965  ;;  %v936_v60 = vpop.xlane.xlu0 %935 }
 0x3f4   :  { %5721 = vpow2.f32 %v1013_v58  ;;  %v986_v53 = vsub.f32 %v6484_v16, %v966_v59  ;;  %v976_v52 = vsub.f32 %v6473_v7, %v936_v60 }
 0x3f6   :  { %v995_v37 = vmul.f32 1.442695, %v976_v52  ;;  %v1015_v63 = vmul.f32 1.442695, %v986_v53 }
 0x3f7   :  { %v942_v21 = vpop.xlane.xlu1 %941  ;;  %v939_v3 = vpop.xlane.xlu0 %938 }
 0x3f8   :  { %v978_v32 = vsub.f32 %v6492_v30, %v942_v21  ;;  %v977_v47 = vsub.f32 %v6489_v55, %v939_v3  ;;  %5723 = vpow2.f32 %v995_v37 }
 0x3f9   :  { %v6572_v24 = vpop.eup %5715  ;;  %5725 = vpow2.f32 %v1015_v63 }
 0x3fa   :  { %v997_v2 = vmul.f32 1.442695, %v977_v47  ;;  %v1045_v54 = vsel %vm924_vm3, %v6572_v24, 0.0  ;;  %v999_v22 = vmul.f32 1.442695, %v978_v32 }
 0x3fb   :  { %v948_v16 = vpop.xlane.xlu1 %947  ;;  %1046 = vadd.xlane.f32.xlu0 %v1045_v54  ;;  %v945_v7 = vpop.xlane.xlu0 %944 }
 0x3fc   :  { %v980_v26 = vsub.f32 %v6517_v28, %v948_v16  ;;  %v979_v31 = vsub.f32 %v6514_v23, %v945_v7  ;;  %5727 = vpow2.f32 %v997_v2 }
 0x3fd   :  { %v6578_v33 = vpop.eup %5717  ;;  %5729 = vpow2.f32 %v999_v22 }
 0x3fe   :  { %v6580_v55 = vpop.eup %5719  ;;  %v1001_v30 = vmul.f32 1.442695, %v979_v31  ;;  %v1048_v34 = vsel %vm924_vm3, %v6578_v33, 0.0  ;;  %v1003_v6 = vmul.f32 1.442695, %v980_v26 }
 0x3ff   :  { %1049 = vadd.xlane.f32.xlu1 %v1048_v34  ;;  %v1027_v20 = vsel %vm924_vm3, %v6580_v55, 0.0  ;;  %v957_v38 = vpop.xlane.xlu0 %956  ;;  %v960_v52 = vpop.xlane.xlu1 %959 }
 0x400   :  { %1028 = vadd.xlane.f32.xlu0 %v1027_v20  ;;  %v983_v28 = vsub.f32 %v6525_v35, %v957_v38  ;;  %5731 = vpow2.f32 %v1001_v30  ;;  %v984_v63 = vsub.f32 %v6528_v44, %v960_v52 }
 0x401   :  { %v6587_v23 = vpop.eup %5721  ;;  %5733 = vpow2.f32 %v1003_v6 }
 0x402   :  { %v1009_v46 = vmul.f32 1.442695, %v983_v28  ;;  %v1057_v48 = vsel %vm924_vm3, %v6587_v23, 0.0  ;;  %v1011_v3 = vmul.f32 1.442695, %v984_v63 }
 0x403   :  { %v969_v37 = vpop.xlane.xlu0 %968  ;;  %v6635_v44 = vpop.permute.xlu1 %1344 }
 0x404   :  { %1058 = vadd.xlane.f32.xlu0 %v1057_v48  ;;  %5735 = vpow2.f32 %v1009_v46  ;;  %v987_v21 = vsub.f32 %v6536_v5, %v969_v37 }
 0x405   :  { %v6591_v36 = vpop.eup %5723  ;;  %5737 = vpow2.f32 %v1011_v3 }
 0x406   :  { %v1030_v50 = vsel %vm924_vm3, %v6591_v36, 0.0  ;;  %v6595_v8 = vpop.eup %5725  ;;  %v1017_v32 = vmul.f32 1.442695, %v987_v21 }
 0x407   :  { %1031 = vadd.xlane.f32.xlu1 %v1030_v50  ;;  %v1060_v35 = vsel %vm924_vm3, %v6595_v8, 0.0  ;;  %v6648_v26 = vpop.permute.xlu0 %1297 }
 0x408   :  { %5739 = vpow2.f32 %v1017_v32 }
 0x409   :  { %v6597_v11 = vpop.eup %5727 }
 0x40a   :  { %v1033_v29 = vsel %vm924_vm3, %v6597_v11, 0.0  ;;  %v6603_v56 = vpop.eup %5729 }
 0x40b   :  { %1061 = vadd.xlane.f32.xlu1 %v1060_v35  ;;  %1034 = vadd.xlane.f32.xlu0 %v1033_v29  ;;  %v1036_v57 = vsel %vm924_vm3, %v6603_v56, 0.0 }
 0x40d   :  { %v6605_v10 = vpop.eup %5731 }
 0x40e   :  { %v1039_v17 = vsel %vm924_vm3, %v6605_v10, 0.0  ;;  %v6611_v58 = vpop.eup %5733 }
 0x40f   :  { %1037 = vadd.xlane.f32.xlu1 %v1036_v57  ;;  %1040 = vadd.xlane.f32.xlu0 %v1039_v17  ;;  %v1042_v60 = vsel %vm924_vm3, %v6611_v58, 0.0 }
 0x411   :  { %v6613_v59 = vpop.eup %5735 }
 0x412   :  { %v1051_v53 = vsel %vm924_vm3, %v6613_v59, 0.0  ;;  %v6625_v47 = vpop.eup %5737 }
 0x413   :  { %1043 = vadd.xlane.f32.xlu1 %v1042_v60  ;;  %1052 = vadd.xlane.f32.xlu0 %v1051_v53  ;;  %v1054_v54 = vsel %vm924_vm3, %v6625_v47, 0.0 }
 0x415   :  { %v6627_v2 = vpop.eup %5739 }
 0x416   :  { %v1063_v22 = vsel %vm924_vm3, %v6627_v2, 0.0 }
 0x424   :  { %1438 = vrot.lane.b32.xlu1 %v6334_v49, %s5982_s26 }
 0x429   :  { %1391 = vrot.lane.b32.xlu0 %v6336_v51, %s5982_s26  ;;  %s5990_s26 = smov 104  }
 0x434   :  { %v972_v5 = vpop.xlane.xlu1 %971 }
 0x435   :  { %v988_v16 = vsub.f32 %v6546_v12, %v972_v5 }
 0x437   :  { %v1019_v7 = vmul.f32 1.442695, %v988_v16 }
 0x439   :  { %5741 = vpow2.f32 %v1019_v7 }
 0x446   :  { %v6654_v30 = vpop.eup %5741 }
 0x447   :  { %v1066_v34 = vsel %vm924_vm3, %v6654_v30, 0.0 }
 0x448   :  { %1055 = vadd.xlane.f32.xlu1 %v1054_v54  ;;  %1064 = vadd.xlane.f32.xlu0 %v1063_v22 }
 0x459   :  { %1554 = vrot.lane.b32.xlu1 %v6310_v45, %s5983_s24 }
 0x45e   :  { %1503 = vrot.lane.b32.xlu0 %v6312_v13, %s5983_s24 }
 0x462   :  { %1501 = vrot.lane.b32.xlu0 %v6312_v13, %s5984_s25 }
 0x466   :  { %1552 = vrot.lane.b32.xlu0 %v6310_v45, %s5984_s25 }
 0x46a   :  { %1603 = vrot.lane.b32.xlu0 %v6318_v27, %s5984_s25 }
 0x46e   :  { %1654 = vrot.lane.b32.xlu0 %v6322_v0, %s5984_s25 }
 0x472   :  { %1705 = vrot.lane.b32.xlu0 %v6326_v1, %s5984_s25 }
 0x475   :  { %v1023_v31 = vpop.xlane.xlu0 %1022 }
 0x476   :  { %1756 = vrot.lane.b32.xlu0 %v6328_v41, %s5984_s25  ;;  %5743 = vrcp.f32 %v1023_v31 }
 0x479   :  { %v1026_v12 = vpop.xlane.xlu1 %1025 }
 0x47a   :  { %5745 = vrcp.f32 %v1026_v12  ;;  %1807 = vrot.lane.b32.xlu0 %v6336_v51, %s5984_s25 }
 0x47d   :  { %1067 = vadd.xlane.f32.xlu1 %v1066_v34 }
 0x483   :  { %v5744_v6 = vpop.eup %5743 }
 0x484   :  { %v1047_v20 = vpop.xlane.xlu0 %1046  ;;  %v1085_v28 = vmul.f32 %v5744_v6, %v6557_v43 }
 0x487   :  { %v5746_v38 = vpop.eup %5745 }
 0x488   :  { %v1086_v46 = vmul.f32 %v5746_v38, %v6563_v15  ;;  %v1050_v35 = vpop.xlane.xlu1 %1049 }
 0x489   :  { %v1029_v50 = vpop.xlane.xlu0 %1028 }
 0x48a   :  { %v1101_v48 = vpack.c.bf16 %v1086_v46, %v1085_v28  ;;  %5747 = vrcp.f32 %v1029_v50 }
 0x48c   :  { %5302 = vmatmul.mubr.msk.bf16.vlgmr.msra.gmra.mxu0 %vm924_vm3, %v1101_v48 }
 0x48d   :  { %5312 = vmatpush3.bf16.msra.mxu0 %v6552_v18  ;;  %5313 = vmatprep.mubr.msk.bf16.mxu0 %vm5980_vm1, %v8027_v4  ;;  %v1059_v29 = vpop.xlane.xlu0 %1058 }
 0x48e   :  { %5323 = vmatprep.subr.bf16.mxu0 %v8027_v4  ;;  %1605 = vrot.lane.b32.xlu1 %v6318_v27, %s5983_s24 }
 0x490   :  { %v1032_v43 = vpop.xlane.xlu1 %1031 }
 0x491   :  { %5749 = vrcp.f32 %v1032_v43 }
 0x492   :  { %1656 = vrot.lane.b32.xlu1 %v6322_v0, %s5983_s24 }
 0x494   :  { %v1062_v15 = vpop.xlane.xlu1 %1061  ;;  %v1035_v57 = vpop.xlane.xlu0 %1034 }
 0x495   :  { %5751 = vrcp.f32 %v1035_v57 }
 0x496   :  { %1707 = vrot.lane.b32.xlu1 %v6326_v1, %s5983_s24 }
 0x497   :  { %v5748_v60 = vpop.eup %5747 }
 0x498   :  { %v1038_v18 = vpop.xlane.xlu1 %1037  ;;  %v1041_v17 = vpop.xlane.xlu0 %1040  ;;  %v1087_v37 = vmul.f32 %v5748_v60, %v6580_v55 }
 0x499   :  { %5753 = vrcp.f32 %v1038_v18 }
 0x49a   :  { %1758 = vrot.lane.b32.xlu1 %v6328_v41, %s5983_s24  ;;  %5755 = vrcp.f32 %v1041_v17 }
 0x49b   :  { %5757 = vrcp.f32 %v1050_v35 }
 0x49c   :  { %v1044_v53 = vpop.xlane.xlu1 %1043  ;;  %v1053_v12 = vpop.xlane.xlu0 %1052 }
 0x49d   :  { %5759 = vrcp.f32 %v1044_v53 }
 0x49e   :  { %v5750_v52 = vpop.eup %5749  ;;  %1809 = vrot.lane.b32.xlu1 %v6336_v51, %s5983_s24  ;;  %5761 = vrcp.f32 %v1047_v20 }
 0x49f   :  { %v1088_v63 = vmul.f32 %v5750_v52, %v6591_v36  ;;  %5763 = vrcp.f32 %v1062_v15 }
 0x4a0   :  { %5765 = vrcp.f32 %v1059_v29  ;;  %v1439_v20 = vpop.permute.xlu1 %1438 }
 0x4a1   :  { %v1102_v21 = vpack.c.bf16 %v1088_v63, %v1087_v37  ;;  %5767 = vrcp.f32 %v1053_v12 }
 0x4a2   :  { %1860 = vrot.lane.b32.xlu1 %v6334_v49, %s5983_s24  ;;  %v5752_v3 = vpop.eup %5751 }
 0x4a3   :  { %5308 = vmatmul.mubr.msk.bf16.vlgmr.msra.gmra.mxu1 %vm924_vm3, %v1102_v21  ;;  %v1089_v55 = vmul.f32 %v5752_v3, %v6597_v11 }
 0x4a4   :  { %5318 = vmatpush3.bf16.msra.mxu1 %v6550_v14  ;;  %5319 = vmatprep.mubr.msk.bf16.mxu1 %vm5980_vm1, %v8027_v4 }
 0x4a5   :  { %5329 = vmatprep.subr.bf16.mxu1 %v8027_v4 }
 0x4a6   :  { %v5754_v32 = vpop.eup %5753  ;;  %1858 = vrot.lane.b32.xlu1 %v6334_v49, %s5984_s25 }
 0x4a7   :  { %v1090_v36 = vmul.f32 %v5754_v32, %v6603_v56  ;;  %v5756_v54 = vpop.eup %5755 }
 0x4a8   :  { %v5758_v22 = vpop.eup %5757  ;;  %v1091_v14 = vmul.f32 %v5756_v54, %v6605_v10 }
 0x4a9   :  { %v1103_v5 = vpack.c.bf16 %v1090_v36, %v1089_v55  ;;  %v1094_v56 = vmul.f32 %v5758_v22, %v6578_v33 }
 0x4aa   :  { %v5760_v16 = vpop.eup %5759 }
 0x4ab   :  { %5314 = vmatmul.mubr.msk.bf16.vlgmr.msra.gmra.mxu0 %vm924_vm3, %v1103_v5  ;;  %v1092_v7 = vmul.f32 %v5760_v16, %v6611_v58  ;;  %v5762_v31 = vpop.eup %5761 }
 0x4ac   :  { %5324 = vmatpush3.bf16.msra.mxu0 %v6648_v26  ;;  %5325 = vmatprep.mubr.msk.bf16.mxu0 %vm5980_vm1, %v8027_v4  ;;  %v1093_v34 = vmul.f32 %v5762_v31, %v6572_v24  ;;  %v5764_v58 = vpop.eup %5763  ;;  %v1392_v26 = vpop.permute.xlu0 %1391 }
 0x4ad   :  { %v1104_v11 = vpack.c.bf16 %v1092_v7, %v1091_v14  ;;  %5335 = vmatprep.subr.bf16.mxu0 %v8027_v4  ;;  %v5766_v6 = vpop.eup %5765  ;;  %v1098_v33 = vmul.f32 %v5764_v58, %v6595_v8 }
 0x4ae   :  { %v1105_v10 = vpack.c.bf16 %v1094_v56, %v1093_v34  ;;  %v1097_v24 = vmul.f32 %v5766_v6, %v6587_v23  ;;  %v5768_v8 = vpop.eup %5767 }
 0x4af   :  { %5320 = vmatmul.mubr.msk.bf16.vlgmr.msra.gmra.mxu1 %vm924_vm3, %v1104_v11  ;;  %v1095_v35 = vmul.f32 %v5768_v8, %v6613_v59 }
 0x4b0   :  { %5330 = vmatpush3.bf16.msra.mxu1 %v6635_v44  ;;  %5331 = vmatprep.mubr.msk.bf16.mxu1 %vm5980_vm1, %v8027_v4  ;;  %v1107_v44 = vpack.c.bf16 %v1098_v33, %v1097_v24 }
 0x4b1   :  { %5341 = vmatprep.subr.bf16.mxu1 %v8027_v4 }
 0x4b3   :  { %5326 = vmatmul.mubr.msk.bf16.vlgmr.msra.gmra.mxu0 %vm924_vm3, %v1105_v10 }
 0x4b4   :  { %5336 = vmatpush3.bf16.msra.mxu0 %v1392_v26  ;;  %5337 = vmatprep.mubr.msk.bf16.mxu0 %vm5980_vm1, %v8027_v4 }
 0x4b5   :  { %5347 = vmatprep.subr.bf16.mxu0 %v8027_v4 }
 0x4bb   :  { %5338 = vmatmul.mubr.msk.bf16.vlgmr.msra.gmra.mxu0 %vm924_vm3, %v1107_v44 }
 0x4bc   :  { %5349 = vmatprep.mubr.msk.bf16.mxu0 %vm5980_vm1, %v8027_v4 }
 0x4d1   :  { %v1056_v38 = vpop.xlane.xlu1 %1055  ;;  %v1065_v28 = vpop.xlane.xlu0 %1064 }
 0x4d2   :  { %5769 = vrcp.f32 %v1056_v38 }
 0x4d3   :  { %5771 = vrcp.f32 %v1065_v28 }
 0x4d5   :  { %v1504_v46 = vpop.permute.xlu0 %1503  ;;  %v1555_v15 = vpop.permute.xlu1 %1554 }
 0x4d6   :  { %v1509_v48 = vsel %vm476_vm2, %v1504_v46, 0  ;;  %v1560_v22 = vsel %vm476_vm2, %v1555_v15, 0 }
 0x4d7   :  { %5348 = vmatpush3.bf16.xpose.msra.mxu0 %v1509_v48 }
 0x4d8   :  { %5359 = vmatprep.subr.bf16.mxu0 %v8027_v4 }
 0x4d9   :  { %v1502_v50 = vpop.permute.xlu0 %1501 }
 0x4dd   :  { %v1553_v57 = vpop.permute.xlu0 %1552 }
 0x4de   :  { %5350 = vmatmul.mubr.msk.bf16.vlgmr.msra.gmra.mxu0 %vm476_vm2, %v1502_v50 }
 0x4df   :  { %v5770_v23 = vpop.eup %5769  ;;  %5361 = vmatprep.mubr.msk.bf16.mxu0 %vm5980_vm1, %v8027_v4 }
 0x4e0   :  { %v1096_v29 = vmul.f32 %v5770_v23, %v6625_v47  ;;  %v5772_v52 = vpop.eup %5771 }
 0x4e1   :  { %v1604_v17 = vpop.permute.xlu0 %1603  ;;  %v1099_v3 = vmul.f32 %v5772_v52, %v6627_v2 }
 0x4e2   :  { %v1106_v43 = vpack.c.bf16 %v1096_v29, %v1095_v35 }
 0x4e4   :  { %5332 = vmatmul.mubr.msk.bf16.vlgmr.msra.gmra.mxu1 %vm924_vm3, %v1106_v43 }
 0x4e5   :  { %5342 = vmatpush3.bf16.msra.mxu1 %v1439_v20  ;;  %5343 = vmatprep.mubr.msk.bf16.mxu1 %vm5980_vm1, %v8027_v4  ;;  %v1655_v53 = vpop.permute.xlu0 %1654 }
 0x4e6   :  { %5353 = vmatprep.subr.bf16.mxu1 %v8027_v4 }
 0x4e9   :  { %v1706_v55 = vpop.permute.xlu0 %1705 }
 0x4ed   :  { %v1757_v2 = vpop.permute.xlu0 %1756 }
 0x4f1   :  { %v1808_v14 = vpop.permute.xlu0 %1807 }
 0x506   :  { %v1068_v18 = vpop.xlane.xlu1 %1067 }
 0x507   :  { %5773 = vrcp.f32 %v1068_v18 }
 0x50a   :  { %v1606_v60 = vpop.permute.xlu1 %1605 }
 0x50b   :  { %v1611_v59 = vsel %vm476_vm2, %v1606_v60, 0 }
 0x50c   :  { %5360 = vmatpush3.bf16.xpose.msra.mxu0 %v1611_v59  ;;  %v6779_v59 = vld [vmem:[%s8022_s6 + $0x10] sm:$0xff] }
 0x50d   :  { %5371 = vmatprep.subr.bf16.mxu0 %v8027_v4 }
 0x50e   :  { %v1657_v47 = vpop.permute.xlu1 %1656 }
 0x512   :  { %v1708_v37 = vpop.permute.xlu1 %1707 }
 0x513   :  { %v1713_v63 = vsel %vm476_vm2, %v1708_v37, 0  ;;  %5362 = vmatmul.mubr.msk.bf16.vlgmr.msra.gmra.mxu0 %vm476_vm2, %v1604_v17 }
 0x514   :  { %v5774_v21 = vpop.eup %5773  ;;  %5372 = vmatpush3.bf16.xpose.msra.mxu0 %v1713_v63  ;;  %5373 = vmatprep.mubr.msk.bf16.mxu0 %vm5980_vm1, %v8027_v4  ;;  %v6785_v63 = vld [vmem:[%s8022_s6 + $0x18] sm:$0xff] }
 0x515   :  { %v1100_v32 = vmul.f32 %v5774_v21, %v6654_v30  ;;  %5383 = vmatprep.subr.bf16.mxu0 %v8027_v4  ;;  %v1662_v30 = vsel %vm476_vm2, %v1657_v47, 0 }
 0x516   :  { %v1759_v36 = vpop.permute.xlu1 %1758 }
 0x517   :  { %v1108_v54 = vpack.c.bf16 %v1100_v32, %v1099_v3  ;;  %v1764_v7 = vsel %vm476_vm2, %v1759_v36, 0 }
 0x519   :  { %5344 = vmatmul.mubr.msk.bf16.vlgmr.msra.gmra.mxu1 %vm924_vm3, %v1108_v54 }
 0x51a   :  { %5354 = vmatpush3.bf16.xpose.msra.mxu1 %v1560_v22  ;;  %v1810_v5 = vpop.permute.xlu1 %1809  ;;  %5355 = vmatprep.mubr.msk.bf16.mxu1 %vm5980_vm1, %v8027_v4 }
 0x51b   :  { %v1815_v16 = vsel %vm476_vm2, %v1810_v5, 0  ;;  %5374 = vmatmul.mubr.msk.bf16.vlgmr.msra.gmra.mxu0 %vm476_vm2, %v1706_v55  ;;  %5365 = vmatprep.subr.bf16.mxu1 %v8027_v4 }
 0x51c   :  { %5384 = vmatpush3.bf16.xpose.msra.mxu0 %v1815_v16  ;;  %5385 = vmatprep.mubr.msk.bf16.mxu0 %vm5980_vm1, %v8027_v4 }
 0x51d   :  { %5395 = vmatprep.subr.bf16.mxu0 %v8027_v4 }
 0x51e   :  { %v1861_v31 = vpop.permute.xlu1 %1860 }
 0x51f   :  { %v1866_v12 = vsel %vm476_vm2, %v1861_v31, 0 }
 0x521   :  { %5356 = vmatmul.mubr.msk.bf16.vlgmr.msra.gmra.mxu1 %vm476_vm2, %v1553_v57 }
 0x522   :  { %5366 = vmatpush3.bf16.xpose.msra.mxu1 %v1662_v30  ;;  %5367 = vmatprep.mubr.msk.bf16.mxu1 %vm5980_vm1, %v8027_v4  ;;  %v1859_v11 = vpop.permute.xlu1 %1858 }
 0x523   :  { %5386 = vmatmul.mubr.msk.bf16.vlgmr.msra.gmra.mxu0 %vm476_vm2, %v1808_v14  ;;  %5377 = vmatprep.subr.bf16.mxu1 %v8027_v4 }
 0x524   :  { %5397 = vmatprep.mubr.msk.bf16.mxu0 %vm5980_vm1, %v8027_v4 }
 0x529   :  { %5368 = vmatmul.mubr.msk.bf16.vlgmr.msra.gmra.mxu1 %vm476_vm2, %v1655_v53 }
 0x52a   :  { %5378 = vmatpush3.bf16.xpose.msra.mxu1 %v1764_v7  ;;  %5379 = vmatprep.mubr.msk.bf16.mxu1 %vm5980_vm1, %v8027_v4 }
 0x52b   :  { %5389 = vmatprep.subr.bf16.mxu1 %v8027_v4 }
 0x531   :  { %5380 = vmatmul.mubr.msk.bf16.vlgmr.msra.gmra.mxu1 %vm476_vm2, %v1757_v2 }
 0x532   :  { %5390 = vmatpush3.bf16.xpose.msra.mxu1 %v1866_v12  ;;  %5391 = vmatprep.mubr.msk.bf16.mxu1 %vm5980_vm1, %v8027_v4 }
 0x533   :  { %5401 = vmatprep.subr.bf16.mxu1 %v8027_v4 }
 0x539   :  { %5392 = vmatmul.mubr.msk.bf16.vlgmr.msra.gmra.mxu1 %vm476_vm2, %v1859_v11 }
 0x53a   :  { %5403 = vmatprep.mubr.msk.bf16.mxu1 %vm5980_vm1, %v8027_v4 }
 0x54c   :  { %v1149_v56 = vpop.f32.mrf.mxu0 }
 0x54d   :  { %1485 = vst.msk [vmem:[#allocation2] sm:$0xff] %vm476_vm2, %v1149_v56 }
 0x54e   :  { %v5303_v34 = vpop.f32.mrf.mxu0 }
 0x550   :  { %v1152_v10 = vpop.f32.mrf.mxu0 }
 0x551   :  { %1486 = vst.msk [vmem:[#allocation2 + $0x8] sm:$0xff] %vm476_vm2, %v1152_v10 }
 0x552   :  { %v5304_v58 = vpop.f32.mrf.mxu0 }
 0x563   :  { %v1196_v26 = vpop.f32.mrf.mxu1 }
 0x564   :  { %1487 = vst.msk [vmem:[#allocation2 + $0x10] sm:$0xff] %vm476_vm2, %v1196_v26 }
 0x565   :  { %v5309_v6 = vpop.f32.mrf.mxu1 }
 0x567   :  { %v1199_v33 = vpop.f32.mrf.mxu1 }
 0x568   :  { %1488 = vst.msk [vmem:[#allocation2 + $0x18] sm:$0xff] %vm476_vm2, %v1199_v33 }
 0x569   :  { %v5310_v24 = vpop.f32.mrf.mxu1 }
 0x56b   :  { %v1243_v44 = vpop.f32.mrf.mxu0 }
 0x56c   :  { %1489 = vst.msk [vmem:[#allocation2 + $0x20] sm:$0xff] %vm476_vm2, %v1243_v44 }
 0x56d   :  { %v5315_v20 = vpop.f32.mrf.mxu0 }
 0x56f   :  { %v1246_v38 = vpop.f32.mrf.mxu0  ;;  %v1290_v28 = vpop.f32.mrf.mxu1 }
 0x570   :  { %1490 = vst.msk [vmem:[#allocation2 + $0x28] sm:$0xff] %vm476_vm2, %v1246_v38  ;;  %1491 = vst.msk [vmem:[#allocation2 + $0x30] sm:$0xff] %vm476_vm2, %v1290_v28 }
 0x571   :  { %v5316_v46 = vpop.f32.mrf.mxu0  ;;  %v5321_v48 = vpop.f32.mrf.mxu1 }
 0x573   :  { %v1293_v8 = vpop.f32.mrf.mxu1  ;;  %v1337_v50 = vpop.f32.mrf.mxu0 }
 0x574   :  { %1492 = vst.msk [vmem:[#allocation2 + $0x38] sm:$0xff] %vm476_vm2, %v1293_v8  ;;  %1493 = vst.msk [vmem:[#allocation2 + $0x40] sm:$0xff] %vm476_vm2, %v1337_v50 }
 0x575   :  { %v5322_v23 = vpop.f32.mrf.mxu1  ;;  %v5327_v35 = vpop.f32.mrf.mxu0 }
 0x577   :  { %v1340_v29 = vpop.f32.mrf.mxu0 }
 0x578   :  { %1494 = vst.msk [vmem:[#allocation2 + $0x48] sm:$0xff] %vm476_vm2, %v1340_v29 }
 0x579   :  { %v5328_v43 = vpop.f32.mrf.mxu0 }
 0x57b   :  { %v1431_v15 = vpop.f32.mrf.mxu0 }
 0x57c   :  { %1497 = vst.msk [vmem:[#allocation2 + $0x60] sm:$0xff] %vm476_vm2, %v1431_v15 }
 0x57d   :  { %v5339_v57 = vpop.f32.mrf.mxu0 }
 0x57f   :  { %v1434_v18 = vpop.f32.mrf.mxu0 }
 0x580   :  { %1498 = vst.msk [vmem:[#allocation2 + $0x68] sm:$0xff] %vm476_vm2, %v1434_v18 }
 0x581   :  { %v5340_v17 = vpop.f32.mrf.mxu0 }
 0x59e   :  { %v1545_v60 = vpop.f32.mrf.mxu0 }
 0x59f   :  { %v1909_v47 = vmul.f32 0.35355338, %v1545_v60 }
 0x5a0   :  { %v5351_v53 = vpop.f32.mrf.mxu0 }
 0x5a1   :  { %v1928_v52 = vadd.f32 %v6779_v59, %v1909_v47 }
 0x5a2   :  { %v1548_v37 = vpop.f32.mrf.mxu0 }
 0x5a3   :  { %v1910_v21 = vmul.f32 0.35355338, %v1548_v37  ;;  %v6788_v3 = vadd.f32 %v1928_v52, %v6408_v25 }
 0x5a4   :  { %v1384_v32 = vpop.f32.mrf.mxu1  ;;  %v5352_v55 = vpop.f32.mrf.mxu0 }
 0x5a5   :  { %v1929_v36 = vadd.f32 %v6785_v63, %v1910_v21  ;;  %1495 = vst.msk [vmem:[#allocation2 + $0x50] sm:$0xff] %vm476_vm2, %v1384_v32  ;;  %v1960_v54 = vsel %vm924_vm3, %v6788_v3, -inf }
 0x5a6   :  { %v5333_v22 = vpop.f32.mrf.mxu1  ;;  %1961 = vmax.xlane.f32.xlu0 %v1960_v54 }
 0x5a7   :  { %v6795_v5 = vadd.f32 %v1929_v36, %v6422_v9 }
 0x5a8   :  { %v1387_v16 = vpop.f32.mrf.mxu1 }
 0x5a9   :  { %1496 = vst.msk [vmem:[#allocation2 + $0x58] sm:$0xff] %vm476_vm2, %v1387_v16  ;;  %v1963_v25 = vsel %vm924_vm3, %v6795_v5, -inf }
 0x5aa   :  { %v5334_v2 = vpop.f32.mrf.mxu1  ;;  %1964 = vmax.xlane.f32.xlu1 %v1963_v25 }
 0x5d3   :  { %v1647_v30 = vpop.f32.mrf.mxu0 }
 0x5d4   :  { %v1913_v48 = vmul.f32 0.35355338, %v1647_v30 }
 0x5d5   :  { %v5363_v14 = vpop.f32.mrf.mxu0 }
 0x5d6   :  { %v1932_v57 = vadd.f32 %v6779_v59, %v1913_v48 }
 0x5d7   :  { %v1650_v7 = vpop.f32.mrf.mxu0 }
 0x5d8   :  { %v1914_v31 = vmul.f32 0.35355338, %v1650_v7  ;;  %v6823_v36 = vadd.f32 %v1932_v57, %v6465_v62 }
 0x5d9   :  { %v1478_v12 = vpop.f32.mrf.mxu1  ;;  %v5364_v11 = vpop.f32.mrf.mxu0 }
 0x5da   :  { %v1933_v56 = vadd.f32 %v6785_v63, %v1914_v31  ;;  %1499 = vst.msk [vmem:[#allocation2 + $0x70] sm:$0xff] %vm476_vm2, %v1478_v12  ;;  %v1972_v14 = vsel %vm924_vm3, %v6823_v36, -inf }
 0x5db   :  { %v5345_v9 = vpop.f32.mrf.mxu1  ;;  %v1749_v34 = vpop.f32.mrf.mxu0 }
 0x5dc   :  { %v6803_v10 = vadd.f32 %v1933_v56, %v6481_v19  ;;  %v1917_v37 = vmul.f32 0.35355338, %v1749_v34  ;;  %v6839_v34 = vld [vmem:[%s8023_s1] sm:$0xff] }
 0x5dd   :  { %v1481_v58 = vpop.f32.mrf.mxu1  ;;  %v5375_v26 = vpop.f32.mrf.mxu0 }
 0x5de   :  { %1500 = vst.msk [vmem:[#allocation2 + $0x78] sm:$0xff] %vm476_vm2, %v1481_v58  ;;  %v1975_v6 = vsel %vm924_vm3, %v6803_v10, -inf  ;;  %v1936_v16 = vadd.f32 %v6779_v59, %v1917_v37  ;;  %v6847_v26 = vld [vmem:[%s8023_s1 + $0x8] sm:$0xff] }
 0x5df   :  { %v5346_v33 = vpop.f32.mrf.mxu1  ;;  %1976 = vmax.xlane.f32.xlu1 %v1975_v6  ;;  %v1752_v24 = vpop.f32.mrf.mxu0 }
 0x5e0   :  { %v1918_v21 = vmul.f32 0.35355338, %v1752_v24  ;;  %v6842_v58 = vadd.f32 %v6839_v34, %v1936_v16 }
 0x5e1   :  { %v1596_v44 = vpop.f32.mrf.mxu1  ;;  %v5376_v20 = vpop.f32.mrf.mxu0 }
 0x5e2   :  { %v1911_v38 = vmul.f32 0.35355338, %v1596_v44  ;;  %v1937_v25 = vadd.f32 %v6785_v63, %v1918_v21 }
 0x5e3   :  { %v5357_v28 = vpop.f32.mrf.mxu1  ;;  %v1851_v46 = vpop.f32.mrf.mxu0 }
 0x5e4   :  { %v1930_v8 = vadd.f32 %v6779_v59, %v1911_v38  ;;  %v1921_v56 = vmul.f32 0.35355338, %v1851_v46  ;;  %v6850_v6 = vadd.f32 %v6847_v26, %v1937_v25 }
 0x5e5   :  { %v1599_v50 = vpop.f32.mrf.mxu1  ;;  %v5387_v23 = vpop.f32.mrf.mxu0 }
 0x5e6   :  { %v1912_v35 = vmul.f32 0.35355338, %v1599_v50  ;;  %v6810_v29 = vadd.f32 %v1930_v8, %v6437_v40  ;;  %v1940_v46 = vadd.f32 %v6779_v59, %v1921_v56  ;;  %v1984_v8 = vsel %vm924_vm3, %v6842_v58, -inf }
 0x5e7   :  { %v5358_v43 = vpop.f32.mrf.mxu1  ;;  %v1854_v15 = vpop.f32.mrf.mxu0 }
 0x5e8   :  { %v1931_v18 = vadd.f32 %v6785_v63, %v1912_v35  ;;  %v1966_v17 = vsel %vm924_vm3, %v6810_v29, -inf  ;;  %v1922_v33 = vmul.f32 0.35355338, %v1854_v15  ;;  %v1987_v35 = vsel %vm924_vm3, %v6850_v6, -inf  ;;  %v6867_v43 = vld [vmem:[%s8023_s1 + $0x10] sm:$0xff] }
 0x5e9   :  { %1967 = vmax.xlane.f32.xlu0 %v1966_v17  ;;  %v1698_v60 = vpop.f32.mrf.mxu1  ;;  %v5388_v47 = vpop.f32.mrf.mxu0 }
 0x5ea   :  { %v1915_v53 = vmul.f32 0.35355338, %v1698_v60  ;;  %v6817_v52 = vadd.f32 %v1931_v18, %v6460_v61  ;;  %v1941_v50 = vadd.f32 %v6785_v63, %v1922_v33  ;;  %v6876_v47 = vadd.f32 %v1940_v46, %v6465_v62 }
 0x5eb   :  { %v5369_v40 = vpop.f32.mrf.mxu1 }
 0x5ec   :  { %v1934_v32 = vadd.f32 %v6779_v59, %v1915_v53  ;;  %v1969_v55 = vsel %vm924_vm3, %v6817_v52, -inf  ;;  %v6884_v40 = vadd.f32 %v1941_v50, %v6481_v19 }
 0x5ed   :  { %1970 = vmax.xlane.f32.xlu0 %v1969_v55  ;;  %v1701_v54 = vpop.f32.mrf.mxu1  ;;  %v1996_v55 = vsel %vm924_vm3, %v6876_v47, -inf }
 0x5ee   :  { %v1916_v22 = vmul.f32 0.35355338, %v1701_v54  ;;  %v6831_v7 = vadd.f32 %v1934_v32, %v6501_v39  ;;  %v1999_v62 = vsel %vm924_vm3, %v6884_v40, -inf }
 0x5ef   :  { %v5370_v2 = vpop.f32.mrf.mxu1 }
 0x5f0   :  { %v1935_v30 = vadd.f32 %v6785_v63, %v1916_v22  ;;  %v1978_v44 = vsel %vm924_vm3, %v6831_v7, -inf }
 0x5f1   :  { %1973 = vmax.xlane.f32.xlu0 %v1972_v14  ;;  %v1800_v31 = vpop.f32.mrf.mxu1 }
 0x5f2   :  { %v1919_v12 = vmul.f32 0.35355338, %v1800_v31  ;;  %v6834_v11 = vadd.f32 %v1935_v30, %v6506_v42 }
 0x5f3   :  { %v5381_v9 = vpop.f32.mrf.mxu1 }
 0x5f4   :  { %v1938_v24 = vadd.f32 %v6779_v59, %v1919_v12  ;;  %v1981_v20 = vsel %vm924_vm3, %v6834_v11, -inf }
 0x5f5   :  { %1979 = vmax.xlane.f32.xlu0 %v1978_v44  ;;  %1982 = vmax.xlane.f32.xlu1 %v1981_v20  ;;  %v1803_v38 = vpop.f32.mrf.mxu1 }
 0x5f6   :  { %v1920_v28 = vmul.f32 0.35355338, %v1803_v38  ;;  %v6870_v15 = vadd.f32 %v6867_v43, %v1938_v24 }
 0x5f7   :  { %v5382_v48 = vpop.f32.mrf.mxu1 }
 0x5f8   :  { %v1939_v23 = vadd.f32 %v6785_v63, %v1920_v28  ;;  %v1990_v37 = vsel %vm924_vm3, %v6870_v15, -inf }
 0x5f9   :  { %1985 = vmax.xlane.f32.xlu0 %v1984_v8  ;;  %1988 = vmax.xlane.f32.xlu1 %v1987_v35  ;;  %v1902_v57 = vpop.f32.mrf.mxu1 }
 0x5fa   :  { %v1923_v18 = vmul.f32 0.35355338, %v1902_v57  ;;  %v6873_v17 = vadd.f32 %v1939_v23, %v6460_v61 }
 0x5fb   :  { %v5393_v60 = vpop.f32.mrf.mxu1 }
 0x5fc   :  { %v1942_v53 = vadd.f32 %v6779_v59, %v1923_v18  ;;  %v1993_v21 = vsel %vm924_vm3, %v6873_v17, -inf }
 0x5fd   :  { %1991 = vmax.xlane.f32.xlu0 %v1990_v37  ;;  %1994 = vmax.xlane.f32.xlu1 %v1993_v21  ;;  %v1905_v32 = vpop.f32.mrf.mxu1 }
 0x5fe   :  { %v6891_v59 = vadd.f32 %v1942_v53, %v6501_v39  ;;  %v1924_v16 = vmul.f32 0.35355338, %v1905_v32 }
 0x5ff   :  { %v5394_v61 = vpop.f32.mrf.mxu1 }
 0x600   :  { %v2002_v54 = vsel %vm924_vm3, %v6891_v59, -inf  ;;  %v1943_v25 = vadd.f32 %v6785_v63, %v1924_v16 }
 0x601   :  { %1997 = vmax.xlane.f32.xlu0 %v1996_v55  ;;  %2000 = vmax.xlane.f32.xlu1 %v1999_v62 }
 0x602   :  { %v6905_v2 = vadd.f32 %v1943_v25, %v6506_v42 }
 0x604   :  { %v2005_v14 = vsel %vm924_vm3, %v6905_v2, -inf }
 0x605   :  { %2003 = vmax.xlane.f32.xlu0 %v2002_v54 }
 0x612   :  { %2191 = vrot.lane.b32.xlu1 %v6310_v45, %s5985_s12 }
 0x616   :  { %2238 = vrot.lane.b32.xlu1 %v6318_v27, %s5985_s12 }
 0x61a   :  { %2285 = vrot.lane.b32.xlu1 %v6322_v0, %s5985_s12 }
 0x61b   :  { %2144 = vrot.lane.b32.xlu0 %v6312_v13, %s5985_s12 }
 0x61e   :  { %2379 = vrot.lane.b32.xlu1 %v6328_v41, %s5985_s12 }
 0x61f   :  { %2332 = vrot.lane.b32.xlu0 %v6326_v1, %s5985_s12 }
 0x623   :  { %2426 = vrot.lane.b32.xlu0 %v6336_v51, %s5985_s12 }
 0x62f   :  { %v1962_v19 = vpop.xlane.xlu0 %1961 }
 0x630   :  { %v2008_v39 = vsub.f32 %v6788_v3, %v1962_v19 }
 0x632   :  { %v2024_v22 = vmul.f32 1.442695, %v2008_v39 }
 0x633   :  { %v1965_v3 = vpop.xlane.xlu1 %1964 }
 0x634   :  { %5775 = vpow2.f32 %v2024_v22  ;;  %v2009_v12 = vsub.f32 %v6795_v5, %v1965_v3 }
 0x636   :  { %v2026_v56 = vmul.f32 1.442695, %v2009_v12 }
 0x638   :  { %5777 = vpow2.f32 %v2026_v56 }
 0x641   :  { %v6907_v30 = vpop.eup %5775 }
 0x642   :  { %2006 = vmax.xlane.f32.xlu1 %v2005_v14  ;;  %v2056_v31 = vsel %vm924_vm3, %v6907_v30, 0.0 }
 0x643   :  { %2057 = vadd.xlane.f32.xlu0 %v2056_v31 }
 0x645   :  { %v6915_v9 = vpop.eup %5777 }
 0x646   :  { %v2059_v38 = vsel %vm924_vm3, %v6915_v9, 0.0 }
 0x653   :  { %2473 = vrot.lane.b32.xlu1 %v6334_v49, %s5985_s12 }
 0x668   :  { %v1977_v63 = vpop.xlane.xlu1 %1976 }
 0x669   :  { %v2013_v24 = vsub.f32 %v6803_v10, %v1977_v63 }
 0x66b   :  { %v2034_v5 = vmul.f32 1.442695, %v2013_v24 }
 0x672   :  { %v1968_v42 = vpop.xlane.xlu0 %1967 }
 0x673   :  { %v2010_v33 = vsub.f32 %v6810_v29, %v1968_v42 }
 0x675   :  { %v2028_v44 = vmul.f32 1.442695, %v2010_v33 }
 0x676   :  { %v1971_v20 = vpop.xlane.xlu0 %1970 }
 0x677   :  { %5779 = vpow2.f32 %v2028_v44  ;;  %v2011_v28 = vsub.f32 %v6817_v52, %v1971_v20  ;;  %2060 = vadd.xlane.f32.xlu1 %v2059_v38 }
 0x679   :  { %v2030_v46 = vmul.f32 1.442695, %v2011_v28 }
 0x67a   :  { %v1974_v48 = vpop.xlane.xlu0 %1973 }
 0x67b   :  { %5781 = vpow2.f32 %v2030_v46  ;;  %v2012_v8 = vsub.f32 %v6823_v36, %v1974_v48 }
 0x67c   :  { %5783 = vpow2.f32 %v2034_v5 }
 0x67d   :  { %v2032_v50 = vmul.f32 1.442695, %v2012_v8 }
 0x67e   :  { %v1983_v29 = vpop.xlane.xlu1 %1982  ;;  %v1980_v23 = vpop.xlane.xlu0 %1979 }
 0x67f   :  { %5785 = vpow2.f32 %v2032_v50  ;;  %v2015_v10 = vsub.f32 %v6834_v11, %v1983_v29  ;;  %v2014_v35 = vsub.f32 %v6831_v7, %v1980_v23 }
 0x681   :  { %v2038_v57 = vmul.f32 1.442695, %v2015_v10  ;;  %v2036_v18 = vmul.f32 1.442695, %v2014_v35 }
 0x682   :  { %v1989_v60 = vpop.xlane.xlu1 %1988  ;;  %v1986_v52 = vpop.xlane.xlu0 %1985 }
 0x683   :  { %5787 = vpow2.f32 %v2038_v57  ;;  %v2017_v53 = vsub.f32 %v6850_v6, %v1989_v60  ;;  %v2016_v37 = vsub.f32 %v6842_v58, %v1986_v52 }
 0x684   :  { %v6927_v21 = vpop.eup %5779  ;;  %5789 = vpow2.f32 %v2036_v18 }
 0x685   :  { %v2042_v36 = vmul.f32 1.442695, %v2017_v53  ;;  %v2040_v32 = vmul.f32 1.442695, %v2016_v37  ;;  %v2062_v61 = vsel %vm924_vm3, %v6927_v21, 0.0 }
 0x686   :  { %v1995_v11 = vpop.xlane.xlu1 %1994  ;;  %2063 = vadd.xlane.f32.xlu0 %v2062_v61  ;;  %v1992_v7 = vpop.xlane.xlu0 %1991 }
 0x687   :  { %5791 = vpow2.f32 %v2042_v36  ;;  %v2019_v55 = vsub.f32 %v6873_v17, %v1995_v11  ;;  %v2018_v62 = vsub.f32 %v6870_v15, %v1992_v7 }
 0x688   :  { %v6933_v54 = vpop.eup %5781  ;;  %5793 = vpow2.f32 %v2040_v32 }
 0x689   :  { %v2046_v58 = vmul.f32 1.442695, %v2019_v55  ;;  %v2044_v6 = vmul.f32 1.442695, %v2018_v62  ;;  %v2065_v19 = vsel %vm924_vm3, %v6933_v54, 0.0  ;;  %v6937_v39 = vpop.eup %5783 }
 0x68a   :  { %v2001_v22 = vpop.xlane.xlu1 %2000  ;;  %2066 = vadd.xlane.f32.xlu1 %v2065_v19  ;;  %v1998_v16 = vpop.xlane.xlu0 %1997  ;;  %v2071_v3 = vsel %vm924_vm3, %v6937_v39, 0.0 }
 0x68b   :  { %5795 = vpow2.f32 %v2046_v58  ;;  %v2021_v25 = vsub.f32 %v6884_v40, %v2001_v22  ;;  %v2020_v17 = vsub.f32 %v6876_v47, %v1998_v16 }
 0x68c   :  { %v6941_v14 = vpop.eup %5785  ;;  %5797 = vpow2.f32 %v2044_v6 }
 0x68d   :  { %v2050_v15 = vmul.f32 1.442695, %v2021_v25  ;;  %v2048_v31 = vmul.f32 1.442695, %v2020_v17  ;;  %v2068_v12 = vsel %vm924_vm3, %v6941_v14, 0.0 }
 0x68e   :  { %v2192_v56 = vpop.permute.xlu1 %2191  ;;  %2072 = vadd.xlane.f32.xlu1 %v2071_v3  ;;  %2069 = vadd.xlane.f32.xlu0 %v2068_v12  ;;  %v2004_v63 = vpop.xlane.xlu0 %2003 }
 0x68f   :  { %5799 = vpow2.f32 %v2050_v15  ;;  %v2022_v40 = vsub.f32 %v6891_v59, %v2004_v63  ;;  %5402 = vmatpush3.bf16.msra.mxu1 %v2192_v56 }
 0x690   :  { %v6948_v47 = vpop.eup %5787  ;;  %5801 = vpow2.f32 %v2048_v31  ;;  %5413 = vmatprep.subr.bf16.mxu1 %v8027_v4 }
 0x691   :  { %v6951_v42 = vpop.eup %5789  ;;  %v2052_v33 = vmul.f32 1.442695, %v2022_v40  ;;  %v2077_v24 = vsel %vm924_vm3, %v6948_v47, 0.0 }
 0x692   :  { %2078 = vadd.xlane.f32.xlu1 %v2077_v24  ;;  %v2074_v44 = vsel %vm924_vm3, %v6951_v42, 0.0  ;;  %v2145_v20 = vpop.permute.xlu0 %2144  ;;  %v2239_v60 = vpop.permute.xlu1 %2238 }
 0x693   :  { %5803 = vpow2.f32 %v2052_v33  ;;  %2075 = vadd.xlane.f32.xlu0 %v2074_v44  ;;  %5396 = vmatpush3.bf16.msra.mxu0 %v2145_v20 }
 0x694   :  { %v6957_v59 = vpop.eup %5791  ;;  %5407 = vmatprep.subr.bf16.mxu0 %v8027_v4 }
 0x695   :  { %v6960_v38 = vpop.eup %5793  ;;  %v2083_v28 = vsel %vm924_vm3, %v6957_v59, 0.0 }
 0x696   :  { %2084 = vadd.xlane.f32.xlu1 %v2083_v28  ;;  %v2080_v5 = vsel %vm924_vm3, %v6960_v38, 0.0  ;;  %v6992_v52 = vpop.permute.xlu1 %2285 }
 0x697   :  { %2081 = vadd.xlane.f32.xlu0 %v2080_v5 }
 0x698   :  { %v6966_v46 = vpop.eup %5795 }
 0x699   :  { %v6968_v48 = vpop.eup %5797  ;;  %v2089_v8 = vsel %vm924_vm3, %v6966_v46, 0.0 }
 0x69a   :  { %2090 = vadd.xlane.f32.xlu1 %v2089_v8  ;;  %v2086_v50 = vsel %vm924_vm3, %v6968_v48, 0.0  ;;  %v6998_v53 = vpop.permute.xlu1 %2379 }
 0x69b   :  { %2087 = vadd.xlane.f32.xlu0 %v2086_v50 }
 0x69c   :  { %v6974_v29 = vpop.eup %5799 }
 0x69d   :  { %v6976_v23 = vpop.eup %5801  ;;  %v2095_v10 = vsel %vm924_vm3, %v6974_v29, 0.0 }
 0x69e   :  { %2096 = vadd.xlane.f32.xlu1 %v2095_v10  ;;  %v2092_v35 = vsel %vm924_vm3, %v6976_v23, 0.0 }
 0x69f   :  { %2093 = vadd.xlane.f32.xlu0 %v2092_v35 }
 0x6a0   :  { %v6982_v57 = vpop.eup %5803 }
 0x6a1   :  { %v2098_v18 = vsel %vm924_vm3, %v6982_v57, 0.0 }
 0x6a3   :  { %2099 = vadd.xlane.f32.xlu0 %v2098_v18 }
 0x6af   :  { %2654 = vrot.lane.b32.xlu1 %v6310_v45, %s5986_s13 }
 0x6b9   :  { %2603 = vrot.lane.b32.xlu0 %v6312_v13, %s5986_s13 }
 0x6bd   :  { %2601 = vrot.lane.b32.xlu0 %v6312_v13, %s5987_s14 }
 0x6c1   :  { %2652 = vrot.lane.b32.xlu0 %v6310_v45, %s5987_s14 }
 0x6c5   :  { %2703 = vrot.lane.b32.xlu0 %v6318_v27, %s5987_s14 }
 0x6c9   :  { %2754 = vrot.lane.b32.xlu0 %v6322_v0, %s5987_s14 }
 0x6cb   :  { %v2007_v37 = vpop.xlane.xlu1 %2006 }
 0x6cc   :  { %v2023_v36 = vsub.f32 %v6905_v2, %v2007_v37  ;;  %v7015_v2 = vpop.permute.xlu0 %2332 }
 0x6cd   :  { %2805 = vrot.lane.b32.xlu0 %v6326_v1, %s5987_s14 }
 0x6ce   :  { %v2054_v32 = vmul.f32 1.442695, %v2023_v36 }
 0x6cf   :  { %v7023_v62 = vpop.permute.xlu1 %2473 }
 0x6d0   :  { %5805 = vpow2.f32 %v2054_v32  ;;  %v7019_v7 = vpop.permute.xlu0 %2426 }
 0x6d1   :  { %2856 = vrot.lane.b32.xlu0 %v6328_v41, %s5987_s14 }
 0x6d4   :  { %v2058_v55 = vpop.xlane.xlu0 %2057 }
 0x6d5   :  { %2907 = vrot.lane.b32.xlu0 %v6336_v51, %s5987_s14  ;;  %5807 = vrcp.f32 %v2058_v55 }
 0x6dd   :  { %v7009_v61 = vpop.eup %5805 }
 0x6de   :  { %v2101_v11 = vsel %vm924_vm3, %v7009_v61, 0.0 }
 0x6df   :  { %2102 = vadd.xlane.f32.xlu1 %v2101_v11 }
 0x6e2   :  { %v5808_v6 = vpop.eup %5807 }
 0x6e3   :  { %v2120_v16 = vmul.f32 %v5808_v6, %v6907_v30 }
 0x6f0   :  { %2705 = vrot.lane.b32.xlu1 %v6318_v27, %s5986_s13 }
 0x6f4   :  { %2756 = vrot.lane.b32.xlu1 %v6322_v0, %s5986_s13 }
 0x6f8   :  { %2807 = vrot.lane.b32.xlu1 %v6326_v1, %s5986_s13 }
 0x6fc   :  { %2858 = vrot.lane.b32.xlu1 %v6328_v41, %s5986_s13 }
 0x700   :  { %v2061_v58 = vpop.xlane.xlu1 %2060  ;;  %2909 = vrot.lane.b32.xlu1 %v6336_v51, %s5986_s13 }
 0x701   :  { %5809 = vrcp.f32 %v2061_v58 }
 0x704   :  { %2960 = vrot.lane.b32.xlu1 %v6334_v49, %s5986_s13 }
 0x708   :  { %2958 = vrot.lane.b32.xlu1 %v6334_v49, %s5987_s14 }
 0x70e   :  { %v5810_v19 = vpop.eup %5809 }
 0x70f   :  { %v2064_v22 = vpop.xlane.xlu0 %2063  ;;  %v2121_v25 = vmul.f32 %v5810_v19, %v6915_v9 }
 0x710   :  { %5811 = vrcp.f32 %v2064_v22 }
 0x711   :  { %v2136_v17 = vpack.c.bf16 %v2121_v25, %v2120_v16 }
 0x713   :  { %v2067_v15 = vpop.xlane.xlu1 %2066  ;;  %5398 = vmatmul.mubr.msk.bf16.vlgmr.msra.gmra.mxu0 %vm924_vm3, %v2136_v17 }
 0x714   :  { %5813 = vrcp.f32 %v2067_v15  ;;  %5408 = vmatpush3.bf16.msra.mxu0 %v2239_v60  ;;  %5409 = vmatprep.mubr.msk.bf16.mxu0 %vm5980_vm1, %v8027_v4 }
 0x715   :  { %5419 = vmatprep.subr.bf16.mxu0 %v8027_v4 }
 0x717   :  { %v2073_v31 = vpop.xlane.xlu1 %2072  ;;  %v2070_v3 = vpop.xlane.xlu0 %2069 }
 0x718   :  { %5815 = vrcp.f32 %v2073_v31 }
 0x719   :  { %5817 = vrcp.f32 %v2070_v3 }
 0x71b   :  { %v2079_v12 = vpop.xlane.xlu1 %2078 }
 0x71c   :  { %5819 = vrcp.f32 %v2079_v12  ;;  %v2076_v30 = vpop.xlane.xlu0 %2075 }
 0x71d   :  { %5821 = vrcp.f32 %v2076_v30  ;;  %v5812_v9 = vpop.eup %5811 }
 0x71e   :  { %v2122_v33 = vmul.f32 %v5812_v9, %v6927_v21 }
 0x71f   :  { %v2085_v56 = vpop.xlane.xlu1 %2084 }
 0x720   :  { %5823 = vrcp.f32 %v2085_v56  ;;  %v2082_v63 = vpop.xlane.xlu0 %2081 }
 0x721   :  { %v5814_v40 = vpop.eup %5813  ;;  %5825 = vrcp.f32 %v2082_v63 }
 0x722   :  { %v2123_v24 = vmul.f32 %v5814_v40, %v6933_v54 }
 0x723   :  { %v2091_v44 = vpop.xlane.xlu1 %2090 }
 0x724   :  { %5827 = vrcp.f32 %v2091_v44  ;;  %v2088_v20 = vpop.xlane.xlu0 %2087  ;;  %v2137_v28 = vpack.c.bf16 %v2123_v24, %v2122_v33 }
 0x725   :  { %v5816_v5 = vpop.eup %5815  ;;  %5829 = vrcp.f32 %v2088_v20 }
 0x726   :  { %v5818_v8 = vpop.eup %5817  ;;  %5404 = vmatmul.mubr.msk.bf16.vlgmr.msra.gmra.mxu1 %vm924_vm3, %v2137_v28  ;;  %v2125_v50 = vmul.f32 %v5816_v5, %v6937_v39 }
 0x727   :  { %5414 = vmatpush3.bf16.msra.mxu1 %v6992_v52  ;;  %v2097_v10 = vpop.xlane.xlu1 %2096  ;;  %v2124_v35 = vmul.f32 %v5818_v8, %v6941_v14  ;;  %5415 = vmatprep.mubr.msk.bf16.mxu1 %vm5980_vm1, %v8027_v4 }
 0x728   :  { %5831 = vrcp.f32 %v2097_v10  ;;  %v2094_v21 = vpop.xlane.xlu0 %2093  ;;  %5425 = vmatprep.subr.bf16.mxu1 %v8027_v4 }
 0x729   :  { %v5820_v54 = vpop.eup %5819  ;;  %5833 = vrcp.f32 %v2094_v21  ;;  %v2138_v18 = vpack.c.bf16 %v2125_v50, %v2124_v35 }
 0x72a   :  { %v5822_v60 = vpop.eup %5821  ;;  %v2127_v37 = vmul.f32 %v5820_v54, %v6948_v47 }
 0x72b   :  { %5410 = vmatmul.mubr.msk.bf16.vlgmr.msra.gmra.mxu0 %vm924_vm3, %v2138_v18  ;;  %v2126_v39 = vmul.f32 %v5822_v60, %v6951_v42 }
 0x72c   :  { %5420 = vmatpush3.bf16.msra.mxu0 %v7015_v2  ;;  %5421 = vmatprep.mubr.msk.bf16.mxu0 %vm5980_vm1, %v8027_v4  ;;  %v2100_v55 = vpop.xlane.xlu0 %2099 }
 0x72d   :  { %v5824_v14 = vpop.eup %5823  ;;  %v2139_v52 = vpack.c.bf16 %v2127_v37, %v2126_v39  ;;  %5431 = vmatprep.subr.bf16.mxu0 %v8027_v4  ;;  %5835 = vrcp.f32 %v2100_v55 }
 0x72e   :  { %v5826_v36 = vpop.eup %5825  ;;  %v2129_v32 = vmul.f32 %v5824_v14, %v6957_v59 }
 0x72f   :  { %5416 = vmatmul.mubr.msk.bf16.vlgmr.msra.gmra.mxu1 %vm924_vm3, %v2139_v52  ;;  %v2128_v47 = vmul.f32 %v5826_v36, %v6960_v38 }
 0x730   :  { %5426 = vmatpush3.bf16.msra.mxu1 %v6998_v53  ;;  %5427 = vmatprep.mubr.msk.bf16.mxu1 %vm5980_vm1, %v8027_v4  ;;  %v2604_v22 = vpop.permute.xlu0 %2603 }
 0x731   :  { %v5828_v42 = vpop.eup %5827  ;;  %v2140_v11 = vpack.c.bf16 %v2129_v32, %v2128_v47  ;;  %5437 = vmatprep.subr.bf16.mxu1 %v8027_v4 }
 0x732   :  { %v5830_v2 = vpop.eup %5829  ;;  %v2131_v58 = vmul.f32 %v5828_v42, %v6966_v46 }
 0x733   :  { %5422 = vmatmul.mubr.msk.bf16.vlgmr.msra.gmra.mxu0 %vm924_vm3, %v2140_v11  ;;  %v2130_v59 = vmul.f32 %v5830_v2, %v6968_v48 }
 0x734   :  { %5432 = vmatpush3.bf16.msra.mxu0 %v7019_v7  ;;  %5433 = vmatprep.mubr.msk.bf16.mxu0 %vm5980_vm1, %v8027_v4  ;;  %v2609_v7 = vsel %vm476_vm2, %v2604_v22, 0 }
 0x735   :  { %v5832_v38 = vpop.eup %5831  ;;  %v2141_v53 = vpack.c.bf16 %v2131_v58, %v2130_v59  ;;  %5443 = vmatprep.subr.bf16.mxu0 %v8027_v4 }
 0x736   :  { %v5834_v6 = vpop.eup %5833  ;;  %v2133_v19 = vmul.f32 %v5832_v38, %v6974_v29  ;;  %v2602_v29 = vpop.permute.xlu0 %2601 }
 0x737   :  { %5428 = vmatmul.mubr.msk.bf16.vlgmr.msra.gmra.mxu1 %vm924_vm3, %v2141_v53  ;;  %v2132_v46 = vmul.f32 %v5834_v6, %v6976_v23  ;;  %v2655_v23 = vpop.permute.xlu1 %2654 }
 0x738   :  { %5438 = vmatpush3.bf16.msra.mxu1 %v7023_v62  ;;  %5439 = vmatprep.mubr.msk.bf16.mxu1 %vm5980_vm1, %v8027_v4  ;;  %v2660_v20 = vsel %vm476_vm2, %v2655_v23, 0 }
 0x739   :  { %v2142_v48 = vpack.c.bf16 %v2133_v19, %v2132_v46  ;;  %5449 = vmatprep.subr.bf16.mxu1 %v8027_v4 }
 0x73a   :  { %v2653_v62 = vpop.permute.xlu0 %2652  ;;  %v5836_v12 = vpop.eup %5835 }
 0x73b   :  { %5434 = vmatmul.mubr.msk.bf16.vlgmr.msra.gmra.mxu0 %vm924_vm3, %v2142_v48  ;;  %v2134_v63 = vmul.f32 %v5836_v12, %v6982_v57 }
 0x73c   :  { %5444 = vmatpush3.bf16.xpose.msra.mxu0 %v2609_v7  ;;  %5445 = vmatprep.mubr.msk.bf16.mxu0 %vm5980_vm1, %v8027_v4 }
 0x73d   :  { %5455 = vmatprep.subr.bf16.mxu0 %v8027_v4 }
 0x73e   :  { %v2704_v25 = vpop.permute.xlu0 %2703 }
 0x742   :  { %v2755_v3 = vpop.permute.xlu0 %2754 }
 0x743   :  { %5446 = vmatmul.mubr.msk.bf16.vlgmr.msra.gmra.mxu0 %vm476_vm2, %v2602_v29 }
 0x744   :  { %5457 = vmatprep.mubr.msk.bf16.mxu0 %vm5980_vm1, %v8027_v4 }
 0x746   :  { %v2806_v33 = vpop.permute.xlu0 %2805 }
 0x74a   :  { %v2857_v57 = vpop.permute.xlu0 %2856 }
 0x74e   :  { %v2908_v8 = vpop.permute.xlu0 %2907 }
 0x768   :  { %v2103_v16 = vpop.xlane.xlu1 %2102 }
 0x769   :  { %5837 = vrcp.f32 %v2103_v16 }
 0x76c   :  { %v2706_v17 = vpop.permute.xlu1 %2705 }
 0x76d   :  { %v2711_v15 = vsel %vm476_vm2, %v2706_v17, 0  ;;  %v7155_v17 = vld [vmem:[%s8022_s6 + $0x20] sm:$0xff] }
 0x76e   :  { %5456 = vmatpush3.bf16.xpose.msra.mxu0 %v2711_v15 }
 0x76f   :  { %5467 = vmatprep.subr.bf16.mxu0 %v8027_v4 }
 0x770   :  { %v2757_v31 = vpop.permute.xlu1 %2756 }
 0x774   :  { %v2808_v30 = vpop.permute.xlu1 %2807 }
 0x775   :  { %v2813_v9 = vsel %vm476_vm2, %v2808_v30, 0  ;;  %5458 = vmatmul.mubr.msk.bf16.vlgmr.msra.gmra.mxu0 %vm476_vm2, %v2704_v25  ;;  %v7161_v30 = vld [vmem:[%s8022_s6 + $0x28] sm:$0xff] }
 0x776   :  { %v5838_v56 = vpop.eup %5837  ;;  %5468 = vmatpush3.bf16.xpose.msra.mxu0 %v2813_v9  ;;  %5469 = vmatprep.mubr.msk.bf16.mxu0 %vm5980_vm1, %v8027_v4 }
 0x777   :  { %v2135_v40 = vmul.f32 %v5838_v56, %v7009_v61  ;;  %5479 = vmatprep.subr.bf16.mxu0 %v8027_v4  ;;  %v2762_v61 = vsel %vm476_vm2, %v2757_v31, 0 }
 0x778   :  { %v2859_v24 = vpop.permute.xlu1 %2858 }
 0x779   :  { %v2143_v44 = vpack.c.bf16 %v2135_v40, %v2134_v63  ;;  %v2864_v50 = vsel %vm476_vm2, %v2859_v24, 0 }
 0x77b   :  { %5440 = vmatmul.mubr.msk.bf16.vlgmr.msra.gmra.mxu1 %vm924_vm3, %v2143_v44 }
 0x77c   :  { %5450 = vmatpush3.bf16.xpose.msra.mxu1 %v2660_v20  ;;  %v2910_v28 = vpop.permute.xlu1 %2909  ;;  %5451 = vmatprep.mubr.msk.bf16.mxu1 %vm5980_vm1, %v8027_v4 }
 0x77d   :  { %v2915_v5 = vsel %vm476_vm2, %v2910_v28, 0  ;;  %5470 = vmatmul.mubr.msk.bf16.vlgmr.msra.gmra.mxu0 %vm476_vm2, %v2806_v33  ;;  %5461 = vmatprep.subr.bf16.mxu1 %v8027_v4 }
 0x77e   :  { %5480 = vmatpush3.bf16.xpose.msra.mxu0 %v2915_v5  ;;  %5481 = vmatprep.mubr.msk.bf16.mxu0 %vm5980_vm1, %v8027_v4 }
 0x77f   :  { %5491 = vmatprep.subr.bf16.mxu0 %v8027_v4 }
 0x780   :  { %v2961_v10 = vpop.permute.xlu1 %2960 }
 0x781   :  { %v2966_v35 = vsel %vm476_vm2, %v2961_v10, 0 }
 0x783   :  { %5452 = vmatmul.mubr.msk.bf16.vlgmr.msra.gmra.mxu1 %vm476_vm2, %v2653_v62 }
 0x784   :  { %5462 = vmatpush3.bf16.xpose.msra.mxu1 %v2762_v61  ;;  %5463 = vmatprep.mubr.msk.bf16.mxu1 %vm5980_vm1, %v8027_v4  ;;  %v2959_v21 = vpop.permute.xlu1 %2958 }
 0x785   :  { %5482 = vmatmul.mubr.msk.bf16.vlgmr.msra.gmra.mxu0 %vm476_vm2, %v2908_v8  ;;  %5473 = vmatprep.subr.bf16.mxu1 %v8027_v4 }
 0x786   :  { %5493 = vmatprep.mubr.msk.bf16.mxu0 %vm5980_vm1, %v8027_v4 }
 0x78b   :  { %5464 = vmatmul.mubr.msk.bf16.vlgmr.msra.gmra.mxu1 %vm476_vm2, %v2755_v3 }
 0x78c   :  { %5474 = vmatpush3.bf16.xpose.msra.mxu1 %v2864_v50  ;;  %5475 = vmatprep.mubr.msk.bf16.mxu1 %vm5980_vm1, %v8027_v4 }
 0x78d   :  { %5485 = vmatprep.subr.bf16.mxu1 %v8027_v4 }
 0x793   :  { %5476 = vmatmul.mubr.msk.bf16.vlgmr.msra.gmra.mxu1 %vm476_vm2, %v2857_v57 }
 0x794   :  { %5486 = vmatpush3.bf16.xpose.msra.mxu1 %v2966_v35  ;;  %5487 = vmatprep.mubr.msk.bf16.mxu1 %vm5980_vm1, %v8027_v4 }
 0x795   :  { %5497 = vmatprep.subr.bf16.mxu1 %v8027_v4 }
 0x79b   :  { %5488 = vmatmul.mubr.msk.bf16.vlgmr.msra.gmra.mxu1 %vm476_vm2, %v2959_v21  ;;  %v7180_v21 = vld [vmem:[%s8023_s1 + $0x28] sm:$0xff] }
 0x79c   :  { %5499 = vmatprep.mubr.msk.bf16.mxu1 %vm5980_vm1, %v8027_v4 }
 0x7d3   :  { %v7124_v54 = vpop.f32.mrf.mxu0 }
 0x7d5   :  { %v5399_v18 = vpop.f32.mrf.mxu0 }
 0x7d7   :  { %v7126_v60 = vpop.f32.mrf.mxu0 }
 0x7d9   :  { %v5400_v37 = vpop.f32.mrf.mxu0 }
 0x7e6   :  { %v7128_v39 = vpop.f32.mrf.mxu1 }
 0x7e8   :  { %v5405_v14 = vpop.f32.mrf.mxu1 }
 0x7ea   :  { %v7130_v52 = vpop.f32.mrf.mxu1 }
 0x7eb   :  { %v7132_v36 = vpop.f32.mrf.mxu0 }
 0x7ec   :  { %v5406_v32 = vpop.f32.mrf.mxu1 }
 0x7ed   :  { %v5411_v47 = vpop.f32.mrf.mxu0 }
 0x7ef   :  { %v7134_v42 = vpop.f32.mrf.mxu0  ;;  %v7136_v11 = vpop.f32.mrf.mxu1 }
 0x7f1   :  { %v5412_v2 = vpop.f32.mrf.mxu0  ;;  %v5417_v55 = vpop.f32.mrf.mxu1 }
 0x7f3   :  { %v7138_v58 = vpop.f32.mrf.mxu1  ;;  %v7140_v59 = vpop.f32.mrf.mxu0 }
 0x7f5   :  { %v5418_v38 = vpop.f32.mrf.mxu1  ;;  %v5423_v53 = vpop.f32.mrf.mxu0 }
 0x7f7   :  { %v7142_v6 = vpop.f32.mrf.mxu0  ;;  %v7144_v19 = vpop.f32.mrf.mxu1 }
 0x7f8   :  { %8029 = vst [vmem:[#allocation3_spill] sm:$0xff] %v7142_v6 }
 0x7f9   :  { %v5424_v46 = vpop.f32.mrf.mxu0  ;;  %v5429_v22 = vpop.f32.mrf.mxu1 }
 0x7fb   :  { %v7146_v48 = vpop.f32.mrf.mxu1  ;;  %v7148_v7 = vpop.f32.mrf.mxu0 }
 0x7fc   :  { %8030 = vst [vmem:[#allocation4_spill] sm:$0xff] %v7146_v48 }
 0x7fd   :  { %v5430_v29 = vpop.f32.mrf.mxu1  ;;  %v5435_v23 = vpop.f32.mrf.mxu0 }
 0x7ff   :  { %v7150_v62 = vpop.f32.mrf.mxu0 }
 0x800   :  { %8031 = vst [vmem:[#allocation5_spill] sm:$0xff] %v7150_v62 }
 0x801   :  { %v5436_v16 = vpop.f32.mrf.mxu0 }
 0x803   :  { %v2645_v25 = vpop.f32.mrf.mxu0 }
 0x804   :  { %v3009_v15 = vmul.f32 0.35355338, %v2645_v25 }
 0x805   :  { %v5447_v31 = vpop.f32.mrf.mxu0 }
 0x806   :  { %v3028_v3 = vadd.f32 %v7155_v17, %v3009_v15 }
 0x807   :  { %v2648_v12 = vpop.f32.mrf.mxu0 }
 0x808   :  { %v3010_v9 = vmul.f32 0.35355338, %v2648_v12  ;;  %v7164_v56 = vadd.f32 %v6839_v34, %v3028_v3 }
 0x809   :  { %v5448_v63 = vpop.f32.mrf.mxu0 }
 0x80a   :  { %v3029_v40 = vadd.f32 %v7161_v30, %v3010_v9  ;;  %v3060_v33 = vsel %vm924_vm3, %v7164_v56, -inf }
 0x80b   :  { %3061 = vmax.xlane.f32.xlu0 %v3060_v33 }
 0x80c   :  { %v7170_v24 = vadd.f32 %v6847_v26, %v3029_v40 }
 0x80e   :  { %v3063_v44 = vsel %vm924_vm3, %v7170_v24, -inf }
 0x80f   :  { %3064 = vmax.xlane.f32.xlu1 %v3063_v44 }
 0x835   :  { %v2747_v20 = vpop.f32.mrf.mxu0 }
 0x836   :  { %v3013_v29 = vmul.f32 0.35355338, %v2747_v20 }
 0x837   :  { %v5459_v28 = vpop.f32.mrf.mxu0 }
 0x838   :  { %v3032_v9 = vadd.f32 %v7155_v17, %v3013_v29  ;;  %v7200_v28 = vld [vmem:[%s8023_s1 + $0x18] sm:$0xff] }
 0x839   :  { %v2750_v5 = vpop.f32.mrf.mxu0 }
 0x83a   :  { %v3014_v57 = vmul.f32 0.35355338, %v2750_v5 }
 0x83b   :  { %v7174_v61 = vpop.f32.mrf.mxu1  ;;  %v5460_v8 = vpop.f32.mrf.mxu0 }
 0x83c   :  { %v3033_v50 = vadd.f32 %v7161_v30, %v3014_v57 }
 0x83d   :  { %v5441_v10 = vpop.f32.mrf.mxu1  ;;  %v2849_v35 = vpop.f32.mrf.mxu0 }
 0x83e   :  { %v7183_v18 = vadd.f32 %v7180_v21, %v3033_v50  ;;  %v3017_v57 = vmul.f32 0.35355338, %v2849_v35 }
 0x83f   :  { %v7185_v37 = vpop.f32.mrf.mxu1  ;;  %v5471_v14 = vpop.f32.mrf.mxu0 }
 0x840   :  { %8032 = vst [vmem:[#allocation6_spill] sm:$0xff] %v7185_v37  ;;  %v3075_v32 = vsel %vm924_vm3, %v7183_v18, -inf  ;;  %v3036_v35 = vadd.f32 %v7155_v17, %v3017_v57 }
 0x841   :  { %v5442_v47 = vpop.f32.mrf.mxu1  ;;  %3076 = vmax.xlane.f32.xlu1 %v3075_v32  ;;  %v2852_v2 = vpop.f32.mrf.mxu0  ;;  %v7211_v32 = vld [vmem:[%s8023_s1 + $0x20] sm:$0xff] }
 0x842   :  { %v3018_v8 = vmul.f32 0.35355338, %v2852_v2  ;;  %v7214_v47 = vadd.f32 %v7211_v32, %v3032_v9 }
 0x843   :  { %v2696_v55 = vpop.f32.mrf.mxu1  ;;  %v5472_v38 = vpop.f32.mrf.mxu0 }
 0x844   :  { %v3011_v53 = vmul.f32 0.35355338, %v2696_v55  ;;  %v3037_v2 = vadd.f32 %v7161_v30, %v3018_v8  ;;  %v3072_v29 = vsel %vm924_vm3, %v7214_v47, -inf }
 0x845   :  { %v5453_v46 = vpop.f32.mrf.mxu1  ;;  %v2951_v22 = vpop.f32.mrf.mxu0 }
 0x846   :  { %v3030_v23 = vadd.f32 %v7155_v17, %v3011_v53 }
 0x847   :  { %v2699_v16 = vpop.f32.mrf.mxu1  ;;  %v5483_v25 = vpop.f32.mrf.mxu0 }
 0x848   :  { %v3012_v15 = vmul.f32 0.35355338, %v2699_v16  ;;  %v7191_v31 = vadd.f32 %v6867_v43, %v3030_v23  ;;  %v7224_v23 = vld [vmem:[%s8023_s1 + $0x30] sm:$0xff] }
 0x849   :  { %v5454_v3 = vpop.f32.mrf.mxu1  ;;  %v2954_v12 = vpop.f32.mrf.mxu0 }
 0x84a   :  { %v3031_v63 = vadd.f32 %v7161_v30, %v3012_v15  ;;  %v3066_v40 = vsel %vm924_vm3, %v7191_v31, -inf  ;;  %v7232_v3 = vld [vmem:[%s8023_s1 + $0x38] sm:$0xff] }
 0x84b   :  { %3067 = vmax.xlane.f32.xlu0 %v3066_v40  ;;  %v2798_v33 = vpop.f32.mrf.mxu1  ;;  %v5484_v44 = vpop.f32.mrf.mxu0 }
 0x84c   :  { %v3015_v20 = vmul.f32 0.35355338, %v2798_v33  ;;  %v7203_v5 = vadd.f32 %v7200_v28, %v3031_v63  ;;  %v3021_v63 = vmul.f32 0.35355338, %v2951_v22  ;;  %v7238_v33 = vadd.f32 %v6839_v34, %v3036_v35 }
 0x84d   :  { %v5465_v50 = vpop.f32.mrf.mxu1  ;;  %v7241_v44 = vadd.f32 %v6847_v26, %v3037_v2 }
 0x84e   :  { %v3034_v10 = vadd.f32 %v7155_v17, %v3015_v20  ;;  %v3069_v14 = vsel %vm924_vm3, %v7203_v5, -inf  ;;  %v3022_v20 = vmul.f32 0.35355338, %v2954_v12  ;;  %v3084_v26 = vsel %vm924_vm3, %v7238_v33, -inf }
 0x84f   :  { %3070 = vmax.xlane.f32.xlu0 %v3069_v14  ;;  %v2801_v55 = vpop.f32.mrf.mxu1  ;;  %v3040_v14 = vadd.f32 %v7155_v17, %v3021_v63 }
 0x850   :  { %v3016_v38 = vmul.f32 0.35355338, %v2801_v55  ;;  %v7227_v16 = vadd.f32 %v7224_v23, %v3034_v10  ;;  %v3041_v12 = vadd.f32 %v7161_v30, %v3022_v20 }
 0x851   :  { %v5466_v53 = vpop.f32.mrf.mxu1 }
 0x852   :  { %v3035_v46 = vadd.f32 %v7161_v30, %v3016_v38  ;;  %v3078_v8 = vsel %vm924_vm3, %v7227_v16, -inf  ;;  %v3087_v38 = vsel %vm924_vm3, %v7241_v44, -inf }
 0x853   :  { %3073 = vmax.xlane.f32.xlu0 %v3072_v29  ;;  %v2900_v25 = vpop.f32.mrf.mxu1 }
 0x854   :  { %v3019_v15 = vmul.f32 0.35355338, %v2900_v25  ;;  %v7235_v9 = vadd.f32 %v7232_v3, %v3035_v46  ;;  %v7262_v25 = vadd.f32 %v7211_v32, %v3040_v14 }
 0x855   :  { %v5477_v40 = vpop.f32.mrf.mxu1 }
 0x856   :  { %v3038_v57 = vadd.f32 %v7155_v17, %v3019_v15  ;;  %v3081_v50 = vsel %vm924_vm3, %v7235_v9, -inf  ;;  %v7270_v40 = vadd.f32 %v7180_v21, %v3041_v12 }
 0x857   :  { %3079 = vmax.xlane.f32.xlu0 %v3078_v8  ;;  %3082 = vmax.xlane.f32.xlu1 %v3081_v50  ;;  %v2903_v10 = vpop.f32.mrf.mxu1  ;;  %v3096_v8 = vsel %vm924_vm3, %v7262_v25, -inf }
 0x858   :  { %v3020_v22 = vmul.f32 0.35355338, %v2903_v10  ;;  %v7256_v35 = vadd.f32 %v6867_v43, %v3038_v57  ;;  %v3099_v50 = vsel %vm924_vm3, %v7270_v40, -inf }
 0x859   :  { %v5478_v34 = vpop.f32.mrf.mxu1 }
 0x85a   :  { %v3039_v55 = vadd.f32 %v7161_v30, %v3020_v22  ;;  %v3090_v63 = vsel %vm924_vm3, %v7256_v35, -inf }
 0x85b   :  { %3085 = vmax.xlane.f32.xlu0 %v3084_v26  ;;  %3088 = vmax.xlane.f32.xlu1 %v3087_v38  ;;  %v3002_v2 = vpop.f32.mrf.mxu1 }
 0x85c   :  { %v3023_v53 = vmul.f32 0.35355338, %v3002_v2  ;;  %v7259_v46 = vadd.f32 %v7200_v28, %v3039_v55 }
 0x85d   :  { %v5489_v29 = vpop.f32.mrf.mxu1 }
 0x85e   :  { %v3042_v15 = vadd.f32 %v7155_v17, %v3023_v53  ;;  %v3093_v43 = vsel %vm924_vm3, %v7259_v46, -inf }
 0x85f   :  { %3091 = vmax.xlane.f32.xlu0 %v3090_v63  ;;  %3094 = vmax.xlane.f32.xlu1 %v3093_v43  ;;  %v3005_v20 = vpop.f32.mrf.mxu1 }
 0x860   :  { %v7277_v17 = vadd.f32 %v7224_v23, %v3042_v15  ;;  %v3024_v34 = vmul.f32 0.35355338, %v3005_v20 }
 0x861   :  { %v5490_v57 = vpop.f32.mrf.mxu1 }
 0x862   :  { %v3102_v10 = vsel %vm924_vm3, %v7277_v17, -inf  ;;  %v3043_v12 = vadd.f32 %v7161_v30, %v3024_v34 }
 0x863   :  { %3097 = vmax.xlane.f32.xlu0 %v3096_v8  ;;  %3100 = vmax.xlane.f32.xlu1 %v3099_v50 }
 0x864   :  { %v7291_v55 = vadd.f32 %v7232_v3, %v3043_v12 }
 0x866   :  { %v3105_v38 = vsel %vm924_vm3, %v7291_v55, -inf }
 0x867   :  { %3103 = vmax.xlane.f32.xlu0 %v3102_v10 }
 0x874   :  { %3291 = vrot.lane.b32.xlu1 %v6310_v45, %s5988_s3 }
 0x878   :  { %3338 = vrot.lane.b32.xlu1 %v6318_v27, %s5988_s3 }
 0x87c   :  { %3385 = vrot.lane.b32.xlu1 %v6322_v0, %s5988_s3 }
 0x87d   :  { %3244 = vrot.lane.b32.xlu0 %v6312_v13, %s5988_s3 }
 0x880   :  { %3479 = vrot.lane.b32.xlu1 %v6328_v41, %s5988_s3 }
 0x881   :  { %3432 = vrot.lane.b32.xlu0 %v6326_v1, %s5988_s3 }
 0x885   :  { %3526 = vrot.lane.b32.xlu0 %v6336_v51, %s5988_s3 }
 0x894   :  { %v3062_v22 = vpop.xlane.xlu0 %3061 }
 0x895   :  { %v3108_v14 = vsub.f32 %v7164_v56, %v3062_v22 }
 0x897   :  { %v3124_v26 = vmul.f32 1.442695, %v3108_v14 }
 0x898   :  { %v3065_v56 = vpop.xlane.xlu1 %3064 }
 0x899   :  { %5839 = vpow2.f32 %v3124_v26  ;;  %v3109_v29 = vsub.f32 %v7170_v24, %v3065_v56 }
 0x89b   :  { %v3126_v15 = vmul.f32 1.442695, %v3109_v29 }
 0x89d   :  { %5841 = vpow2.f32 %v3126_v15 }
 0x8a4   :  { %3106 = vmax.xlane.f32.xlu1 %v3105_v38 }
 0x8a6   :  { %v7295_v2 = vpop.eup %5839 }
 0x8a7   :  { %v3156_v53 = vsel %vm924_vm3, %v7295_v2, 0.0 }
 0x8a8   :  { %3157 = vadd.xlane.f32.xlu0 %v3156_v53 }
 0x8aa   :  { %v7301_v43 = vpop.eup %5841 }
 0x8ab   :  { %v3159_v10 = vsel %vm924_vm3, %v7301_v43, 0.0 }
 0x8b5   :  { %3573 = vrot.lane.b32.xlu1 %v6334_v49, %s5988_s3 }
 0x8ca   :  { %v3077_v30 = vpop.xlane.xlu1 %3076 }
 0x8cb   :  { %v3113_v57 = vsub.f32 %v7183_v18, %v3077_v30 }
 0x8cd   :  { %v3134_v24 = vmul.f32 1.442695, %v3113_v57 }
 0x8d4   :  { %v3068_v63 = vpop.xlane.xlu0 %3067 }
 0x8d5   :  { %v3110_v20 = vsub.f32 %v7191_v31, %v3068_v63 }
 0x8d7   :  { %v3128_v8 = vmul.f32 1.442695, %v3110_v20 }
 0x8d8   :  { %v3071_v50 = vpop.xlane.xlu0 %3070 }
 0x8d9   :  { %5843 = vpow2.f32 %v3128_v8  ;;  %v3111_v22 = vsub.f32 %v7203_v5, %v3071_v50  ;;  %3160 = vadd.xlane.f32.xlu1 %v3159_v10 }
 0x8db   :  { %v3130_v14 = vmul.f32 1.442695, %v3111_v22 }
 0x8dc   :  { %v3074_v34 = vpop.xlane.xlu0 %3073 }
 0x8dd   :  { %5845 = vpow2.f32 %v3130_v14  ;;  %v3112_v26 = vsub.f32 %v7214_v47, %v3074_v34 }
 0x8de   :  { %5847 = vpow2.f32 %v3134_v24 }
 0x8df   :  { %v3132_v12 = vmul.f32 1.442695, %v3112_v26 }
 0x8e0   :  { %v3083_v31 = vpop.xlane.xlu1 %3082  ;;  %v3080_v38 = vpop.xlane.xlu0 %3079 }
 0x8e1   :  { %5849 = vpow2.f32 %v3132_v12  ;;  %v3115_v18 = vsub.f32 %v7235_v9, %v3083_v31  ;;  %v3114_v53 = vsub.f32 %v7227_v16, %v3080_v38 }
 0x8e3   :  { %v3138_v56 = vmul.f32 1.442695, %v3115_v18  ;;  %v3136_v29 = vmul.f32 1.442695, %v3114_v53 }
 0x8e4   :  { %v3089_v15 = vpop.xlane.xlu1 %3088  ;;  %v3086_v5 = vpop.xlane.xlu0 %3085 }
 0x8e5   :  { %5851 = vpow2.f32 %v3138_v56  ;;  %v3117_v30 = vsub.f32 %v7241_v44, %v3089_v15  ;;  %v3116_v63 = vsub.f32 %v7238_v33, %v3086_v5 }
 0x8e6   :  { %v7313_v20 = vpop.eup %5843  ;;  %5853 = vpow2.f32 %v3136_v29 }
 0x8e7   :  { %v3142_v47 = vmul.f32 1.442695, %v3117_v30  ;;  %v3140_v57 = vmul.f32 1.442695, %v3116_v63  ;;  %v3162_v8 = vsel %vm924_vm3, %v7313_v20, 0.0 }
 0x8e8   :  { %v3095_v9 = vpop.xlane.xlu1 %3094  ;;  %3163 = vadd.xlane.f32.xlu0 %v3162_v8  ;;  %v3092_v16 = vpop.xlane.xlu0 %3091 }
 0x8e9   :  { %5855 = vpow2.f32 %v3142_v47  ;;  %v3119_v50 = vsub.f32 %v7259_v46, %v3095_v9  ;;  %v3118_v10 = vsub.f32 %v7256_v35, %v3092_v16 }
 0x8ea   :  { %v7319_v22 = vpop.eup %5845  ;;  %5857 = vpow2.f32 %v3140_v57 }
 0x8eb   :  { %v3146_v33 = vmul.f32 1.442695, %v3119_v50  ;;  %v3144_v44 = vmul.f32 1.442695, %v3118_v10  ;;  %v3165_v24 = vsel %vm924_vm3, %v7319_v22, 0.0  ;;  %v7323_v14 = vpop.eup %5847 }
 0x8ec   :  { %v3101_v34 = vpop.xlane.xlu1 %3100  ;;  %3166 = vadd.xlane.f32.xlu1 %v3165_v24  ;;  %v3098_v26 = vpop.xlane.xlu0 %3097  ;;  %v3171_v18 = vsel %vm924_vm3, %v7323_v14, 0.0 }
 0x8ed   :  { %5859 = vpow2.f32 %v3146_v33  ;;  %v3121_v12 = vsub.f32 %v7270_v40, %v3101_v34  ;;  %v3120_v46 = vsub.f32 %v7262_v25, %v3098_v26 }
 0x8ee   :  { %v7327_v31 = vpop.eup %5849  ;;  %5861 = vpow2.f32 %v3144_v44 }
 0x8ef   :  { %v3150_v35 = vmul.f32 1.442695, %v3121_v12  ;;  %v3148_v38 = vmul.f32 1.442695, %v3120_v46  ;;  %v3168_v53 = vsel %vm924_vm3, %v7327_v31, 0.0 }
 0x8f0   :  { %v3292_v56 = vpop.permute.xlu1 %3291  ;;  %3172 = vadd.xlane.f32.xlu1 %v3171_v18  ;;  %3169 = vadd.xlane.f32.xlu0 %v3168_v53  ;;  %v3104_v29 = vpop.xlane.xlu0 %3103 }
 0x8f1   :  { %5863 = vpow2.f32 %v3150_v35  ;;  %v3122_v40 = vsub.f32 %v7277_v17, %v3104_v29  ;;  %5498 = vmatpush3.bf16.msra.mxu1 %v3292_v56 }
 0x8f2   :  { %v7334_v25 = vpop.eup %5851  ;;  %5865 = vpow2.f32 %v3148_v38  ;;  %5509 = vmatprep.subr.bf16.mxu1 %v8027_v4 }
 0x8f3   :  { %v7337_v15 = vpop.eup %5853  ;;  %v3152_v5 = vmul.f32 1.442695, %v3122_v40  ;;  %v3177_v30 = vsel %vm924_vm3, %v7334_v25, 0.0 }
 0x8f4   :  { %3178 = vadd.xlane.f32.xlu1 %v3177_v30  ;;  %v3174_v63 = vsel %vm924_vm3, %v7337_v15, 0.0  ;;  %v3245_v47 = vpop.permute.xlu0 %3244  ;;  %v3339_v35 = vpop.permute.xlu1 %3338 }
 0x8f5   :  { %5867 = vpow2.f32 %v3152_v5  ;;  %3175 = vadd.xlane.f32.xlu0 %v3174_v63  ;;  %5492 = vmatpush3.bf16.msra.mxu0 %v3245_v47 }
 0x8f6   :  { %v7343_v17 = vpop.eup %5855  ;;  %5503 = vmatprep.subr.bf16.mxu0 %v8027_v4 }
 0x8f7   :  { %v7346_v57 = vpop.eup %5857  ;;  %v3183_v8 = vsel %vm924_vm3, %v7343_v17, 0.0 }
 0x8f8   :  { %3184 = vadd.xlane.f32.xlu1 %v3183_v8  ;;  %v3180_v9 = vsel %vm924_vm3, %v7346_v57, 0.0  ;;  %v7378_v38 = vpop.permute.xlu1 %3385 }
 0x8f9   :  { %3181 = vadd.xlane.f32.xlu0 %v3180_v9 }
 0x8fa   :  { %v7352_v16 = vpop.eup %5859 }
 0x8fb   :  { %v7354_v50 = vpop.eup %5861  ;;  %v3189_v10 = vsel %vm924_vm3, %v7352_v16, 0.0 }
 0x8fc   :  { %3190 = vadd.xlane.f32.xlu1 %v3189_v10  ;;  %v3186_v33 = vsel %vm924_vm3, %v7354_v50, 0.0  ;;  %v7384_v18 = vpop.permute.xlu1 %3479 }
 0x8fd   :  { %3187 = vadd.xlane.f32.xlu0 %v3186_v33 }
 0x8fe   :  { %v7360_v44 = vpop.eup %5863 }
 0x8ff   :  { %v7362_v24 = vpop.eup %5865  ;;  %v3195_v34 = vsel %vm924_vm3, %v7360_v44, 0.0 }
 0x900   :  { %3196 = vadd.xlane.f32.xlu1 %v3195_v34  ;;  %v3192_v26 = vsel %vm924_vm3, %v7362_v24, 0.0 }
 0x901   :  { %3193 = vadd.xlane.f32.xlu0 %v3192_v26 }
 0x902   :  { %v7368_v12 = vpop.eup %5867 }
 0x903   :  { %v3198_v46 = vsel %vm924_vm3, %v7368_v12, 0.0 }
 0x905   :  { %3199 = vadd.xlane.f32.xlu0 %v3198_v46 }
 0x911   :  { %3754 = vrot.lane.b32.xlu1 %v6310_v45, %s5989_s5 }
 0x91b   :  { %3703 = vrot.lane.b32.xlu0 %v6312_v13, %s5989_s5 }
 0x91f   :  { %3701 = vrot.lane.b32.xlu0 %v6312_v13, %s5990_s26 }
 0x923   :  { %3752 = vrot.lane.b32.xlu0 %v6310_v45, %s5990_s26 }
 0x927   :  { %3803 = vrot.lane.b32.xlu0 %v6318_v27, %s5990_s26 }
 0x92b   :  { %3854 = vrot.lane.b32.xlu0 %v6322_v0, %s5990_s26 }
 0x92d   :  { %v3107_v53 = vpop.xlane.xlu1 %3106 }
 0x92e   :  { %v3123_v56 = vsub.f32 %v7291_v55, %v3107_v53  ;;  %v7401_v55 = vpop.permute.xlu0 %3432 }
 0x92f   :  { %3905 = vrot.lane.b32.xlu0 %v6326_v1, %s5990_s26 }
 0x930   :  { %v3154_v29 = vmul.f32 1.442695, %v3123_v56 }
 0x931   :  { %v7409_v47 = vpop.permute.xlu1 %3573 }
 0x932   :  { %5869 = vpow2.f32 %v3154_v29  ;;  %v7405_v30 = vpop.permute.xlu0 %3526 }
 0x933   :  { %3956 = vrot.lane.b32.xlu0 %v6328_v41, %s5990_s26 }
 0x936   :  { %v3158_v63 = vpop.xlane.xlu0 %3157 }
 0x937   :  { %4007 = vrot.lane.b32.xlu0 %v6336_v51, %s5990_s26  ;;  %5871 = vrcp.f32 %v3158_v63 }
 0x93f   :  { %v7395_v40 = vpop.eup %5869 }
 0x940   :  { %v3201_v5 = vsel %vm924_vm3, %v7395_v40, 0.0 }
 0x941   :  { %3202 = vadd.xlane.f32.xlu1 %v3201_v5 }
 0x944   :  { %v5872_v9 = vpop.eup %5871 }
 0x945   :  { %v3220_v34 = vmul.f32 %v5872_v9, %v7295_v2 }
 0x952   :  { %3805 = vrot.lane.b32.xlu1 %v6318_v27, %s5989_s5 }
 0x956   :  { %3856 = vrot.lane.b32.xlu1 %v6322_v0, %s5989_s5 }
 0x95a   :  { %3907 = vrot.lane.b32.xlu1 %v6326_v1, %s5989_s5 }
 0x95e   :  { %3958 = vrot.lane.b32.xlu1 %v6328_v41, %s5989_s5 }
 0x962   :  { %v3161_v8 = vpop.xlane.xlu1 %3160  ;;  %4009 = vrot.lane.b32.xlu1 %v6336_v51, %s5989_s5 }
 0x963   :  { %5873 = vrcp.f32 %v3161_v8 }
 0x966   :  { %4060 = vrot.lane.b32.xlu1 %v6334_v49, %s5989_s5 }
 0x96a   :  { %4058 = vrot.lane.b32.xlu1 %v6334_v49, %s5990_s26 }
 0x970   :  { %v5874_v10 = vpop.eup %5873 }
 0x971   :  { %v3164_v33 = vpop.xlane.xlu0 %3163  ;;  %v3221_v26 = vmul.f32 %v5874_v10, %v7301_v43 }
 0x972   :  { %5875 = vrcp.f32 %v3164_v33 }
 0x973   :  { %v3236_v46 = vpack.c.bf16 %v3221_v26, %v3220_v34 }
 0x975   :  { %v3167_v53 = vpop.xlane.xlu1 %3166  ;;  %5494 = vmatmul.mubr.msk.bf16.vlgmr.msra.gmra.mxu0 %vm924_vm3, %v3236_v46 }
 0x976   :  { %5877 = vrcp.f32 %v3167_v53  ;;  %5504 = vmatpush3.bf16.msra.mxu0 %v3339_v35  ;;  %5505 = vmatprep.mubr.msk.bf16.mxu0 %vm5980_vm1, %v8027_v4 }
 0x977   :  { %5515 = vmatprep.subr.bf16.mxu0 %v8027_v4 }
 0x979   :  { %v3173_v56 = vpop.xlane.xlu1 %3172  ;;  %v3170_v29 = vpop.xlane.xlu0 %3169 }
 0x97a   :  { %5879 = vrcp.f32 %v3173_v56 }
 0x97b   :  { %5881 = vrcp.f32 %v3170_v29 }
 0x97d   :  { %v3179_v5 = vpop.xlane.xlu1 %3178 }
 0x97e   :  { %5883 = vrcp.f32 %v3179_v5  ;;  %v3176_v2 = vpop.xlane.xlu0 %3175 }
 0x97f   :  { %5885 = vrcp.f32 %v3176_v2  ;;  %v5876_v43 = vpop.eup %5875 }
 0x980   :  { %v3222_v35 = vmul.f32 %v5876_v43, %v7313_v20 }
 0x981   :  { %v3185_v63 = vpop.xlane.xlu1 %3184 }
 0x982   :  { %5887 = vrcp.f32 %v3185_v63  ;;  %v3182_v8 = vpop.xlane.xlu0 %3181 }
 0x983   :  { %v5878_v9 = vpop.eup %5877  ;;  %5889 = vrcp.f32 %v3182_v8 }
 0x984   :  { %v3223_v10 = vmul.f32 %v5878_v9, %v7319_v22 }
 0x985   :  { %v3191_v33 = vpop.xlane.xlu1 %3190 }
 0x986   :  { %5891 = vrcp.f32 %v3191_v33  ;;  %v3188_v34 = vpop.xlane.xlu0 %3187  ;;  %v3237_v26 = vpack.c.bf16 %v3223_v10, %v3222_v35 }
 0x987   :  { %v5880_v46 = vpop.eup %5879  ;;  %5893 = vrcp.f32 %v3188_v34 }
 0x988   :  { %v5882_v53 = vpop.eup %5881  ;;  %5500 = vmatmul.mubr.msk.bf16.vlgmr.msra.gmra.mxu1 %vm924_vm3, %v3237_v26  ;;  %v3225_v56 = vmul.f32 %v5880_v46, %v7323_v14 }
 0x989   :  { %5510 = vmatpush3.bf16.msra.mxu1 %v7378_v38  ;;  %v3197_v29 = vpop.xlane.xlu1 %3196  ;;  %v3224_v5 = vmul.f32 %v5882_v53, %v7327_v31  ;;  %5511 = vmatprep.mubr.msk.bf16.mxu1 %vm5980_vm1, %v8027_v4 }
 0x98a   :  { %5895 = vrcp.f32 %v3197_v29  ;;  %v3194_v20 = vpop.xlane.xlu0 %3193  ;;  %5521 = vmatprep.subr.bf16.mxu1 %v8027_v4 }
 0x98b   :  { %v5884_v22 = vpop.eup %5883  ;;  %5897 = vrcp.f32 %v3194_v20  ;;  %v3238_v2 = vpack.c.bf16 %v3225_v56, %v3224_v5 }
 0x98c   :  { %v5886_v43 = vpop.eup %5885  ;;  %v3227_v63 = vmul.f32 %v5884_v22, %v7334_v25 }
 0x98d   :  { %5506 = vmatmul.mubr.msk.bf16.vlgmr.msra.gmra.mxu0 %vm924_vm3, %v3238_v2  ;;  %v3226_v14 = vmul.f32 %v5886_v43, %v7337_v15 }
 0x98e   :  { %5516 = vmatpush3.bf16.msra.mxu0 %v7401_v55  ;;  %5517 = vmatprep.mubr.msk.bf16.mxu0 %vm5980_vm1, %v8027_v4  ;;  %v3200_v10 = vpop.xlane.xlu0 %3199 }
 0x98f   :  { %v5888_v31 = vpop.eup %5887  ;;  %v3239_v38 = vpack.c.bf16 %v3227_v63, %v3226_v14  ;;  %5527 = vmatprep.subr.bf16.mxu0 %v8027_v4  ;;  %5899 = vrcp.f32 %v3200_v10 }
 0x990   :  { %v5890_v8 = vpop.eup %5889  ;;  %v3229_v9 = vmul.f32 %v5888_v31, %v7343_v17 }
 0x991   :  { %5512 = vmatmul.mubr.msk.bf16.vlgmr.msra.gmra.mxu1 %vm924_vm3, %v3239_v38  ;;  %v3228_v25 = vmul.f32 %v5890_v8, %v7346_v57 }
 0x992   :  { %5522 = vmatpush3.bf16.msra.mxu1 %v7384_v18  ;;  %5523 = vmatprep.mubr.msk.bf16.mxu1 %vm5980_vm1, %v8027_v4  ;;  %v3704_v46 = vpop.permute.xlu0 %3703 }
 0x993   :  { %v5892_v15 = vpop.eup %5891  ;;  %v3240_v55 = vpack.c.bf16 %v3229_v9, %v3228_v25  ;;  %5533 = vmatprep.subr.bf16.mxu1 %v8027_v4 }
 0x994   :  { %v5894_v35 = vpop.eup %5893  ;;  %v3231_v33 = vmul.f32 %v5892_v15, %v7352_v16 }
 0x995   :  { %5518 = vmatmul.mubr.msk.bf16.vlgmr.msra.gmra.mxu0 %vm924_vm3, %v3240_v55  ;;  %v3230_v17 = vmul.f32 %v5894_v35, %v7354_v50 }
 0x996   :  { %5528 = vmatpush3.bf16.msra.mxu0 %v7405_v30  ;;  %5529 = vmatprep.mubr.msk.bf16.mxu0 %vm5980_vm1, %v8027_v4  ;;  %v3709_v30 = vsel %vm476_vm2, %v3704_v46, 0 }
 0x997   :  { %v5896_v57 = vpop.eup %5895  ;;  %v3241_v18 = vpack.c.bf16 %v3231_v33, %v3230_v17  ;;  %5539 = vmatprep.subr.bf16.mxu0 %v8027_v4 }
 0x998   :  { %v5898_v34 = vpop.eup %5897  ;;  %v3233_v26 = vmul.f32 %v5896_v57, %v7360_v44  ;;  %v3702_v44 = vpop.permute.xlu0 %3701 }
 0x999   :  { %5524 = vmatmul.mubr.msk.bf16.vlgmr.msra.gmra.mxu1 %vm924_vm3, %v3241_v18  ;;  %v3232_v16 = vmul.f32 %v5898_v34, %v7362_v24  ;;  %v3755_v24 = vpop.permute.xlu1 %3754 }
 0x99a   :  { %5534 = vmatpush3.bf16.msra.mxu1 %v7409_v47  ;;  %5535 = vmatprep.mubr.msk.bf16.mxu1 %vm5980_vm1, %v8027_v4  ;;  %v3760_v15 = vsel %vm476_vm2, %v3755_v24, 0 }
 0x99b   :  { %v3242_v50 = vpack.c.bf16 %v3233_v26, %v3232_v16  ;;  %5545 = vmatprep.subr.bf16.mxu1 %v8027_v4 }
 0x99c   :  { %v3753_v47 = vpop.permute.xlu0 %3752  ;;  %v5900_v2 = vpop.eup %5899 }
 0x99d   :  { %5530 = vmatmul.mubr.msk.bf16.vlgmr.msra.gmra.mxu0 %vm924_vm3, %v3242_v50  ;;  %v3234_v31 = vmul.f32 %v5900_v2, %v7368_v12 }
 0x99e   :  { %5540 = vmatpush3.bf16.xpose.msra.mxu0 %v3709_v30  ;;  %5541 = vmatprep.mubr.msk.bf16.mxu0 %vm5980_vm1, %v8027_v4 }
 0x99f   :  { %5551 = vmatprep.subr.bf16.mxu0 %v8027_v4 }
 0x9a0   :  { %v3804_v56 = vpop.permute.xlu0 %3803 }
 0x9a4   :  { %v3855_v22 = vpop.permute.xlu0 %3854 }
 0x9a5   :  { %5542 = vmatmul.mubr.msk.bf16.vlgmr.msra.gmra.mxu0 %vm476_vm2, %v3702_v44 }
 0x9a6   :  { %5553 = vmatprep.mubr.msk.bf16.mxu0 %vm5980_vm1, %v8027_v4 }
 0x9a8   :  { %v3906_v8 = vpop.permute.xlu0 %3905 }
 0x9ac   :  { %v3957_v12 = vpop.permute.xlu0 %3956 }
 0x9b0   :  { %v4008_v10 = vpop.permute.xlu0 %4007 }
 0x9ca   :  { %v3203_v53 = vpop.xlane.xlu1 %3202 }
 0x9cb   :  { %5901 = vrcp.f32 %v3203_v53 }
 0x9ce   :  { %v3806_v29 = vpop.permute.xlu1 %3805 }
 0x9cf   :  { %v3811_v5 = vsel %vm476_vm2, %v3806_v29, 0 }
 0x9d0   :  { %5552 = vmatpush3.bf16.xpose.msra.mxu0 %v3811_v5 }
 0x9d1   :  { %5563 = vmatprep.subr.bf16.mxu0 %v8027_v4 }
 0x9d2   :  { %v3857_v20 = vpop.permute.xlu1 %3856 }
 0x9d6   :  { %v3908_v43 = vpop.permute.xlu1 %3907 }
 0x9d7   :  { %v3913_v63 = vsel %vm476_vm2, %v3908_v43, 0  ;;  %5554 = vmatmul.mubr.msk.bf16.vlgmr.msra.gmra.mxu0 %vm476_vm2, %v3804_v56 }
 0x9d8   :  { %v5902_v14 = vpop.eup %5901  ;;  %5564 = vmatpush3.bf16.xpose.msra.mxu0 %v3913_v63  ;;  %5565 = vmatprep.mubr.msk.bf16.mxu0 %vm5980_vm1, %v8027_v4 }
 0x9d9   :  { %v3235_v38 = vmul.f32 %v5902_v14, %v7395_v40  ;;  %5575 = vmatprep.subr.bf16.mxu0 %v8027_v4  ;;  %v3862_v40 = vsel %vm476_vm2, %v3857_v20, 0 }
 0x9da   :  { %v3959_v9 = vpop.permute.xlu1 %3958 }
 0x9db   :  { %v3243_v25 = vpack.c.bf16 %v3235_v38, %v3234_v31  ;;  %v3964_v33 = vsel %vm476_vm2, %v3959_v9, 0 }
 0x9dd   :  { %5536 = vmatmul.mubr.msk.bf16.vlgmr.msra.gmra.mxu1 %vm924_vm3, %v3243_v25 }
 0x9de   :  { %5546 = vmatpush3.bf16.xpose.msra.mxu1 %v3760_v15  ;;  %v4010_v55 = vpop.permute.xlu1 %4009  ;;  %5547 = vmatprep.mubr.msk.bf16.mxu1 %vm5980_vm1, %v8027_v4 }
 0x9df   :  { %v4015_v35 = vsel %vm476_vm2, %v4010_v55, 0  ;;  %5566 = vmatmul.mubr.msk.bf16.vlgmr.msra.gmra.mxu0 %vm476_vm2, %v3906_v8  ;;  %5557 = vmatprep.subr.bf16.mxu1 %v8027_v4 }
 0x9e0   :  { %5576 = vmatpush3.bf16.xpose.msra.mxu0 %v4015_v35  ;;  %5577 = vmatprep.mubr.msk.bf16.mxu0 %vm5980_vm1, %v8027_v4 }
 0x9e1   :  { %5587 = vmatprep.subr.bf16.mxu0 %v8027_v4 }
 0x9e2   :  { %v4061_v17 = vpop.permute.xlu1 %4060 }
 0x9e3   :  { %v4066_v57 = vsel %vm476_vm2, %v4061_v17, 0 }
 0x9e5   :  { %5548 = vmatmul.mubr.msk.bf16.vlgmr.msra.gmra.mxu1 %vm476_vm2, %v3753_v47 }
 0x9e6   :  { %5558 = vmatpush3.bf16.xpose.msra.mxu1 %v3862_v40  ;;  %5559 = vmatprep.mubr.msk.bf16.mxu1 %vm5980_vm1, %v8027_v4  ;;  %v4059_v18 = vpop.permute.xlu1 %4058 }
 0x9e7   :  { %5578 = vmatmul.mubr.msk.bf16.vlgmr.msra.gmra.mxu0 %vm476_vm2, %v4008_v10  ;;  %5569 = vmatprep.subr.bf16.mxu1 %v8027_v4  ;;  %v7541_v10 = vld [vmem:[%s8022_s6 + $0x30] sm:$0xff] }
 0x9e8   :  { %5589 = vmatprep.mubr.msk.bf16.mxu0 %vm5980_vm1, %v8027_v4 }
 0x9ed   :  { %5560 = vmatmul.mubr.msk.bf16.vlgmr.msra.gmra.mxu1 %vm476_vm2, %v3855_v22 }
 0x9ee   :  { %5570 = vmatpush3.bf16.xpose.msra.mxu1 %v3964_v33  ;;  %5571 = vmatprep.mubr.msk.bf16.mxu1 %vm5980_vm1, %v8027_v4 }
 0x9ef   :  { %5581 = vmatprep.subr.bf16.mxu1 %v8027_v4 }
 0x9f5   :  { %5572 = vmatmul.mubr.msk.bf16.vlgmr.msra.gmra.mxu1 %vm476_vm2, %v3957_v12 }
 0x9f6   :  { %5582 = vmatpush3.bf16.xpose.msra.mxu1 %v4066_v57  ;;  %5583 = vmatprep.mubr.msk.bf16.mxu1 %vm5980_vm1, %v8027_v4 }
 0x9f7   :  { %5593 = vmatprep.subr.bf16.mxu1 %v8027_v4 }
 0x9fd   :  { %5584 = vmatmul.mubr.msk.bf16.vlgmr.msra.gmra.mxu1 %vm476_vm2, %v4059_v18 }
 0x9fe   :  { %5595 = vmatprep.mubr.msk.bf16.mxu1 %vm5980_vm1, %v8027_v4 }
 0xa35   :  { %v7510_v34 = vpop.f32.mrf.mxu0 }
 0xa37   :  { %v5495_v26 = vpop.f32.mrf.mxu0 }
 0xa38   :  { %v7547_v26 = vld [vmem:[%s8022_s6 + $0x38] sm:$0xff] }
 0xa39   :  { %v7512_v16 = vpop.f32.mrf.mxu0 }
 0xa3b   :  { %v5496_v46 = vpop.f32.mrf.mxu0 }
 0xa48   :  { %v7514_v50 = vpop.f32.mrf.mxu1 }
 0xa4a   :  { %v5501_v30 = vpop.f32.mrf.mxu1 }
 0xa4b   :  { %v7552_v30 = vld [vmem:[%s8023_s1] sm:$0xff] }
 0xa4c   :  { %v7516_v44 = vpop.f32.mrf.mxu1 }
 0xa4d   :  { %v7518_v24 = vpop.f32.mrf.mxu0 }
 0xa4e   :  { %v5502_v47 = vpop.f32.mrf.mxu1 }
 0xa4f   :  { %v5507_v53 = vpop.f32.mrf.mxu0 }
 0xa51   :  { %v7520_v56 = vpop.f32.mrf.mxu0  ;;  %v7522_v29 = vpop.f32.mrf.mxu1 }
 0xa53   :  { %v5508_v5 = vpop.f32.mrf.mxu0  ;;  %v5513_v20 = vpop.f32.mrf.mxu1 }
 0xa55   :  { %v7524_v22 = vpop.f32.mrf.mxu1  ;;  %v7526_v2 = vpop.f32.mrf.mxu0 }
 0xa57   :  { %v5514_v43 = vpop.f32.mrf.mxu1  ;;  %v5519_v63 = vpop.f32.mrf.mxu0 }
 0xa58   :  { %v7563_v43 = vld [vmem:[%s8023_s1 + $0x8] sm:$0xff] }
 0xa59   :  { %v7528_v14 = vpop.f32.mrf.mxu0  ;;  %v7530_v31 = vpop.f32.mrf.mxu1 }
 0xa5a   :  { %8033 = vst [vmem:[#allocation7_spill] sm:$0xff] %v7528_v14 }
 0xa5b   :  { %v5520_v38 = vpop.f32.mrf.mxu0  ;;  %v5525_v8 = vpop.f32.mrf.mxu1 }
 0xa5d   :  { %v7532_v9 = vpop.f32.mrf.mxu1  ;;  %v7534_v25 = vpop.f32.mrf.mxu0 }
 0xa5e   :  { %8034 = vst [vmem:[#allocation8_spill] sm:$0xff] %v7532_v9 }
 0xa5f   :  { %v5526_v15 = vpop.f32.mrf.mxu1  ;;  %v5531_v55 = vpop.f32.mrf.mxu0 }
 0xa61   :  { %v7536_v35 = vpop.f32.mrf.mxu0 }
 0xa62   :  { %8035 = vst [vmem:[#allocation9_spill] sm:$0xff] %v7536_v35 }
 0xa63   :  { %v5532_v12 = vpop.f32.mrf.mxu0 }
 0xa65   :  { %v3745_v40 = vpop.f32.mrf.mxu0 }
 0xa66   :  { %v4109_v33 = vmul.f32 0.35355338, %v3745_v40 }
 0xa67   :  { %v5543_v17 = vpop.f32.mrf.mxu0 }
 0xa68   :  { %v4128_v57 = vadd.f32 %v7541_v10, %v4109_v33 }
 0xa69   :  { %v3748_v18 = vpop.f32.mrf.mxu0 }
 0xa6a   :  { %v4110_v46 = vmul.f32 0.35355338, %v3748_v18  ;;  %v7555_v47 = vadd.f32 %v7552_v30, %v4128_v57 }
 0xa6b   :  { %v5544_v53 = vpop.f32.mrf.mxu0 }
 0xa6c   :  { %v4129_v5 = vadd.f32 %v7547_v26, %v4110_v46  ;;  %v4160_v20 = vsel %vm924_vm3, %v7555_v47, -inf }
 0xa6d   :  { %4161 = vmax.xlane.f32.xlu0 %v4160_v20 }
 0xa6e   :  { %v7566_v63 = vadd.f32 %v7563_v43, %v4129_v5 }
 0xa70   :  { %v4163_v38 = vsel %vm924_vm3, %v7566_v63, -inf }
 0xa71   :  { %4164 = vmax.xlane.f32.xlu1 %v4163_v38 }
 0xa97   :  { %v3847_v8 = vpop.f32.mrf.mxu0 }
 0xa99   :  { %v5555_v15 = vpop.f32.mrf.mxu0 }
 0xa9b   :  { %v3850_v55 = vpop.f32.mrf.mxu0 }
 0xa9c   :  { %v4114_v12 = vmul.f32 0.35355338, %v3850_v55 }
 0xa9d   :  { %v7570_v40 = vpop.f32.mrf.mxu1  ;;  %v5556_v33 = vpop.f32.mrf.mxu0 }
 0xa9e   :  { %v4133_v17 = vadd.f32 %v7547_v26, %v4114_v12  ;;  %v4113_v12 = vmul.f32 0.35355338, %v3847_v8 }
 0xa9f   :  { %v5537_v57 = vpop.f32.mrf.mxu1  ;;  %v3949_v18 = vpop.f32.mrf.mxu0 }
 0xaa0   :  { %v7574_v46 = vadd.f32 %v7180_v21, %v4133_v17  ;;  %v4132_v9 = vadd.f32 %v7541_v10, %v4113_v12 }
 0xaa1   :  { %v7576_v53 = vpop.f32.mrf.mxu1  ;;  %v5567_v5 = vpop.f32.mrf.mxu0 }
 0xaa2   :  { %8036 = vst [vmem:[#allocation10_spill] sm:$0xff] %v7576_v53  ;;  %v4175_v20 = vsel %vm924_vm3, %v7574_v46, -inf  ;;  %v5977_v5 = vld [vmem:[%s8023_s1 + $0x10] sm:$0xff] }
 0xaa3   :  { %v5538_v38 = vpop.f32.mrf.mxu1  ;;  %4176 = vmax.xlane.f32.xlu1 %v4175_v20  ;;  %v3952_v15 = vpop.f32.mrf.mxu0 }
 0xaa4   :  { %v4118_v14 = vmul.f32 0.35355338, %v3952_v15 }
 0xaa5   :  { %v3796_v55 = vpop.f32.mrf.mxu1  ;;  %v5568_v4 = vpop.f32.mrf.mxu0 }
 0xaa6   :  { %v4111_v35 = vmul.f32 0.35355338, %v3796_v55 }
 0xaa7   :  { %v5549_v33 = vpop.f32.mrf.mxu1  ;;  %v4051_v37 = vpop.f32.mrf.mxu0 }
 0xaa8   :  { %v4130_v57 = vadd.f32 %v7541_v10, %v4111_v35 }
 0xaa9   :  { %v3799_v62 = vpop.f32.mrf.mxu1  ;;  %v5579_v21 = vpop.f32.mrf.mxu0 }
 0xaaa   :  { %v4112_v17 = vmul.f32 0.35355338, %v3799_v62  ;;  %v7584_v53 = vadd.f32 %v5977_v5, %v4130_v57  ;;  %v4117_v21 = vmul.f32 0.35355338, %v3949_v18 }
 0xaab   :  { %v5550_v38 = vpop.f32.mrf.mxu1  ;;  %v4054_v20 = vpop.f32.mrf.mxu0 }
 0xaac   :  { %v4131_v4 = vadd.f32 %v7547_v26, %v4112_v17  ;;  %v4166_v8 = vsel %vm924_vm3, %v7584_v53, -inf  ;;  %v7597_v17 = vadd.f32 %v7211_v32, %v4132_v9 }
 0xaad   :  { %4167 = vmax.xlane.f32.xlu0 %v4166_v8  ;;  %v3898_v35 = vpop.f32.mrf.mxu1  ;;  %v5580_v55 = vpop.f32.mrf.mxu0 }
 0xaae   :  { %v4115_v33 = vmul.f32 0.35355338, %v3898_v35  ;;  %v7591_v62 = vadd.f32 %v7200_v28, %v4131_v4  ;;  %v4136_v55 = vadd.f32 %v7541_v10, %v4117_v21  ;;  %v4137_v35 = vadd.f32 %v7547_v26, %v4118_v14 }
 0xaaf   :  { %v5561_v57 = vpop.f32.mrf.mxu1  ;;  %v4172_v15 = vsel %vm924_vm3, %v7597_v17, -inf }
 0xab0   :  { %v4134_v38 = vadd.f32 %v7541_v10, %v4115_v33  ;;  %v4169_v12 = vsel %vm924_vm3, %v7591_v62, -inf  ;;  %v7611_v21 = vadd.f32 %v7552_v30, %v4136_v55  ;;  %v7614_v14 = vadd.f32 %v7563_v43, %v4137_v35 }
 0xab1   :  { %4170 = vmax.xlane.f32.xlu0 %v4169_v12  ;;  %v3901_v48 = vpop.f32.mrf.mxu1 }
 0xab2   :  { %v4116_v8 = vmul.f32 0.35355338, %v3901_v48  ;;  %v7605_v33 = vadd.f32 %v7224_v23, %v4134_v38  ;;  %v4121_v48 = vmul.f32 0.35355338, %v4051_v37  ;;  %v4184_v43 = vsel %vm924_vm3, %v7611_v21, -inf }
 0xab3   :  { %v5562_v4 = vpop.f32.mrf.mxu1  ;;  %v4187_v35 = vsel %vm924_vm3, %v7614_v14, -inf }
 0xab4   :  { %v4135_v18 = vadd.f32 %v7547_v26, %v4116_v8  ;;  %v4122_v8 = vmul.f32 0.35355338, %v4054_v20  ;;  %v4178_v38 = vsel %vm924_vm3, %v7605_v33, -inf }
 0xab5   :  { %4173 = vmax.xlane.f32.xlu0 %v4172_v15  ;;  %v4000_v57 = vpop.f32.mrf.mxu1 }
 0xab6   :  { %v4119_v9 = vmul.f32 0.35355338, %v4000_v57  ;;  %v7608_v12 = vadd.f32 %v7232_v3, %v4135_v18  ;;  %v4141_v20 = vadd.f32 %v7547_v26, %v4122_v8 }
 0xab7   :  { %v5573_v6 = vpop.f32.mrf.mxu1 }
 0xab8   :  { %v4138_v4 = vadd.f32 %v7541_v10, %v4119_v9  ;;  %v4181_v15 = vsel %vm924_vm3, %v7608_v12, -inf  ;;  %v4140_v6 = vadd.f32 %v7541_v10, %v4121_v48 }
 0xab9   :  { %4179 = vmax.xlane.f32.xlu0 %v4178_v38  ;;  %4182 = vmax.xlane.f32.xlu1 %v4181_v15  ;;  %v4003_v18 = vpop.f32.mrf.mxu1 }
 0xaba   :  { %v4120_v37 = vmul.f32 0.35355338, %v4003_v18  ;;  %v7628_v57 = vadd.f32 %v5977_v5, %v4138_v4  ;;  %v7634_v18 = vadd.f32 %v7211_v32, %v4140_v6  ;;  %v5978_v4 = vld [vmem:[%s8023_s1 + $0x28] sm:$0xff]  ;;  %s5991_s1 = smov 40  }
 0xabb   :  { %v5574_v30 = vpop.f32.mrf.mxu1 }
 0xabc   :  { %v4139_v55 = vadd.f32 %v7547_v26, %v4120_v37  ;;  %v4190_v37 = vsel %vm924_vm3, %v7628_v57, -inf  ;;  %v7644_v30 = vadd.f32 %v5978_v4, %v4141_v20  ;;  %v4196_v32 = vsel %vm924_vm3, %v7634_v18, -inf }
 0xabd   :  { %4185 = vmax.xlane.f32.xlu0 %v4184_v43  ;;  %4188 = vmax.xlane.f32.xlu1 %v4187_v35  ;;  %v4102_v9 = vpop.f32.mrf.mxu1 }
 0xabe   :  { %v4123_v38 = vmul.f32 0.35355338, %v4102_v9  ;;  %v7631_v15 = vadd.f32 %v7200_v28, %v4139_v55 }
 0xabf   :  { %v5585_v48 = vpop.f32.mrf.mxu1 }
 0xac0   :  { %v4142_v8 = vadd.f32 %v7541_v10, %v4123_v38  ;;  %v4193_v5 = vsel %vm924_vm3, %v7631_v15, -inf  ;;  %v4199_v10 = vsel %vm924_vm3, %v7644_v30, -inf }
 0xac1   :  { %4191 = vmax.xlane.f32.xlu0 %v4190_v37  ;;  %4194 = vmax.xlane.f32.xlu1 %v4193_v5  ;;  %v4105_v28 = vpop.f32.mrf.mxu1 }
 0xac2   :  { %v7651_v6 = vadd.f32 %v7224_v23, %v4142_v8  ;;  %v4124_v23 = vmul.f32 0.35355338, %v4105_v28 }
 0xac3   :  { %v5586_v43 = vpop.f32.mrf.mxu1 }
 0xac4   :  { %v4202_v55 = vsel %vm924_vm3, %v7651_v6, -inf  ;;  %v4143_v9 = vadd.f32 %v7547_v26, %v4124_v23 }
 0xac5   :  { %4197 = vmax.xlane.f32.xlu0 %v4196_v32  ;;  %4200 = vmax.xlane.f32.xlu1 %v4199_v10 }
 0xac9   :  { %4203 = vmax.xlane.f32.xlu0 %v4202_v55 }
 0xad6   :  { %4391 = vrot.lane.b32.xlu1 %v6310_v45, %s5991_s1  ;;  %v7668_v45 = vadd.f32 %v7232_v3, %v4143_v9 }
 0xada   :  { %4438 = vrot.lane.b32.xlu1 %v6318_v27, %s5991_s1  ;;  %v4205_v27 = vsel %vm924_vm3, %v7668_v45, -inf }
 0xade   :  { %4485 = vrot.lane.b32.xlu1 %v6322_v0, %s5991_s1 }
 0xadf   :  { %4344 = vrot.lane.b32.xlu0 %v6312_v13, %s5991_s1 }
 0xae3   :  { %4532 = vrot.lane.b32.xlu0 %v6326_v1, %s5991_s1 }
 0xaf6   :  { %v4162_v20 = vpop.xlane.xlu0 %4161 }
 0xaf7   :  { %v4208_v35 = vsub.f32 %v7555_v47, %v4162_v20 }
 0xaf9   :  { %v4224_v38 = vmul.f32 1.442695, %v4208_v35 }
 0xafa   :  { %v4165_v1 = vpop.xlane.xlu1 %4164 }
 0xafb   :  { %5903 = vpow2.f32 %v4224_v38  ;;  %v4209_v26 = vsub.f32 %v7566_v63, %v4165_v1 }
 0xafd   :  { %v4226_v47 = vmul.f32 1.442695, %v4209_v26 }
 0xaff   :  { %5905 = vpow2.f32 %v4226_v47 }
 0xb02   :  { %4206 = vmax.xlane.f32.xlu1 %v4205_v27 }
 0xb08   :  { %v7672_v0 = vpop.eup %5903 }
 0xb09   :  { %v4256_v13 = vsel %vm924_vm3, %v7672_v0, 0.0 }
 0xb0a   :  { %4257 = vadd.xlane.f32.xlu0 %v4256_v13 }
 0xb0c   :  { %v7679_v3 = vpop.eup %5905 }
 0xb0d   :  { %v4259_v37 = vsel %vm924_vm3, %v7679_v3, 0.0 }
 0xb13   :  { %4579 = vrot.lane.b32.xlu1 %v6328_v41, %s5991_s1 }
 0xb2c   :  { %v4177_v48 = vpop.xlane.xlu1 %4176 }
 0xb2d   :  { %v4213_v4 = vsub.f32 %v7574_v46, %v4177_v48 }
 0xb2f   :  { %v4234_v63 = vmul.f32 1.442695, %v4213_v4 }
 0xb36   :  { %v4168_v8 = vpop.xlane.xlu0 %4167 }
 0xb37   :  { %v4210_v5 = vsub.f32 %v7584_v53, %v4168_v8  ;;  %4260 = vadd.xlane.f32.xlu1 %v4259_v37 }
 0xb39   :  { %v4228_v28 = vmul.f32 1.442695, %v4210_v5 }
 0xb3a   :  { %v4171_v43 = vpop.xlane.xlu0 %4170 }
 0xb3b   :  { %5907 = vpow2.f32 %v4228_v28  ;;  %v4211_v41 = vsub.f32 %v7591_v62, %v4171_v43 }
 0xb3d   :  { %v4230_v32 = vmul.f32 1.442695, %v4211_v41 }
 0xb3e   :  { %v4174_v10 = vpop.xlane.xlu0 %4173 }
 0xb3f   :  { %5909 = vpow2.f32 %v4230_v32  ;;  %v4212_v55 = vsub.f32 %v7597_v17, %v4174_v10 }
 0xb40   :  { %5911 = vpow2.f32 %v4234_v63 }
 0xb41   :  { %v4232_v23 = vmul.f32 1.442695, %v4212_v55 }
 0xb42   :  { %v4183_v20 = vpop.xlane.xlu1 %4182  ;;  %v4180_v35 = vpop.xlane.xlu0 %4179 }
 0xb43   :  { %5913 = vpow2.f32 %v4232_v23  ;;  %v4215_v53 = vsub.f32 %v7608_v12, %v4183_v20  ;;  %v4214_v46 = vsub.f32 %v7605_v33, %v4180_v35 }
 0xb45   :  { %v4238_v9 = vmul.f32 1.442695, %v4215_v53  ;;  %v4236_v38 = vmul.f32 1.442695, %v4214_v46  ;;  %v8037_v53 = vmov 0.0  }
 0xb46   :  { %v4189_v27 = vpop.xlane.xlu1 %4188  ;;  %v4186_v13 = vpop.xlane.xlu0 %4185 }
 0xb47   :  { %5915 = vpow2.f32 %v4238_v9  ;;  %v4217_v62 = vsub.f32 %v7614_v14, %v4189_v27  ;;  %v4216_v1 = vsub.f32 %v7611_v21, %v4186_v13 }
 0xb48   :  { %v7691_v26 = vpop.eup %5907  ;;  %5917 = vpow2.f32 %v4236_v38 }
 0xb49   :  { %v4242_v17 = vmul.f32 1.442695, %v4217_v62  ;;  %v4240_v47 = vmul.f32 1.442695, %v4216_v1  ;;  %v4262_v48 = vsel %vm924_vm3, %v7691_v26, 0.0 }
 0xb4a   :  { %v4195_v12 = vpop.xlane.xlu1 %4194  ;;  %4263 = vadd.xlane.f32.xlu0 %v4262_v48  ;;  %v4192_v33 = vpop.xlane.xlu0 %4191 }
 0xb4b   :  { %5919 = vpow2.f32 %v4242_v17  ;;  %v4219_v8 = vsub.f32 %v7631_v15, %v4195_v12  ;;  %v4218_v37 = vsub.f32 %v7628_v57, %v4192_v33 }
 0xb4c   :  { %v7697_v5 = vpop.eup %5909  ;;  %5921 = vpow2.f32 %v4240_v47 }
 0xb4d   :  { %v4246_v21 = vmul.f32 1.442695, %v4219_v8  ;;  %v4244_v14 = vmul.f32 1.442695, %v4218_v37  ;;  %v4265_v4 = vsel %vm924_vm3, %v7697_v5, 0.0  ;;  %v7701_v28 = vpop.eup %5911 }
 0xb4e   :  { %v4201_v43 = vpop.xlane.xlu1 %4200  ;;  %4266 = vadd.xlane.f32.xlu1 %v4265_v4  ;;  %v4198_v41 = vpop.xlane.xlu0 %4197  ;;  %v4271_v55 = vsel %vm924_vm3, %v7701_v28, 0.0 }
 0xb4f   :  { %5923 = vpow2.f32 %v4246_v21  ;;  %v4221_v63 = vsub.f32 %v7644_v30, %v4201_v43  ;;  %v4220_v15 = vsub.f32 %v7634_v18, %v4198_v41 }
 0xb50   :  { %v7705_v32 = vpop.eup %5913  ;;  %5925 = vpow2.f32 %v4244_v14 }
 0xb51   :  { %v4250_v57 = vmul.f32 1.442695, %v4221_v63  ;;  %v4248_v10 = vmul.f32 1.442695, %v4220_v15  ;;  %v4268_v23 = vsel %vm924_vm3, %v7705_v32, 0.0 }
 0xb52   :  { %v4392_v20 = vpop.permute.xlu1 %4391  ;;  %4272 = vadd.xlane.f32.xlu1 %v4271_v55  ;;  %4269 = vadd.xlane.f32.xlu0 %v4268_v23  ;;  %v4204_v35 = vpop.xlane.xlu0 %4203 }
 0xb53   :  { %5927 = vpow2.f32 %v4250_v57  ;;  %v4222_v30 = vsub.f32 %v7651_v6, %v4204_v35  ;;  %5594 = vmatpush3.bf16.msra.mxu1 %v4392_v20  ;;  %v8043_v20 = vld [vmem:[#allocation6_spill] sm:$0xff] }
 0xb54   :  { %v7712_v18 = vpop.eup %5915  ;;  %5929 = vpow2.f32 %v4248_v10  ;;  %5605 = vmatprep.subr.bf16.mxu1 %v8037_v53 }
 0xb55   :  { %v7715_v46 = vpop.eup %5917  ;;  %v4252_v9 = vmul.f32 1.442695, %v4222_v30  ;;  %v4277_v38 = vsel %vm924_vm3, %v7712_v18, 0.0 }
 0xb56   :  { %4278 = vadd.xlane.f32.xlu1 %v4277_v38  ;;  %v4274_v27 = vsel %vm924_vm3, %v7715_v46, 0.0  ;;  %v4345_v13 = vpop.permute.xlu0 %4344  ;;  %v4439_v41 = vpop.permute.xlu1 %4438 }
 0xb57   :  { %5931 = vpow2.f32 %v4252_v9  ;;  %4275 = vadd.xlane.f32.xlu0 %v4274_v27  ;;  %5588 = vmatpush3.bf16.msra.mxu0 %v4345_v13  ;;  %v8044_v27 = vld [vmem:[#allocation9_spill] sm:$0xff] }
 0xb58   :  { %v7721_v6 = vpop.eup %5919  ;;  %5599 = vmatprep.subr.bf16.mxu0 %v8037_v53 }
 0xb59   :  { %v7724_v62 = vpop.eup %5921  ;;  %v4283_v1 = vsel %vm924_vm3, %v7721_v6, 0.0 }
 0xb5a   :  { %4284 = vadd.xlane.f32.xlu1 %v4283_v1  ;;  %v4280_v17 = vsel %vm924_vm3, %v7724_v62, 0.0  ;;  %v7756_v63 = vpop.permute.xlu1 %4485 }
 0xb5b   :  { %4281 = vadd.xlane.f32.xlu0 %v4280_v17 }
 0xb5c   :  { %v7730_v47 = vpop.eup %5923 }
 0xb5d   :  { %v7732_v48 = vpop.eup %5925  ;;  %v4289_v12 = vsel %vm924_vm3, %v7730_v47, 0.0 }
 0xb5e   :  { %4290 = vadd.xlane.f32.xlu1 %v4289_v12  ;;  %v4286_v33 = vsel %vm924_vm3, %v7732_v48, 0.0 }
 0xb5f   :  { %4287 = vadd.xlane.f32.xlu0 %v4286_v33  ;;  %v8045_v33 = vld [vmem:[#allocation10_spill] sm:$0xff] }
 0xb60   :  { %v7738_v8 = vpop.eup %5927 }
 0xb61   :  { %v7740_v37 = vpop.eup %5929  ;;  %v4295_v21 = vsel %vm924_vm3, %v7738_v8, 0.0 }
 0xb62   :  { %4296 = vadd.xlane.f32.xlu1 %v4295_v21  ;;  %v4292_v14 = vsel %vm924_vm3, %v7740_v37, 0.0 }
 0xb63   :  { %4293 = vadd.xlane.f32.xlu0 %v4292_v14 }
 0xb64   :  { %v7746_v4 = vpop.eup %5931 }
 0xb65   :  { %v4298_v43 = vsel %vm924_vm3, %v7746_v4, 0.0 }
 0xb67   :  { %4299 = vadd.xlane.f32.xlu0 %v4298_v43 }
 0xb7d   :  { %4626 = vrot.lane.b32.xlu0 %v6336_v51, %s5991_s1 }
 0xb81   :  { %2536 = vrot.lane.b32.xlu0 %v7124_v54, %s5992_s17 }
 0xb85   :  { %2540 = vrot.lane.b32.xlu0 %v7128_v39, %s5992_s17 }
 0xb89   :  { %3636 = vrot.lane.b32.xlu0 %v7510_v34, %s5993_s18 }
 0xb8b   :  { %v4207_v15 = vpop.xlane.xlu1 %4206 }
 0xb8c   :  { %v4223_v57 = vsub.f32 %v7668_v45, %v4207_v15 }
 0xb8d   :  { %3640 = vrot.lane.b32.xlu0 %v7514_v50, %s5993_s18 }
 0xb8e   :  { %v4254_v51 = vmul.f32 1.442695, %v4223_v57 }
 0xb90   :  { %5933 = vpow2.f32 %v4254_v51 }
 0xb91   :  { %2544 = vrot.lane.b32.xlu0 %v7132_v36, %s5992_s17  ;;  %v7791_v36 = vpop.permute.xlu0 %4532 }
 0xb95   :  { %2548 = vrot.lane.b32.xlu0 %v7136_v11, %s5992_s17  ;;  %v7797_v11 = vpop.permute.xlu1 %4579 }
 0xb99   :  { %3644 = vrot.lane.b32.xlu0 %v7518_v24, %s5993_s18  ;;  %v8040_v24 = vld [vmem:[#allocation7_spill] sm:$0xff] }
 0xb9d   :  { %v7769_v54 = vpop.eup %5933  ;;  %3648 = vrot.lane.b32.xlu0 %v7522_v29, %s5993_s18 }
 0xb9e   :  { %v4301_v39 = vsel %vm924_vm3, %v7769_v54, 0.0 }
 0xb9f   :  { %4302 = vadd.xlane.f32.xlu1 %v4301_v39 }
 0xba1   :  { %2552 = vrot.lane.b32.xlu0 %v7140_v59, %s5992_s17 }
 0xba5   :  { %2556 = vrot.lane.b32.xlu0 %v7144_v19, %s5992_s17 }
 0xba9   :  { %3652 = vrot.lane.b32.xlu0 %v7526_v2, %s5993_s18 }
 0xbad   :  { %3656 = vrot.lane.b32.xlu0 %v7530_v31, %s5993_s18 }
 0xbb0   :  { %4673 = vrot.lane.b32.xlu1 %v6334_v49, %s5991_s1  ;;  %v4258_v49 = vpop.xlane.xlu0 %4257 }
 0xbb1   :  { %2560 = vrot.lane.b32.xlu0 %v7148_v7, %s5992_s17  ;;  %5935 = vrcp.f32 %v4258_v49 }
 0xbb4   :  { %2538 = vrot.lane.b32.xlu1 %v7126_v60, %s5992_s17 }
 0xbb5   :  { %2564 = vrot.lane.b32.xlu0 %v7174_v61, %s5992_s17 }
 0xbb8   :  { %2542 = vrot.lane.b32.xlu1 %v7130_v52, %s5992_s17 }
 0xbb9   :  { %3660 = vrot.lane.b32.xlu0 %v7534_v25, %s5993_s18 }
 0xbbc   :  { %3638 = vrot.lane.b32.xlu1 %v7512_v16, %s5993_s18  ;;  %v8039_v16 = vld [vmem:[#allocation4_spill] sm:$0xff] }
 0xbbd   :  { %3664 = vrot.lane.b32.xlu0 %v7570_v40, %s5993_s18  ;;  %v8042_v40 = vld [vmem:[#allocation5_spill] sm:$0xff] }
 0xbbe   :  { %v5936_v52 = vpop.eup %5935 }
 0xbbf   :  { %v4320_v19 = vmul.f32 %v5936_v52, %v7672_v0 }
 0xbc0   :  { %v4261_v60 = vpop.xlane.xlu1 %4260  ;;  %3642 = vrot.lane.b32.xlu1 %v7516_v44, %s5993_s18 }
 0xbc1   :  { %5937 = vrcp.f32 %v4261_v60 }
 0xbc4   :  { %2546 = vrot.lane.b32.xlu1 %v7134_v42, %s5992_s17  ;;  %v8038_v42 = vld [vmem:[#allocation3_spill] sm:$0xff] }
 0xbc8   :  { %2550 = vrot.lane.b32.xlu1 %v7138_v58, %s5992_s17 }
 0xbcc   :  { %3646 = vrot.lane.b32.xlu1 %v7520_v56, %s5993_s18 }
 0xbce   :  { %v5938_v59 = vpop.eup %5937 }
 0xbcf   :  { %v4321_v7 = vmul.f32 %v5938_v59, %v7679_v3 }
 0xbd0   :  { %3650 = vrot.lane.b32.xlu1 %v7524_v22, %s5993_s18  ;;  %v8041_v22 = vld [vmem:[#allocation8_spill] sm:$0xff] }
 0xbd1   :  { %v4336_v61 = vpack.c.bf16 %v4321_v7, %v4320_v19 }
 0xbd3   :  { %5590 = vmatmul.mubr.msk.bf16.vlgmr.msra.gmra.mxu0 %vm924_vm3, %v4336_v61  ;;  %v4264_v34 = vpop.xlane.xlu0 %4263 }
 0xbd4   :  { %5600 = vmatpush3.bf16.msra.mxu0 %v4439_v41  ;;  %2554 = vrot.lane.b32.xlu1 %v8038_v42, %s5992_s17  ;;  %5939 = vrcp.f32 %v4264_v34 }
 0xbd5   :  { %5601 = vmatprep.mubr.msk.bf16.mxu0 %vm5980_vm1, %v8037_v53  ;;  %5611 = vmatprep.subr.bf16.mxu0 %v8037_v53 }
 0xbd7   :  { %v4267_v58 = vpop.xlane.xlu1 %4266 }
 0xbd8   :  { %5941 = vrcp.f32 %v4267_v58  ;;  %2558 = vrot.lane.b32.xlu1 %v8039_v16, %s5992_s17 }
 0xbdb   :  { %v4273_v50 = vpop.xlane.xlu1 %4272  ;;  %v4270_v44 = vpop.xlane.xlu0 %4269 }
 0xbdc   :  { %5943 = vrcp.f32 %v4273_v50  ;;  %3654 = vrot.lane.b32.xlu1 %v8040_v24, %s5993_s18 }
 0xbdd   :  { %5945 = vrcp.f32 %v4270_v44 }
 0xbdf   :  { %v4279_v56 = vpop.xlane.xlu1 %4278 }
 0xbe0   :  { %5947 = vrcp.f32 %v4279_v56  ;;  %v4276_v29 = vpop.xlane.xlu0 %4275  ;;  %3658 = vrot.lane.b32.xlu1 %v8041_v22, %s5993_s18 }
 0xbe1   :  { %5949 = vrcp.f32 %v4276_v29  ;;  %v5940_v2 = vpop.eup %5939 }
 0xbe2   :  { %v4322_v0 = vmul.f32 %v5940_v2, %v7691_v26 }
 0xbe3   :  { %v4285_v31 = vpop.xlane.xlu1 %4284 }
 0xbe4   :  { %5951 = vrcp.f32 %v4285_v31  ;;  %v4282_v25 = vpop.xlane.xlu0 %4281  ;;  %2562 = vrot.lane.b32.xlu1 %v8042_v40, %s5992_s17 }
 0xbe5   :  { %v5942_v45 = vpop.eup %5941  ;;  %5953 = vrcp.f32 %v4282_v25 }
 0xbe6   :  { %v4323_v3 = vmul.f32 %v5942_v45, %v7697_v5 }
 0xbe7   :  { %v4291_v10 = vpop.xlane.xlu1 %4290 }
 0xbe8   :  { %v4337_v55 = vpack.c.bf16 %v4323_v3, %v4322_v0  ;;  %5955 = vrcp.f32 %v4291_v10  ;;  %v4288_v23 = vpop.xlane.xlu0 %4287  ;;  %2566 = vrot.lane.b32.xlu1 %v8043_v20, %s5992_s17 }
 0xbe9   :  { %v5944_v35 = vpop.eup %5943  ;;  %5957 = vrcp.f32 %v4288_v23 }
 0xbea   :  { %v5946_v30 = vpop.eup %5945  ;;  %v4325_v9 = vmul.f32 %v5944_v35, %v7701_v28  ;;  %5596 = vmatmul.mubr.msk.bf16.vlgmr.msra.gmra.mxu1 %vm924_vm3, %v4337_v55 }
 0xbeb   :  { %v4324_v38 = vmul.f32 %v5946_v30, %v7705_v32  ;;  %5606 = vmatpush3.bf16.msra.mxu1 %v7756_v63  ;;  %v4297_v26 = vpop.xlane.xlu1 %4296  ;;  %5607 = vmatprep.mubr.msk.bf16.mxu1 %vm5980_vm1, %v8037_v53 }
 0xbec   :  { %5959 = vrcp.f32 %v4297_v26  ;;  %v4294_v5 = vpop.xlane.xlu0 %4293  ;;  %3662 = vrot.lane.b32.xlu1 %v8044_v27, %s5993_s18  ;;  %5617 = vmatprep.subr.bf16.mxu1 %v8037_v53 }
 0xbed   :  { %v5948_v13 = vpop.eup %5947  ;;  %v4338_v1 = vpack.c.bf16 %v4325_v9, %v4324_v38  ;;  %5961 = vrcp.f32 %v4294_v5 }
 0xbee   :  { %v5950_v28 = vpop.eup %5949  ;;  %v4327_v17 = vmul.f32 %v5948_v13, %v7712_v18 }
 0xbef   :  { %v4326_v32 = vmul.f32 %v5950_v28, %v7715_v46  ;;  %5602 = vmatmul.mubr.msk.bf16.vlgmr.msra.gmra.mxu0 %vm924_vm3, %v4338_v1 }
 0xbf0   :  { %5612 = vmatpush3.bf16.msra.mxu0 %v7791_v36  ;;  %v4300_v12 = vpop.xlane.xlu0 %4299  ;;  %3666 = vrot.lane.b32.xlu1 %v8045_v33, %s5993_s18 }
 0xbf1   :  { %v5952_v21 = vpop.eup %5951  ;;  %v4339_v14 = vpack.c.bf16 %v4327_v17, %v4326_v32  ;;  %5613 = vmatprep.mubr.msk.bf16.mxu0 %vm5980_vm1, %v8037_v53  ;;  %5623 = vmatprep.subr.bf16.mxu0 %v8037_v53  ;;  %5963 = vrcp.f32 %v4300_v12  ;;  %v5677_v17 = vld [vmem:[%s8024_s7 + $0x8] sm:$0xff]   ;;  %v5678_v32 = vld [vmem:[%s8024_s7] sm:$0xff]  }
 0xbf2   :  { %v5954_v43 = vpop.eup %5953  ;;  %v4329_v18 = vmul.f32 %v5952_v21, %v7721_v6 }
 0xbf3   :  { %v4328_v46 = vmul.f32 %v5954_v43, %v7724_v62  ;;  %5608 = vmatmul.mubr.msk.bf16.vlgmr.msra.gmra.mxu1 %vm924_vm3, %v4339_v14 }
 0xbf4   :  { %5618 = vmatpush3.bf16.msra.mxu1 %v7797_v11  ;;  %v4627_v41 = vpop.permute.xlu0 %4626  ;;  %5619 = vmatprep.mubr.msk.bf16.mxu1 %vm5980_vm1, %v8037_v53 }
 0xbf5   :  { %v5956_v63 = vpop.eup %5955  ;;  %v4340_v15 = vpack.c.bf16 %v4329_v18, %v4328_v46  ;;  %5629 = vmatprep.subr.bf16.mxu1 %v8037_v53 }
 0xbf6   :  { %v5958_v57 = vpop.eup %5957  ;;  %v4331_v51 = vmul.f32 %v5956_v63, %v7730_v47 }
 0xbf7   :  { %v4330_v6 = vmul.f32 %v5958_v57, %v7732_v48  ;;  %5614 = vmatmul.mubr.msk.bf16.vlgmr.msra.gmra.mxu0 %vm924_vm3, %v4340_v15 }
 0xbf8   :  { %5624 = vmatpush3.bf16.msra.mxu0 %v4627_v41  ;;  %v2537_v62 = vpop.permute.xlu0 %2536  ;;  %5625 = vmatprep.mubr.msk.bf16.mxu0 %vm5980_vm1, %v8037_v53 }
 0xbf9   :  { %v5960_v39 = vpop.eup %5959  ;;  %v4341_v36 = vpack.c.bf16 %v4331_v51, %v4330_v6  ;;  %2585 = vst.msk [vmem:[#allocation2] sm:$0xff] %vm2584_vm4, %v2537_v62  ;;  %5635 = vmatprep.subr.bf16.mxu0 %v5677_v17 }
 0xbfa   :  { %v5962_v11 = vpop.eup %5961  ;;  %v4333_v49 = vmul.f32 %v5960_v39, %v7738_v8 }
 0xbfb   :  { %v4332_v60 = vmul.f32 %v5962_v11, %v7740_v37  ;;  %5620 = vmatmul.mubr.msk.bf16.vlgmr.msra.gmra.mxu1 %vm924_vm3, %v4341_v36 }
 0xbfc   :  { %v2541_v47 = vpop.permute.xlu0 %2540  ;;  %5631 = vmatprep.mubr.msk.bf16.mxu1 %vm5980_vm1, %v8037_v53 }
 0xbfd   :  { %v4342_v48 = vpack.c.bf16 %v4333_v49, %v4332_v60  ;;  %2587 = vst.msk [vmem:[#allocation2 + $0x10] sm:$0xff] %vm2584_vm4, %v2541_v47 }
 0xbfe   :  { %v5964_v29 = vpop.eup %5963 }
 0xbff   :  { %5626 = vmatmul.mubr.msk.bf16.vlgmr.msra.gmra.mxu0 %vm924_vm3, %v4342_v48  ;;  %v4334_v25 = vmul.f32 %v5964_v29, %v7746_v4 }
 0xc00   :  { %v3637_v52 = vpop.permute.xlu0 %3636  ;;  %5636 = vmatpush3.bf16.msra.mxu0 %v5677_v17 }
 0xc01   :  { %3685 = vst.msk [vmem:[#allocation2] sm:$0xff] %vm3684_vm5, %v3637_v52  ;;  %5637 = vmatprep.subr.bf16.mxu0 %v5678_v32 }
 0xc04   :  { %v3641_v59 = vpop.permute.xlu0 %3640  ;;  %5638 = vmatpush3.bf16.msra.mxu0 %v5678_v32 }
 0xc05   :  { %3687 = vst.msk [vmem:[#allocation2 + $0x10] sm:$0xff] %vm3684_vm5, %v3641_v59 }
 0xc08   :  { %v2545_v8 = vpop.permute.xlu0 %2544 }
 0xc09   :  { %2589 = vst.msk [vmem:[#allocation2 + $0x20] sm:$0xff] %vm2584_vm4, %v2545_v8 }
 0xc0c   :  { %v2549_v37 = vpop.permute.xlu0 %2548 }
 0xc0d   :  { %2591 = vst.msk [vmem:[#allocation2 + $0x30] sm:$0xff] %vm2584_vm4, %v2549_v37 }
 0xc10   :  { %v3645_v19 = vpop.permute.xlu0 %3644 }
 0xc11   :  { %3689 = vst.msk [vmem:[#allocation2 + $0x20] sm:$0xff] %vm3684_vm5, %v3645_v19 }
 0xc14   :  { %v3649_v53 = vpop.permute.xlu0 %3648 }
 0xc15   :  { %3691 = vst.msk [vmem:[#allocation2 + $0x30] sm:$0xff] %vm3684_vm5, %v3649_v53 }
 0xc18   :  { %v2553_v7 = vpop.permute.xlu0 %2552 }
 0xc19   :  { %2593 = vst.msk [vmem:[#allocation2 + $0x40] sm:$0xff] %vm2584_vm4, %v2553_v7 }
 0xc1c   :  { %v2557_v61 = vpop.permute.xlu0 %2556 }
 0xc1d   :  { %2595 = vst.msk [vmem:[#allocation2 + $0x50] sm:$0xff] %vm2584_vm4, %v2557_v61 }
 0xc20   :  { %v3653_v34 = vpop.permute.xlu0 %3652 }
 0xc21   :  { %3693 = vst.msk [vmem:[#allocation2 + $0x40] sm:$0xff] %vm3684_vm5, %v3653_v34 }
 0xc24   :  { %v3657_v42 = vpop.permute.xlu0 %3656 }
 0xc25   :  { %3695 = vst.msk [vmem:[#allocation2 + $0x50] sm:$0xff] %vm3684_vm5, %v3657_v42 }
 0xc28   :  { %v2561_v58 = vpop.permute.xlu0 %2560  ;;  %v4303_v16 = vpop.xlane.xlu1 %4302 }
 0xc29   :  { %2597 = vst.msk [vmem:[#allocation2 + $0x60] sm:$0xff] %vm2584_vm4, %v2561_v58  ;;  %5965 = vrcp.f32 %v4303_v16 }
 0xc2c   :  { %v2565_v50 = vpop.permute.xlu0 %2564  ;;  %v4674_v44 = vpop.permute.xlu1 %4673 }
 0xc2d   :  { %2599 = vst.msk [vmem:[#allocation2 + $0x70] sm:$0xff] %vm2584_vm4, %v2565_v50  ;;  %5630 = vmatpush3.bf16.msra.mxu1 %v4674_v44 }
 0xc30   :  { %v3661_v24 = vpop.permute.xlu0 %3660  ;;  %v2539_v56 = vpop.permute.xlu1 %2538 }
 0xc31   :  { %3697 = vst.msk [vmem:[#allocation2 + $0x60] sm:$0xff] %vm3684_vm5, %v3661_v24 }
 0xc32   :  { %2586 = vst.msk [vmem:[#allocation2 + $0x8] sm:$0xff] %vm2584_vm4, %v2539_v56 }
 0xc34   :  { %v3665_v22 = vpop.permute.xlu0 %3664  ;;  %v2543_v2 = vpop.permute.xlu1 %2542 }
 0xc35   :  { %3699 = vst.msk [vmem:[#allocation2 + $0x70] sm:$0xff] %vm3684_vm5, %v3665_v22 }
 0xc36   :  { %2588 = vst.msk [vmem:[#allocation2 + $0x18] sm:$0xff] %vm2584_vm4, %v2543_v2  ;;  %v5966_v31 = vpop.eup %5965 }
 0xc37   :  { %v4335_v40 = vmul.f32 %v5966_v31, %v7769_v54 }
 0xc38   :  { %v3639_v45 = vpop.permute.xlu1 %3638 }
 0xc39   :  { %v4343_v0 = vpack.c.bf16 %v4335_v40, %v4334_v25  ;;  %3686 = vst.msk [vmem:[#allocation2 + $0x8] sm:$0xff] %vm3684_vm5, %v3639_v45 }
 0xc3b   :  { %5632 = vmatmul.mubr.msk.bf16.vlgmr.msra.gmra.mxu1 %vm924_vm3, %v4343_v0 }
 0xc3c   :  { %v3643_v3 = vpop.permute.xlu1 %3642 }
 0xc3d   :  { %3688 = vst.msk [vmem:[#allocation2 + $0x18] sm:$0xff] %vm3684_vm5, %v3643_v3 }
 0xc40   :  { %v2547_v10 = vpop.permute.xlu1 %2546 }
 0xc41   :  { %2590 = vst.msk [vmem:[#allocation2 + $0x28] sm:$0xff] %vm2584_vm4, %v2547_v10 }
 0xc44   :  { %v2551_v55 = vpop.permute.xlu1 %2550 }
 0xc45   :  { %2592 = vst.msk [vmem:[#allocation2 + $0x38] sm:$0xff] %vm2584_vm4, %v2551_v55 }
 0xc48   :  { %v3647_v23 = vpop.permute.xlu1 %3646 }
 0xc49   :  { %3690 = vst.msk [vmem:[#allocation2 + $0x28] sm:$0xff] %vm3684_vm5, %v3647_v23 }
 0xc4c   :  { %v3651_v4 = vpop.permute.xlu1 %3650 }
 0xc4d   :  { %3692 = vst.msk [vmem:[#allocation2 + $0x38] sm:$0xff] %vm3684_vm5, %v3651_v4 }
 0xc50   :  { %v2555_v54 = vpop.permute.xlu1 %2554 }
 0xc51   :  { %2594 = vst.msk [vmem:[#allocation2 + $0x48] sm:$0xff] %vm2584_vm4, %v2555_v54 }
 0xc54   :  { %v2559_v20 = vpop.permute.xlu1 %2558 }
 0xc55   :  { %2596 = vst.msk [vmem:[#allocation2 + $0x58] sm:$0xff] %vm2584_vm4, %v2559_v20 }
 0xc58   :  { %v3655_v35 = vpop.permute.xlu1 %3654 }
 0xc59   :  { %3694 = vst.msk [vmem:[#allocation2 + $0x48] sm:$0xff] %vm3684_vm5, %v3655_v35 }
 0xc5c   :  { %v3659_v30 = vpop.permute.xlu1 %3658 }
 0xc5d   :  { %3696 = vst.msk [vmem:[#allocation2 + $0x58] sm:$0xff] %vm3684_vm5, %v3659_v30 }
 0xc60   :  { %v2563_v9 = vpop.permute.xlu1 %2562 }
 0xc61   :  { %2598 = vst.msk [vmem:[#allocation2 + $0x68] sm:$0xff] %vm2584_vm4, %v2563_v9 }
 0xc64   :  { %v2567_v38 = vpop.permute.xlu1 %2566 }
 0xc65   :  { %2600 = vst.msk [vmem:[#allocation2 + $0x78] sm:$0xff] %vm2584_vm4, %v2567_v38 }
 0xc68   :  { %v3663_v26 = vpop.permute.xlu1 %3662 }
 0xc69   :  { %3698 = vst.msk [vmem:[#allocation2 + $0x68] sm:$0xff] %vm3684_vm5, %v3663_v26 }
 0xc6c   :  { %v3667_v5 = vpop.permute.xlu1 %3666 }
 0xc6d   :  { %3700 = vst.msk [vmem:[#allocation2 + $0x78] sm:$0xff] %vm3684_vm5, %v3667_v5 }
 0xc93   :  { %v4384_v27 = vpop.f32.mrf.mxu0 }
 0xc94   :  { %4736 = vrot.lane.b32.xlu0 %v4384_v27, %s5994_s19 }
 0xc95   :  { %v5591_v13 = vpop.f32.mrf.mxu0 }
 0xc97   :  { %v4387_v1 = vpop.f32.mrf.mxu0 }
 0xc98   :  { %4738 = vrot.lane.b32.xlu1 %v4387_v1, %s5994_s19 }
 0xc99   :  { %v5592_v28 = vpop.f32.mrf.mxu0 }
 0xcaa   :  { %v4431_v12 = vpop.f32.mrf.mxu1 }
 0xcab   :  { %4740 = vrot.lane.b32.xlu0 %v4431_v12, %s5994_s19 }
 0xcac   :  { %v5597_v33 = vpop.f32.mrf.mxu1 }
 0xcae   :  { %v4434_v21 = vpop.f32.mrf.mxu1 }
 0xcaf   :  { %v4478_v14 = vpop.f32.mrf.mxu0  ;;  %4742 = vrot.lane.b32.xlu1 %v4434_v21, %s5994_s19 }
 0xcb0   :  { %4744 = vrot.lane.b32.xlu0 %v4478_v14, %s5994_s19  ;;  %v5598_v43 = vpop.f32.mrf.mxu1 }
 0xcb1   :  { %v5603_v18 = vpop.f32.mrf.mxu0  ;;  %v5072_v43 = vld [vmem:[%s8025_s8] ss:$0 sm:$0xff] }
 0xcb3   :  { %v4481_v46 = vpop.f32.mrf.mxu0  ;;  %v4525_v41 = vpop.f32.mrf.mxu1 }
 0xcb4   :  { %4746 = vrot.lane.b32.xlu1 %v4481_v46, %s5994_s19  ;;  %4748 = vrot.lane.b32.xlu0 %v4525_v41, %s5994_s19 }
 0xcb5   :  { %v5604_v63 = vpop.f32.mrf.mxu0  ;;  %v5609_v15 = vpop.f32.mrf.mxu1 }
 0xcb7   :  { %v4528_v57 = vpop.f32.mrf.mxu1  ;;  %v4572_v51 = vpop.f32.mrf.mxu0 }
 0xcb8   :  { %4750 = vrot.lane.b32.xlu1 %v4528_v57, %s5994_s19  ;;  %4752 = vrot.lane.b32.xlu0 %v4572_v51, %s5994_s19 }
 0xcb9   :  { %v5610_v6 = vpop.f32.mrf.mxu1  ;;  %v5615_v62 = vpop.f32.mrf.mxu0 }
 0xcbb   :  { %v4575_v39 = vpop.f32.mrf.mxu0  ;;  %v4619_v36 = vpop.f32.mrf.mxu1 }
 0xcbc   :  { %4754 = vrot.lane.b32.xlu1 %v4575_v39, %s5994_s19  ;;  %4756 = vrot.lane.b32.xlu0 %v4619_v36, %s5994_s19 }
 0xcbd   :  { %v5616_v11 = vpop.f32.mrf.mxu0  ;;  %v5621_v49 = vpop.f32.mrf.mxu1 }
 0xcbf   :  { %v4622_v60 = vpop.f32.mrf.mxu1  ;;  %v4666_v47 = vpop.f32.mrf.mxu0 }
 0xcc0   :  { %4758 = vrot.lane.b32.xlu1 %v4622_v60, %s5994_s19  ;;  %4760 = vrot.lane.b32.xlu0 %v4666_v47, %s5994_s19 }
 0xcc1   :  { %v5622_v48 = vpop.f32.mrf.mxu1  ;;  %v5627_v52 = vpop.f32.mrf.mxu0 }
 0xcc3   :  { %v4669_v59 = vpop.f32.mrf.mxu0 }
 0xcc4   :  { %4762 = vrot.lane.b32.xlu1 %v4669_v59, %s5994_s19 }
 0xcc5   :  { %v5628_v8 = vpop.f32.mrf.mxu0 }
 0xcfb   :  { %v4713_v37 = vpop.f32.mrf.mxu1 }
 0xcfc   :  { %4764 = vrot.lane.b32.xlu0 %v4713_v37, %s5994_s19 }
 0xcfd   :  { %v5633_v19 = vpop.f32.mrf.mxu1 }
 0xcff   :  { %v4716_v53 = vpop.f32.mrf.mxu1 }
 0xd00   :  { %4766 = vrot.lane.b32.xlu1 %v4716_v53, %s5994_s19 }
 0xd01   :  { %v5634_v7 = vpop.f32.mrf.mxu1 }
 0xd06   :  { %v4737_v61 = vpop.permute.xlu0 %4736 }
 0xd07   :  { %4785 = vst.msk [vmem:[#allocation2] sm:$0xff] %vm4784_vm6, %v4737_v61 }
 0xd0a   :  { %v4739_v34 = vpop.permute.xlu1 %4738 }
 0xd0b   :  { %4786 = vst.msk [vmem:[#allocation2 + $0x8] sm:$0xff] %vm4784_vm6, %v4739_v34 }
 0xd0e   :  { %v4801_v42 = vld [vmem:[#allocation2] sm:$0xff] }
 0xd12   :  { %v4802_v58 = vld [vmem:[#allocation2 + $0x8] sm:$0xff] }
 0xd13   :  { %v4817_v16 = vpack.c.bf16 %v4802_v58, %v4801_v42 }
 0xd15   :  { %5639 = vmatprep.mubr.msk.bf16.mxu0 %vm51_vm0, %v4817_v16 }
 0xd1d   :  { %v4741_v50 = vpop.permute.xlu0 %4740 }
 0xd1e   :  { %4787 = vst.msk [vmem:[#allocation2 + $0x10] sm:$0xff] %vm4784_vm6, %v4741_v50 }
 0xd21   :  { %v4743_v44 = vpop.permute.xlu1 %4742 }
 0xd22   :  { %4788 = vst.msk [vmem:[#allocation2 + $0x18] sm:$0xff] %vm4784_vm6, %v4743_v44  ;;  %v4745_v24 = vpop.permute.xlu0 %4744 }
 0xd23   :  { %4789 = vst.msk [vmem:[#allocation2 + $0x20] sm:$0xff] %vm4784_vm6, %v4745_v24 }
 0xd25   :  { %v4803_v22 = vld [vmem:[#allocation2 + $0x10] sm:$0xff] }
 0xd26   :  { %v4747_v56 = vpop.permute.xlu1 %4746  ;;  %v4749_v29 = vpop.permute.xlu0 %4748 }
 0xd27   :  { %4790 = vst.msk [vmem:[#allocation2 + $0x28] sm:$0xff] %vm4784_vm6, %v4747_v56  ;;  %4791 = vst.msk [vmem:[#allocation2 + $0x30] sm:$0xff] %vm4784_vm6, %v4749_v29 }
 0xd29   :  { %v4804_v2 = vld [vmem:[#allocation2 + $0x18] sm:$0xff] }
 0xd2a   :  { %v4751_v31 = vpop.permute.xlu1 %4750  ;;  %v4753_v25 = vpop.permute.xlu0 %4752  ;;  %v4818_v40 = vpack.c.bf16 %v4804_v2, %v4803_v22  ;;  %v4805_v3 = vld [vmem:[#allocation2 + $0x20] sm:$0xff] }
 0xd2b   :  { %4792 = vst.msk [vmem:[#allocation2 + $0x38] sm:$0xff] %vm4784_vm6, %v4751_v31  ;;  %4793 = vst.msk [vmem:[#allocation2 + $0x40] sm:$0xff] %vm4784_vm6, %v4753_v25 }
 0xd2c   :  { %5640 = vmatmul.mubr.msk.bf16.vlgmr.msra.gmra.mxu0 %vm51_vm0, %v4818_v40 }
 0xd2e   :  { %v4755_v45 = vpop.permute.xlu1 %4754  ;;  %v4757_v0 = vpop.permute.xlu0 %4756  ;;  %v4806_v10 = vld [vmem:[#allocation2 + $0x28] sm:$0xff]  ;;  %v4807_v54 = vld [vmem:[#allocation2 + $0x30] sm:$0xff] }
 0xd2f   :  { %4794 = vst.msk [vmem:[#allocation2 + $0x48] sm:$0xff] %vm4784_vm6, %v4755_v45  ;;  %4795 = vst.msk [vmem:[#allocation2 + $0x50] sm:$0xff] %vm4784_vm6, %v4757_v0  ;;  %v4819_v55 = vpack.c.bf16 %v4806_v10, %v4805_v3 }
 0xd31   :  { %5643 = vmatprep.mubr.msk.bf16.mxu0 %vm51_vm0, %v4819_v55 }
 0xd32   :  { %v4759_v23 = vpop.permute.xlu1 %4758  ;;  %v4761_v4 = vpop.permute.xlu0 %4760  ;;  %v4808_v20 = vld [vmem:[#allocation2 + $0x38] sm:$0xff]  ;;  %v4809_v9 = vld [vmem:[#allocation2 + $0x40] sm:$0xff] }
 0xd33   :  { %4796 = vst.msk [vmem:[#allocation2 + $0x58] sm:$0xff] %vm4784_vm6, %v4759_v23  ;;  %4797 = vst.msk [vmem:[#allocation2 + $0x60] sm:$0xff] %vm4784_vm6, %v4761_v4  ;;  %v4820_v35 = vpack.c.bf16 %v4808_v20, %v4807_v54 }
 0xd35   :  { %5644 = vmatmul.mubr.msk.bf16.gmra.mxu0 %vm51_vm0, %v4820_v35 }
 0xd36   :  { %v4763_v30 = vpop.permute.xlu1 %4762  ;;  %v4810_v38 = vld [vmem:[#allocation2 + $0x48] sm:$0xff]  ;;  %v4811_v5 = vld [vmem:[#allocation2 + $0x50] sm:$0xff] }
 0xd37   :  { %4798 = vst.msk [vmem:[#allocation2 + $0x68] sm:$0xff] %vm4784_vm6, %v4763_v30  ;;  %v4821_v26 = vpack.c.bf16 %v4810_v38, %v4809_v9 }
 0xd39   :  { %5647 = vmatprep.mubr.msk.bf16.mxu0 %vm51_vm0, %v4821_v26 }
 0xd3a   :  { %v4812_v27 = vld [vmem:[#allocation2 + $0x58] sm:$0xff]  ;;  %v4813_v1 = vld [vmem:[#allocation2 + $0x60] sm:$0xff] }
 0xd3b   :  { %v4822_v13 = vpack.c.bf16 %v4812_v27, %v4811_v5 }
 0xd3d   :  { %5648 = vmatmul.mubr.msk.bf16.gmra.mxu0 %vm51_vm0, %v4822_v13 }
 0xd3e   :  { %v4814_v28 = vld [vmem:[#allocation2 + $0x68] sm:$0xff] }
 0xd3f   :  { %v4823_v17 = vpack.c.bf16 %v4814_v28, %v4813_v1 }
 0xd41   :  { %5651 = vmatprep.mubr.msk.bf16.mxu0 %vm51_vm0, %v4823_v17 }
 0xd6e   :  { %v4765_v32 = vpop.permute.xlu0 %4764 }
 0xd6f   :  { %4799 = vst.msk [vmem:[#allocation2 + $0x70] sm:$0xff] %vm4784_vm6, %v4765_v32 }
 0xd72   :  { %v4767_v12 = vpop.permute.xlu1 %4766 }
 0xd73   :  { %4800 = vst.msk [vmem:[#allocation2 + $0x78] sm:$0xff] %vm4784_vm6, %v4767_v12 }
 0xd76   :  { %v4815_v33 = vld [vmem:[#allocation2 + $0x70] sm:$0xff] }
 0xd7a   :  { %v4816_v21 = vld [vmem:[#allocation2 + $0x78] sm:$0xff] }
 0xd7b   :  { %v4824_v14 = vpack.c.bf16 %v4816_v21, %v4815_v33 }
 0xd7d   :  { %5652 = vmatmul.mubr.msk.bf16.gmra.mxu0 %vm51_vm0, %v4824_v14 }
 0xdec   :  { %v5641_v18 = vpop.f32.mrf.mxu0 }
 0xded   :  { %v4915_v46 = vadd.f32 %v5641_v18, %v5072_v43 }
 0xdee   :  { %v4906_v41 = vpop.f32.mrf.mxu0 }
 0xdef   :  { %4971 = vst.msk [vmem:[%s8026_s9 + $0x10] sm:$0xff] %vm51_vm0, %v4915_v46  ;;  %v4907_v63 = vadd.f32 %v5072_v43, %v4906_v41 }
 0xdf0   :  { %v5642_v15 = vpop.f32.mrf.mxu0 }
 0xdf1   :  { %4969 = vst.msk [vmem:[%s8026_s9] sm:$0xff] %vm51_vm0, %v4907_v63  ;;  %v4918_v57 = vadd.f32 %v5642_v15, %v5072_v43 }
 0xdf2   :  { %v4909_v51 = vpop.f32.mrf.mxu0 }
 0xdf3   :  { %4972 = vst.msk [vmem:[%s8026_s9 + $0x18] sm:$0xff] %vm51_vm0, %v4918_v57  ;;  %v4910_v6 = vadd.f32 %v5072_v43, %v4909_v51 }
 0xdf5   :  { %4970 = vst.msk [vmem:[%s8026_s9 + $0x8] sm:$0xff] %vm51_vm0, %v4910_v6  ;;  %v5645_v62 = vpop.f32.mrf.mxu0 }
 0xdf6   :  { %v4931_v39 = vadd.f32 %v5645_v62, %v5072_v43 }
 0xdf7   :  { %v4922_v36 = vpop.f32.mrf.mxu0 }
 0xdf8   :  { %4975 = vst.msk [vmem:[%s8026_s9 + $0x30] sm:$0xff] %vm51_vm0, %v4931_v39  ;;  %v4923_v11 = vadd.f32 %v5072_v43, %v4922_v36 }
 0xdf9   :  { %v5646_v49 = vpop.f32.mrf.mxu0 }
 0xdfa   :  { %4973 = vst.msk [vmem:[%s8026_s9 + $0x20] sm:$0xff] %vm51_vm0, %v4923_v11  ;;  %v4934_v60 = vadd.f32 %v5646_v49, %v5072_v43 }
 0xdfb   :  { %v4925_v47 = vpop.f32.mrf.mxu0 }
 0xdfc   :  { %4976 = vst.msk [vmem:[%s8026_s9 + $0x38] sm:$0xff] %vm51_vm0, %v4934_v60  ;;  %v4926_v48 = vadd.f32 %v5072_v43, %v4925_v47 }
 0xdfd   :  { %v5649_v52 = vpop.f32.mrf.mxu0 }
 0xdfe   :  { %4974 = vst.msk [vmem:[%s8026_s9 + $0x28] sm:$0xff] %vm51_vm0, %v4926_v48  ;;  %v4947_v59 = vadd.f32 %v5649_v52, %v5072_v43 }
 0xdff   :  { %v4938_v8 = vpop.f32.mrf.mxu0 }
 0xe00   :  { %4979 = vst.msk [vmem:[%s8026_s9 + $0x50] sm:$0xff] %vm51_vm0, %v4947_v59  ;;  %v4939_v37 = vadd.f32 %v5072_v43, %v4938_v8 }
 0xe01   :  { %v5650_v19 = vpop.f32.mrf.mxu0 }
 0xe02   :  { %4977 = vst.msk [vmem:[%s8026_s9 + $0x40] sm:$0xff] %vm51_vm0, %v4939_v37  ;;  %v4950_v53 = vadd.f32 %v5650_v19, %v5072_v43 }
 0xe03   :  { %v4941_v7 = vpop.f32.mrf.mxu0 }
 0xe04   :  { %4980 = vst.msk [vmem:[%s8026_s9 + $0x58] sm:$0xff] %vm51_vm0, %v4950_v53  ;;  %v4942_v61 = vadd.f32 %v5072_v43, %v4941_v7 }
 0xe06   :  { %4978 = vst.msk [vmem:[%s8026_s9 + $0x48] sm:$0xff] %vm51_vm0, %v4942_v61 }
 0xe3d   :  { %v5653_v34 = vpop.f32.mrf.mxu0 }
 0xe3e   :  { %v4963_v42 = vadd.f32 %v5653_v34, %v5072_v43 }
 0xe3f   :  { %v4954_v58 = vpop.f32.mrf.mxu0 }
 0xe40   :  { %4983 = vst.msk [vmem:[%s8026_s9 + $0x70] sm:$0xff] %vm51_vm0, %v4963_v42  ;;  %v4955_v16 = vadd.f32 %v5072_v43, %v4954_v58 }
 0xe41   :  { %v5654_v50 = vpop.f32.mrf.mxu0 }
 0xe42   :  { %4981 = vst.msk [vmem:[%s8026_s9 + $0x60] sm:$0xff] %vm51_vm0, %v4955_v16  ;;  %v4966_v44 = vadd.f32 %v5654_v50, %v5072_v43 }
 0xe43   :  { %v4957_v24 = vpop.f32.mrf.mxu0 }
 0xe44   :  { %4984 = vst.msk [vmem:[%s8026_s9 + $0x78] sm:$0xff] %vm51_vm0, %v4966_v44  ;;  %v4958_v56 = vadd.f32 %v5072_v43, %v4957_v24 }
 0xe46   :  { %4982 = vst.msk [vmem:[%s8026_s9 + $0x68] sm:$0xff] %vm51_vm0, %v4958_v56 }

</bundles_post_ra>
